<compile_context>
chip_gen: v7x
topology: tpu7x:2x2x1
jax: 0.10.0
libtpu: 0.0.40
codegen_flags: <defaults>
</compile_context>

<pallas_src>
import jax
import jax.numpy as jnp
import numpy as np
from jax.experimental import pallas as pl
from jax.experimental.pallas import tpu as pltpu

# ---------------- small, shape-consistent configuration ----------------
B = 2
H0, W0 = 16, 16                       # spatial size of unet feature outs[0]
C0, C1, C2, C3 = 32, 64, 64, 64       # scaled-down ldm_prior = [C0, C1, C2 + C3]
SUM_PRIOR = C0 + C1 + C2 + C3         # 224
OUT_DIM = 64
OUT_PAD = 128                         # lane-dense padded output channels
GN_GROUPS = 16                        # hardcoded in module: nn.GroupNorm(16, .)
EMB_DIM = 32
EMB_PAD = 128
NO_OF_CLASSES = 100
NCLS_PAD = 128
VIT_LOGITS = 1000                     # hardcoded in module: nn.Linear(1000, 400)
VIT_PAD = 1024
FC_HIDDEN = 400
FC_PAD = 512
GN_EPS = 1e-5

H1, W1 = H0 // 2, W0 // 2             # 8, 8
H2, W2 = H0 // 4, W0 // 4             # 4, 4
H3, W3 = H0 // 8, W0 // 8             # 2, 2
M0, M1, M2, M3 = H0 * W0, H1 * W1, H2 * W2, H3 * W3   # 256, 64, 16, 4
_GELU_C = 0.7978845608028654          # sqrt(2/pi)

# Guard against quadratic VMEM blow-up of the selection-matrix im2col (review item).
assert 9 * M1 * M0 * 2 <= 8 * 1024 * 1024, "g1 too large for one VMEM block; tile spatially"

# packed-constant row layout (all row offsets for 2-D sub-blocks are multiples of 8)
ROW_B1, ROW_GN1W, ROW_GN1B, ROW_B2, ROW_BL2, ROW_BOUT, ROW_GNOW, ROW_GNOB, ROW_FC2B = range(9)
P1_ROW0 = 16                          # (C0, C0) GroupNorm(16, C0) group-projection
PO_ROW0 = P1_ROW0 + C0                # (OUT_PAD, OUT_PAD) GroupNorm(16, OUT_DIM) group-projection
CONST_ROWS = PO_ROW0 + OUT_PAD        # 176


# ================================ fused Pallas kernel ================================

def _fused_encoder_kernel(f0_ref, f1_ref, f23_ref, vit_ref,
                          g1_ref, g2_ref, w12_ref, wl2_ref, wo_ref,
                          fc1q_ref, fc1aux_ref, fc2w_ref, emb_ref, cst_ref,
                          out_ref, cond_ref):
    f32, bf16 = jnp.float32, jnp.bfloat16

    def conv3x3_s2(x_bf16, g_ref, w_ref, w_row0, cin, m_out, bias):
        # im2col as ONE stacked-gather matmul: p = G_stack @ X, G_stack = [G_0; ...; G_8].
        p = jnp.dot(g_ref[...], x_bf16, preferred_element_type=f32)      # (9*m_out, cin)
        acc = bias                                                        # (1, cout) broadcast
        for t in range(9):                                                # static, aligned slices
            pt = p[t * m_out:(t + 1) * m_out, :].astype(bf16)
            wt = w_ref[w_row0 + t * cin:w_row0 + (t + 1) * cin, :]
            acc = acc + jnp.dot(pt, wt, preferred_element_type=f32)
        return acc

    def gn_relu(y, proj, gamma, beta):
        # per-image GroupNorm: sublane reduce -> (C,C) group-projection matmul (includes 1/count).
        s1 = jnp.sum(y, axis=0, keepdims=True)                            # (1, C)
        mean = jnp.dot(s1, proj, preferred_element_type=f32)              # (1, C)
        d = y - mean
        s2 = jnp.sum(d * d, axis=0, keepdims=True)
        var = jnp.dot(s2, proj, preferred_element_type=f32)
        return jnp.maximum(d * jax.lax.rsqrt(var + GN_EPS) * gamma + beta, 0.0)

    # ---- packed small constants (static slices) ----
    b1 = cst_ref[ROW_B1:ROW_B1 + 1, 0:C0]
    gn1w = cst_ref[ROW_GN1W:ROW_GN1W + 1, 0:C0]
    gn1b = cst_ref[ROW_GN1B:ROW_GN1B + 1, 0:C0]
    b2 = cst_ref[ROW_B2:ROW_B2 + 1, 0:C0]
    bl2 = cst_ref[ROW_BL2:ROW_BL2 + 1, 0:C1]
    bout = cst_ref[ROW_BOUT:ROW_BOUT + 1, :]
    gnow = cst_ref[ROW_GNOW:ROW_GNOW + 1, :]
    gnob = cst_ref[ROW_GNOB:ROW_GNOB + 1, :]
    fc2b = cst_ref[ROW_FC2B:ROW_FC2B + 1, :]
    p1 = cst_ref[P1_ROW0:P1_ROW0 + C0, 0:C0]                              # (32, 32)
    po = cst_ref[PO_ROW0:PO_ROW0 + OUT_PAD, :]                            # (128, 128)

    # ---- layer1: Conv3x3/s2 -> GroupNorm(16) -> ReLU -> Conv3x3/s2 ----
    h = conv3x3_s2(f0_ref[...], g1_ref, w12_ref, 0, C0, M1, b1)           # (M1, C0) f32
    h = gn_relu(h, p1, gn1w, gn1b)
    l1 = conv3x3_s2(h.astype(bf16), g2_ref, w12_ref, 9 * C0, C0, M2, b2)  # (M2, C0)

    # ---- layer2: Conv3x3/s2 ----
    l2 = conv3x3_s2(f1_ref[...], g2_ref, wl2_ref, 0, C1, M2, bl2)         # (M2, C1)

    # ---- out_layer Conv1x1 over the virtual concat [l1 | l2 | f2 | f3up] -> GN(16) -> ReLU ----
    y = (jnp.dot(l1.astype(bf16), wo_ref[0:C0, :], preferred_element_type=f32)
         + jnp.dot(l2.astype(bf16), wo_ref[C0:C0 + C1, :], preferred_element_type=f32)
         + jnp.dot(f23_ref[...], wo_ref[C0 + C1:SUM_PRIOR, :], preferred_element_type=f32)
         + bout)                                                          # (M2, OUT_PAD)
    # padded channels stay exactly 0: wo pad cols, bout/gnow/gnob pads and po pad rows are all 0
    y = gn_relu(y, po, gnow, gnob)
    out_ref[...] = y                                                      # dense 128-lane store

    # ---- CIDE head: Linear -> GELU -> Linear -> softmax -> @ embeddings ----
    xv = vit_ref[...]                                                     # (8, VIT_PAD) bf16
    w1fc = fc1q_ref[...].astype(bf16)                                     # int8 -> bf16 (exact)
    scale = fc1aux_ref[0:1, :]                                            # per-column dequant
    fc1b = fc1aux_ref[1:2, :]
    hfc = jnp.dot(xv, w1fc, preferred_element_type=f32) * scale + fc1b    # (8, FC_PAD)
    # tanh-approx GELU (EUP); deviates from PyTorch's exact-erf nn.GELU at the ~1e-3 level.
    hfc = 0.5 * hfc * (1.0 + jnp.tanh(_GELU_C * (hfc + 0.044715 * hfc * hfc * hfc)))
    z = jnp.dot(hfc.astype(bf16), fc2w_ref[...], preferred_element_type=f32) + fc2b
    cls_mask = jax.lax.broadcasted_iota(jnp.int32, z.shape, 1) < NO_OF_CLASSES
    z = jnp.where(cls_mask, z, -1e30)                                     # padded classes -> p=0
    z = z - jnp.max(z, axis=1, keepdims=True)
    e = jnp.exp(z)
    probs = e / jnp.sum(e, axis=1, keepdims=True)                         # exact softmax
    cond_ref[...] = jnp.dot(probs.astype(bf16), emb_ref[...],
                            preferred_element_type=f32)                   # (8, EMB_PAD)


# ================================ pallas_call glue ================================

def _per_batch_spec(arr):
    nd = arr.ndim
    return pl.BlockSpec((None,) + tuple(arr.shape[1:]),
                        lambda b, _n=nd: (b,) + (0,) * (_n - 1))


def _shared_spec(arr):
    nd = arr.ndim
    return pl.BlockSpec(tuple(arr.shape), lambda b, _n=nd: (0,) * _n)


def _fused_call(batch, f0, f1, f23, vit, p):
    shared = [p["g1"], p["g2"], p["w12"], p["wl2"], p["wo"],
              p["fc1_q"], p["fc1_aux"], p["fc2_w"], p["emb"], p["const"]]
    in_specs = ([_per_batch_spec(a) for a in (f0, f1, f23, vit)]
                + [_shared_spec(a) for a in shared])
    out_shape = (jax.ShapeDtypeStruct((batch, M2, OUT_PAD), jnp.float32),
                 jax.ShapeDtypeStruct((batch, 8, EMB_PAD), jnp.float32))
    out_specs = (pl.BlockSpec((None, M2, OUT_PAD), lambda b: (b, 0, 0)),
                 pl.BlockSpec((None, 8, EMB_PAD), lambda b: (b, 0, 0)))
    return pl.pallas_call(
        _fused_encoder_kernel,
        grid=(batch,),
        in_specs=in_specs,
        out_specs=out_specs,
        out_shape=out_shape,
        compiler_params=pltpu.CompilerParams(dimension_semantics=("parallel",)),
        cost_estimate=pl.CostEstimate(flops=50_000_000, transcendentals=12_000,
                                      bytes_accessed=2_200_000),
    )(f0, f1, f23, vit, *shared)


# ================================ constant builders (host-side) ================================

def _conv3x3_s2_gather_stacked(h, w):
    # PER-IMAGE (9*Ho*Wo, H*W) 0/1 selection matrix for Conv2d(k=3, s=2, p=1), tap-major rows.
    ho, wo = (h + 1) // 2, (w + 1) // 2
    g = np.zeros((9 * ho * wo, h * w), np.float32)
    for dy in range(3):
        for dx in range(3):
            t = dy * 3 + dx
            for i in range(ho):
                yi = 2 * i + dy - 1
                if not 0 <= yi < h:
                    continue
                for j in range(wo):
                    xj = 2 * j + dx - 1
                    if not 0 <= xj < w:
                        continue
                    g[t * ho * wo + i * wo + j, yi * w + xj] = 1.0
    return g


def _group_proj(c, groups, count, pad_to=None):
    # (C, C) projection: proj[c', c] = 1/count if same group else 0 (pad rows/cols are zero).
    gs = c // groups
    grp = np.arange(c) // gs
    proj = (grp[:, None] == grp[None, :]).astype(np.float32) / float(count)
    if pad_to is not None and pad_to > c:
        proj = np.pad(proj, ((0, pad_to - c), (0, pad_to - c)))
    return proj


def _conv_w_taps_stacked(w):
    # torch (Cout, Cin, 3, 3) -> (9*Cin, Cout), tap-major rows (t = dy*3 + dx).
    cout, cin, kh, kw = w.shape
    return jnp.transpose(w, (2, 3, 1, 0)).reshape(kh * kw * cin, cout)


def _quant_int8_cols(w):
    # symmetric per-output-column int8 quantization with f32 scales.
    amax = jnp.max(jnp.abs(w), axis=0, keepdims=True)
    scale = jnp.where(amax > 0, amax / 127.0, 1.0)
    q = jnp.clip(jnp.round(w / scale), -127, 127).astype(jnp.int8)
    return q, scale


# ================================ parameters ================================

def init_params(key):
    ks = iter(jax.random.split(key, 8))
    std = 0.02

    def tn(k, shape):
        # trunc_normal_(std=0.02) with +/-2 absolute cutoffs is effectively N(0, 0.02)
        return std * jax.random.normal(k, shape, jnp.float32)

    bf = lambda a: a.astype(jnp.bfloat16)
    p = {}

    # layer1 / layer2 conv weights (all conv & fc biases are zero: nn.init.constant_(m.bias, 0))
    w1 = _conv_w_taps_stacked(tn(next(ks), (C0, C0, 3, 3)))
    w2 = _conv_w_taps_stacked(tn(next(ks), (C0, C0, 3, 3)))
    p["w12"] = bf(jnp.concatenate([w1, w2], axis=0))                       # (576, 32)
    p["wl2"] = bf(_conv_w_taps_stacked(tn(next(ks), (C1, C1, 3, 3))))      # (576, 64)

    # out_layer: Conv(sum(ldm_prior), OUT_DIM, 1), padded to 128 output lanes
    wout = tn(next(ks), (OUT_DIM, SUM_PRIOR, 1, 1))[:, :, 0, 0]            # (OUT_DIM, SUM_PRIOR)
    p["wo"] = bf(jnp.pad(jnp.transpose(wout, (1, 0)),
                         ((0, 0), (0, OUT_PAD - OUT_DIM))))                # (224, 128)

    # CIDE head: fc1 int8 + per-column scales, fc2 / embeddings bf16 (lane-friendly padding)
    fc1 = jnp.pad(tn(next(ks), (VIT_LOGITS, FC_HIDDEN)),
                  ((0, VIT_PAD - VIT_LOGITS), (0, FC_PAD - FC_HIDDEN)))
    fc1_q, fc1_scale = _quant_int8_cols(fc1)
    p["fc1_q"] = fc1_q                                                     # (1024, 512) int8
    fc1_aux = jnp.zeros((8, FC_PAD), jnp.float32)
    fc1_aux = fc1_aux.at[0].set(fc1_scale[0])                              # row 0: dequant scales
    p["fc1_aux"] = fc1_aux                                                 # row 1: fc1 bias (=0)
    fc2 = tn(next(ks), (FC_HIDDEN, NO_OF_CLASSES))
    p["fc2_w"] = bf(jnp.pad(fc2, ((0, FC_PAD - FC_HIDDEN), (0, NCLS_PAD - NO_OF_CLASSES))))
    emb = jax.random.normal(next(ks), (NO_OF_CLASSES, EMB_DIM), jnp.float32)
    p["emb"] = bf(jnp.pad(emb, ((0, NCLS_PAD - NO_OF_CLASSES), (0, EMB_PAD - EMB_DIM))))
    p["gamma"] = 1e-4 * jnp.ones((EMB_DIM,), jnp.float32)  # EmbeddingAdapter consumer untranslatable

    # packed small constants: biases, GN affine, GN group-projection matrices
    cst = np.zeros((CONST_ROWS, OUT_PAD), np.float32)
    cst[ROW_GN1W, 0:C0] = 1.0                   # GroupNorm(16, C0) weight
    cst[ROW_GNOW, 0:OUT_DIM] = 1.0              # GroupNorm(16, OUT_DIM) weight (pad lanes stay 0)
    cst[P1_ROW0:P1_ROW0 + C0, 0:C0] = _group_proj(C0, GN_GROUPS, M1 * (C0 // GN_GROUPS))
    cst[PO_ROW0:PO_ROW0 + OUT_PAD, :] = _group_proj(OUT_DIM, GN_GROUPS,
                                                    M2 * (OUT_DIM // GN_GROUPS), pad_to=OUT_PAD)
    p["const"] = jnp.asarray(cst)                                          # (176, 128)

    # per-image structural constants (shared across the parallel B grid axis)
    p["g1"] = bf(jnp.asarray(_conv3x3_s2_gather_stacked(H0, W0)))          # (576, 256)
    p["g2"] = bf(jnp.asarray(_conv3x3_s2_gather_stacked(H1, W1)))          # (144, 64)
    return p


# ================================ forward pass ================================

def ecodepth_encoder_forward(params, x, unet_feats, vit_logits):
    """Mirror of EcoDepthEncoder.forward for the translatable compute.

    Returns ((out_layer(xx), outs[0]), conditioning_scene_embedding).
    """
    del x  # TODO(synk): encoder_vq.encode (SD VAE) + the frozen ViT processing of x are external modules.

    # TODO(synk): UNetWrapper(latents, t, c_crossattn=[cond]) is an external frozen SD UNet;
    # its 4 multiscale features are supplied as inputs.
    f0, f1, f2, f3 = unet_feats
    batch = f0.shape[0]
    rows = lambda a: jnp.transpose(a, (0, 2, 3, 1)).reshape(a.shape[0], -1, a.shape[1])
    f0_r = rows(f0).astype(jnp.bfloat16)                                   # (B, 256, 32)
    f1_r = rows(f1).astype(jnp.bfloat16)                                   # (B, 64, 64)
    # F.interpolate(outs[3], scale_factor=2, nearest) + channel concat with outs[2] (host-side,
    # per review: both operands are externally supplied, so one K=128 dot in the kernel).
    f3u = jnp.repeat(jnp.repeat(jnp.transpose(f3, (0, 2, 3, 1)), 2, axis=1), 2, axis=2)
    f23 = jnp.concatenate([rows(f2), f3u.reshape(batch, M2, C3)],
                          axis=-1).astype(jnp.bfloat16)                    # (B, 16, 128)
    vit_pad = jnp.pad(vit_logits, ((0, 0), (0, VIT_PAD - VIT_LOGITS)))
    vit_b = jnp.broadcast_to(vit_pad[:, None, :], (batch, 8, VIT_PAD)).astype(jnp.bfloat16)

    out_pad, cond_pad = _fused_call(batch, f0_r, f1_r, f23, vit_b, params)

    out = out_pad[:, :, :OUT_DIM].reshape(batch, H2, W2, OUT_DIM)
    out_nchw = jnp.transpose(out, (0, 3, 1, 2))
    cond = cond_pad[:, 0, :EMB_DIM]
    # TODO(synk): EmbeddingAdapter(class_embeddings, gamma) and the frozen SD UNet consumer of
    # `cond` have no in-script definition; `cond` (= class_probs @ embeddings) is returned as-is.
    return (out_nchw, f0), cond


# ================================ main ================================

if __name__ == "__main__":
    key = jax.random.PRNGKey(0)
    kp, kx, k0, k1, k2, k3, kv = jax.random.split(key, 7)
    params = init_params(kp)

    x = jax.random.normal(kx, (B, 3, 4 * H0, 4 * W0), jnp.float32)         # NCHW image input
    unet_feats = [                                                         # stand-ins for UNetWrapper outputs
        jax.random.normal(k0, (B, C0, H0, W0), jnp.float32),
        jax.random.normal(k1, (B, C1, H1, W1), jnp.float32),
        jax.random.normal(k2, (B, C2, H2, W2), jnp.float32),
        jax.random.normal(k3, (B, C3, H3, W3), jnp.float32),
    ]
    vit_logits = jax.random.normal(kv, (B, VIT_LOGITS), jnp.float32)       # stand-in for frozen ViT logits

    fwd = jax.jit(ecodepth_encoder_forward)
    (out, skip), cond = fwd(params, x, unet_feats, vit_logits)
    jax.block_until_ready((out, skip, cond))

    assert out.shape == (B, OUT_DIM, H2, W2)
    assert skip.shape == (B, C0, H0, W0)
    assert cond.shape == (B, EMB_DIM)
    assert bool(jnp.all(jnp.isfinite(out))) and bool(jnp.all(jnp.isfinite(cond)))
    print("KERNEL_OK")
</pallas_src>

<mosaic_0001>
module attributes {stable_mosaic.version = 11 : i64} {
  func.func @_fused_encoder_kernel(%arg0: i32, %arg1: memref<1x256x32xbf16, #tpu.memory_space<vmem>>, %arg2: memref<1x64x64xbf16, #tpu.memory_space<vmem>>, %arg3: memref<1x16x128xbf16, #tpu.memory_space<vmem>>, %arg4: memref<1x8x1024xbf16, #tpu.memory_space<vmem>>, %arg5: memref<576x256xbf16, #tpu.memory_space<vmem>>, %arg6: memref<144x64xbf16, #tpu.memory_space<vmem>>, %arg7: memref<576x32xbf16, #tpu.memory_space<vmem>>, %arg8: memref<576x64xbf16, #tpu.memory_space<vmem>>, %arg9: memref<224x128xbf16, #tpu.memory_space<vmem>>, %arg10: memref<1024x512xi8, #tpu.memory_space<vmem>>, %arg11: memref<8x512xf32, #tpu.memory_space<vmem>>, %arg12: memref<512x128xbf16, #tpu.memory_space<vmem>>, %arg13: memref<128x128xbf16, #tpu.memory_space<vmem>>, %arg14: memref<176x128xf32, #tpu.memory_space<vmem>>, %arg15: memref<1x16x128xf32, #tpu.memory_space<vmem>>, %arg16: memref<1x8x128xf32, #tpu.memory_space<vmem>>) attributes {dimension_semantics = [#tpu.dimension_semantics<parallel>], iteration_bounds = array<i64: 2>, scalar_prefetch = 0 : i64, scratch_operands = 0 : i64, tpu.core_type = #tpu.core_type<tc>, window_params = [{transform_indices = @transform_0, window_bounds = array<i64: 1, 256, 32>}, {transform_indices = @transform_1, window_bounds = array<i64: 1, 64, 64>}, {transform_indices = @transform_2, window_bounds = array<i64: 1, 16, 128>}, {transform_indices = @transform_3, window_bounds = array<i64: 1, 8, 1024>}, {pipeline_mode = #tpu.pipeline_mode<synchronous>, transform_indices = @transform_4, window_bounds = array<i64: 576, 256>}, {pipeline_mode = #tpu.pipeline_mode<synchronous>, transform_indices = @transform_5, window_bounds = array<i64: 144, 64>}, {pipeline_mode = #tpu.pipeline_mode<synchronous>, transform_indices = @transform_6, window_bounds = array<i64: 576, 32>}, {pipeline_mode = #tpu.pipeline_mode<synchronous>, transform_indices = @transform_7, window_bounds = array<i64: 576, 64>}, {pipeline_mode = #tpu.pipeline_mode<synchronous>, transform_indices = @transform_8, window_bounds = array<i64: 224, 128>}, {pipeline_mode = #tpu.pipeline_mode<synchronous>, transform_indices = @transform_9, window_bounds = array<i64: 1024, 512>}, {pipeline_mode = #tpu.pipeline_mode<synchronous>, transform_indices = @transform_10, window_bounds = array<i64: 8, 512>}, {pipeline_mode = #tpu.pipeline_mode<synchronous>, transform_indices = @transform_11, window_bounds = array<i64: 512, 128>}, {pipeline_mode = #tpu.pipeline_mode<synchronous>, transform_indices = @transform_12, window_bounds = array<i64: 128, 128>}, {pipeline_mode = #tpu.pipeline_mode<synchronous>, transform_indices = @transform_13, window_bounds = array<i64: 176, 128>}, {transform_indices = @transform_14, window_bounds = array<i64: 1, 16, 128>}, {transform_indices = @transform_15, window_bounds = array<i64: 1, 8, 128>}]} {
    %c0 = arith.constant 0 : index
    %c0_0 = arith.constant 0 : index
    %0 = vector.load %arg14[%c0, %c0_0] : memref<176x128xf32, #tpu.memory_space<vmem>>, vector<1x32xf32>
    %c1 = arith.constant 1 : index
    %c0_1 = arith.constant 0 : index
    %1 = vector.load %arg14[%c1, %c0_1] : memref<176x128xf32, #tpu.memory_space<vmem>>, vector<1x32xf32>
    %c2 = arith.constant 2 : index
    %c0_2 = arith.constant 0 : index
    %2 = vector.load %arg14[%c2, %c0_2] : memref<176x128xf32, #tpu.memory_space<vmem>>, vector<1x32xf32>
    %c3 = arith.constant 3 : index
    %c0_3 = arith.constant 0 : index
    %3 = vector.load %arg14[%c3, %c0_3] : memref<176x128xf32, #tpu.memory_space<vmem>>, vector<1x32xf32>
    %c4 = arith.constant 4 : index
    %c0_4 = arith.constant 0 : index
    %4 = vector.load %arg14[%c4, %c0_4] : memref<176x128xf32, #tpu.memory_space<vmem>>, vector<1x64xf32>
    %c5 = arith.constant 5 : index
    %c0_5 = arith.constant 0 : index
    %5 = vector.load %arg14[%c5, %c0_5] : memref<176x128xf32, #tpu.memory_space<vmem>>, vector<1x128xf32>
    %c6 = arith.constant 6 : index
    %c0_6 = arith.constant 0 : index
    %6 = vector.load %arg14[%c6, %c0_6] : memref<176x128xf32, #tpu.memory_space<vmem>>, vector<1x128xf32>
    %c7 = arith.constant 7 : index
    %c0_7 = arith.constant 0 : index
    %7 = vector.load %arg14[%c7, %c0_7] : memref<176x128xf32, #tpu.memory_space<vmem>>, vector<1x128xf32>
    %c8 = arith.constant 8 : index
    %c0_8 = arith.constant 0 : index
    %8 = vector.load %arg14[%c8, %c0_8] : memref<176x128xf32, #tpu.memory_space<vmem>>, vector<1x128xf32>
    %c16 = arith.constant 16 : index
    %c0_9 = arith.constant 0 : index
    %9 = vector.load %arg14[%c16, %c0_9] : memref<176x128xf32, #tpu.memory_space<vmem>>, vector<32x32xf32>
    %c48 = arith.constant 48 : index
    %c0_10 = arith.constant 0 : index
    %10 = vector.load %arg14[%c48, %c0_10] : memref<176x128xf32, #tpu.memory_space<vmem>>, vector<128x128xf32>
    %c0_11 = arith.constant 0 : index
    %c0_12 = arith.constant 0 : index
    %c0_13 = arith.constant 0 : index
    %11 = vector.load %arg1[%c0_11, %c0_12, %c0_13] : memref<1x256x32xbf16, #tpu.memory_space<vmem>>, vector<1x256x32xbf16>
    %12 = vector.shape_cast %11 : vector<1x256x32xbf16> to vector<256x32xbf16>
    %c0_14 = arith.constant 0 : index
    %c0_15 = arith.constant 0 : index
    %13 = vector.load %arg5[%c0_14, %c0_15] : memref<576x256xbf16, #tpu.memory_space<vmem>>, vector<576x256xbf16>
    %cst = arith.constant dense<0.000000e+00> : vector<576x32xf32>
    %14 = tpu.matmul %13, %12, %cst {dimension_numbers = #tpu.dot_dimension_numbers<[1], [0], [0], [1], [0, 0, 1, 1], [], []>} : vector<576x256xbf16>, vector<256x32xbf16>, vector<576x32xf32> -> vector<576x32xf32>
    %15 = vector.extract_strided_slice %14 {offsets = [0, 0], sizes = [64, 32], strides = [1, 1]} : vector<576x32xf32> to vector<64x32xf32>
    %16 = arith.truncf %15 : vector<64x32xf32> to vector<64x32xbf16>
    %c0_16 = arith.constant 0 : index
    %c0_17 = arith.constant 0 : index
    %17 = vector.load %arg7[%c0_16, %c0_17] : memref<576x32xbf16, #tpu.memory_space<vmem>>, vector<32x32xbf16>
    %cst_18 = arith.constant dense<0.000000e+00> : vector<64x32xf32>
    %18 = tpu.matmul %16, %17, %cst_18 {dimension_numbers = #tpu.dot_dimension_numbers<[1], [0], [0], [1], [0, 0, 1, 1], [], []>} : vector<64x32xbf16>, vector<32x32xbf16>, vector<64x32xf32> -> vector<64x32xf32>
    %19 = vector.broadcast %0 : vector<1x32xf32> to vector<64x32xf32>
    %20 = arith.addf %19, %18 : vector<64x32xf32>
    %21 = vector.extract_strided_slice %14 {offsets = [64, 0], sizes = [64, 32], strides = [1, 1]} : vector<576x32xf32> to vector<64x32xf32>
    %22 = arith.truncf %21 : vector<64x32xf32> to vector<64x32xbf16>
    %c32 = arith.constant 32 : index
    %c0_19 = arith.constant 0 : index
    %23 = vector.load %arg7[%c32, %c0_19] : memref<576x32xbf16, #tpu.memory_space<vmem>>, vector<32x32xbf16>
    %cst_20 = arith.constant dense<0.000000e+00> : vector<64x32xf32>
    %24 = tpu.matmul %22, %23, %cst_20 {dimension_numbers = #tpu.dot_dimension_numbers<[1], [0], [0], [1], [0, 0, 1, 1], [], []>} : vector<64x32xbf16>, vector<32x32xbf16>, vector<64x32xf32> -> vector<64x32xf32>
    %25 = arith.addf %20, %24 : vector<64x32xf32>
    %26 = vector.extract_strided_slice %14 {offsets = [128, 0], sizes = [64, 32], strides = [1, 1]} : vector<576x32xf32> to vector<64x32xf32>
    %27 = arith.truncf %26 : vector<64x32xf32> to vector<64x32xbf16>
    %c64 = arith.constant 64 : index
    %c0_21 = arith.constant 0 : index
    %28 = vector.load %arg7[%c64, %c0_21] : memref<576x32xbf16, #tpu.memory_space<vmem>>, vector<32x32xbf16>
    %cst_22 = arith.constant dense<0.000000e+00> : vector<64x32xf32>
    %29 = tpu.matmul %27, %28, %cst_22 {dimension_numbers = #tpu.dot_dimension_numbers<[1], [0], [0], [1], [0, 0, 1, 1], [], []>} : vector<64x32xbf16>, vector<32x32xbf16>, vector<64x32xf32> -> vector<64x32xf32>
    %30 = arith.addf %25, %29 : vector<64x32xf32>
    %31 = vector.extract_strided_slice %14 {offsets = [192, 0], sizes = [64, 32], strides = [1, 1]} : vector<576x32xf32> to vector<64x32xf32>
    %32 = arith.truncf %31 : vector<64x32xf32> to vector<64x32xbf16>
    %c96 = arith.constant 96 : index
    %c0_23 = arith.constant 0 : index
    %33 = vector.load %arg7[%c96, %c0_23] : memref<576x32xbf16, #tpu.memory_space<vmem>>, vector<32x32xbf16>
    %cst_24 = arith.constant dense<0.000000e+00> : vector<64x32xf32>
    %34 = tpu.matmul %32, %33, %cst_24 {dimension_numbers = #tpu.dot_dimension_numbers<[1], [0], [0], [1], [0, 0, 1, 1], [], []>} : vector<64x32xbf16>, vector<32x32xbf16>, vector<64x32xf32> -> vector<64x32xf32>
    %35 = arith.addf %30, %34 : vector<64x32xf32>
    %36 = vector.extract_strided_slice %14 {offsets = [256, 0], sizes = [64, 32], strides = [1, 1]} : vector<576x32xf32> to vector<64x32xf32>
    %37 = arith.truncf %36 : vector<64x32xf32> to vector<64x32xbf16>
    %c128 = arith.constant 128 : index
    %c0_25 = arith.constant 0 : index
    %38 = vector.load %arg7[%c128, %c0_25] : memref<576x32xbf16, #tpu.memory_space<vmem>>, vector<32x32xbf16>
    %cst_26 = arith.constant dense<0.000000e+00> : vector<64x32xf32>
    %39 = tpu.matmul %37, %38, %cst_26 {dimension_numbers = #tpu.dot_dimension_numbers<[1], [0], [0], [1], [0, 0, 1, 1], [], []>} : vector<64x32xbf16>, vector<32x32xbf16>, vector<64x32xf32> -> vector<64x32xf32>
    %40 = arith.addf %35, %39 : vector<64x32xf32>
    %41 = vector.extract_strided_slice %14 {offsets = [320, 0], sizes = [64, 32], strides = [1, 1]} : vector<576x32xf32> to vector<64x32xf32>
    %42 = arith.truncf %41 : vector<64x32xf32> to vector<64x32xbf16>
    %c160 = arith.constant 160 : index
    %c0_27 = arith.constant 0 : index
    %43 = vector.load %arg7[%c160, %c0_27] : memref<576x32xbf16, #tpu.memory_space<vmem>>, vector<32x32xbf16>
    %cst_28 = arith.constant dense<0.000000e+00> : vector<64x32xf32>
    %44 = tpu.matmul %42, %43, %cst_28 {dimension_numbers = #tpu.dot_dimension_numbers<[1], [0], [0], [1], [0, 0, 1, 1], [], []>} : vector<64x32xbf16>, vector<32x32xbf16>, vector<64x32xf32> -> vector<64x32xf32>
    %45 = arith.addf %40, %44 : vector<64x32xf32>
    %46 = vector.extract_strided_slice %14 {offsets = [384, 0], sizes = [64, 32], strides = [1, 1]} : vector<576x32xf32> to vector<64x32xf32>
    %47 = arith.truncf %46 : vector<64x32xf32> to vector<64x32xbf16>
    %c192 = arith.constant 192 : index
    %c0_29 = arith.constant 0 : index
    %48 = vector.load %arg7[%c192, %c0_29] : memref<576x32xbf16, #tpu.memory_space<vmem>>, vector<32x32xbf16>
    %cst_30 = arith.constant dense<0.000000e+00> : vector<64x32xf32>
    %49 = tpu.matmul %47, %48, %cst_30 {dimension_numbers = #tpu.dot_dimension_numbers<[1], [0], [0], [1], [0, 0, 1, 1], [], []>} : vector<64x32xbf16>, vector<32x32xbf16>, vector<64x32xf32> -> vector<64x32xf32>
    %50 = arith.addf %45, %49 : vector<64x32xf32>
    %51 = vector.extract_strided_slice %14 {offsets = [448, 0], sizes = [64, 32], strides = [1, 1]} : vector<576x32xf32> to vector<64x32xf32>
    %52 = arith.truncf %51 : vector<64x32xf32> to vector<64x32xbf16>
    %c224 = arith.constant 224 : index
    %c0_31 = arith.constant 0 : index
    %53 = vector.load %arg7[%c224, %c0_31] : memref<576x32xbf16, #tpu.memory_space<vmem>>, vector<32x32xbf16>
    %cst_32 = arith.constant dense<0.000000e+00> : vector<64x32xf32>
    %54 = tpu.matmul %52, %53, %cst_32 {dimension_numbers = #tpu.dot_dimension_numbers<[1], [0], [0], [1], [0, 0, 1, 1], [], []>} : vector<64x32xbf16>, vector<32x32xbf16>, vector<64x32xf32> -> vector<64x32xf32>
    %55 = arith.addf %50, %54 : vector<64x32xf32>
    %56 = vector.extract_strided_slice %14 {offsets = [512, 0], sizes = [64, 32], strides = [1, 1]} : vector<576x32xf32> to vector<64x32xf32>
    %57 = arith.truncf %56 : vector<64x32xf32> to vector<64x32xbf16>
    %c256 = arith.constant 256 : index
    %c0_33 = arith.constant 0 : index
    %58 = vector.load %arg7[%c256, %c0_33] : memref<576x32xbf16, #tpu.memory_space<vmem>>, vector<32x32xbf16>
    %cst_34 = arith.constant dense<0.000000e+00> : vector<64x32xf32>
    %59 = tpu.matmul %57, %58, %cst_34 {dimension_numbers = #tpu.dot_dimension_numbers<[1], [0], [0], [1], [0, 0, 1, 1], [], []>} : vector<64x32xbf16>, vector<32x32xbf16>, vector<64x32xf32> -> vector<64x32xf32>
    %60 = arith.addf %55, %59 : vector<64x32xf32>
    %cst_35 = arith.constant dense<0.000000e+00> : vector<32xf32>
    %61 = vector.multi_reduction <add>, %60, %cst_35 [0] : vector<64x32xf32> to vector<32xf32>
    %62 = vector.shape_cast %61 : vector<32xf32> to vector<1x32xf32>
    %cst_36 = arith.constant dense<0.000000e+00> : vector<1x32xf32>
    %63 = tpu.matmul %62, %9, %cst_36 {dimension_numbers = #tpu.dot_dimension_numbers<[1], [0], [0], [1], [0, 0, 1, 1], [], []>} : vector<1x32xf32>, vector<32x32xf32>, vector<1x32xf32> -> vector<1x32xf32>
    %64 = vector.broadcast %63 : vector<1x32xf32> to vector<64x32xf32>
    %65 = arith.subf %60, %64 : vector<64x32xf32>
    %66 = arith.mulf %65, %65 : vector<64x32xf32>
    %cst_37 = arith.constant dense<0.000000e+00> : vector<32xf32>
    %67 = vector.multi_reduction <add>, %66, %cst_37 [0] : vector<64x32xf32> to vector<32xf32>
    %68 = vector.shape_cast %67 : vector<32xf32> to vector<1x32xf32>
    %cst_38 = arith.constant dense<0.000000e+00> : vector<1x32xf32>
    %69 = tpu.matmul %68, %9, %cst_38 {dimension_numbers = #tpu.dot_dimension_numbers<[1], [0], [0], [1], [0, 0, 1, 1], [], []>} : vector<1x32xf32>, vector<32x32xf32>, vector<1x32xf32> -> vector<1x32xf32>
    %cst_39 = arith.constant 9.99999974E-6 : f32
    %70 = vector.broadcast %cst_39 : f32 to vector<1x32xf32>
    %71 = arith.addf %69, %70 : vector<1x32xf32>
    %72 = math.rsqrt %71 : vector<1x32xf32>
    %73 = vector.broadcast %72 : vector<1x32xf32> to vector<64x32xf32>
    %74 = arith.mulf %65, %73 : vector<64x32xf32>
    %75 = vector.broadcast %1 : vector<1x32xf32> to vector<64x32xf32>
    %76 = arith.mulf %74, %75 : vector<64x32xf32>
    %77 = vector.broadcast %2 : vector<1x32xf32> to vector<64x32xf32>
    %78 = arith.addf %76, %77 : vector<64x32xf32>
    %cst_40 = arith.constant 0.000000e+00 : f32
    %79 = vector.broadcast %cst_40 : f32 to vector<64x32xf32>
    %80 = arith.maximumf %78, %79 : vector<64x32xf32>
    %81 = arith.truncf %80 : vector<64x32xf32> to vector<64x32xbf16>
    %c0_41 = arith.constant 0 : index
    %c0_42 = arith.constant 0 : index
    %82 = vector.load %arg6[%c0_41, %c0_42] : memref<144x64xbf16, #tpu.memory_space<vmem>>, vector<144x64xbf16>
    %cst_43 = arith.constant dense<0.000000e+00> : vector<144x32xf32>
    %83 = tpu.matmul %82, %81, %cst_43 {dimension_numbers = #tpu.dot_dimension_numbers<[1], [0], [0], [1], [0, 0, 1, 1], [], []>} : vector<144x64xbf16>, vector<64x32xbf16>, vector<144x32xf32> -> vector<144x32xf32>
    %84 = vector.extract_strided_slice %83 {offsets = [0, 0], sizes = [16, 32], strides = [1, 1]} : vector<144x32xf32> to vector<16x32xf32>
    %85 = arith.truncf %84 : vector<16x32xf32> to vector<16x32xbf16>
    %c288 = arith.constant 288 : index
    %c0_44 = arith.constant 0 : index
    %86 = vector.load %arg7[%c288, %c0_44] : memref<576x32xbf16, #tpu.memory_space<vmem>>, vector<32x32xbf16>
    %cst_45 = arith.constant dense<0.000000e+00> : vector<16x32xf32>
    %87 = tpu.matmul %85, %86, %cst_45 {dimension_numbers = #tpu.dot_dimension_numbers<[1], [0], [0], [1], [0, 0, 1, 1], [], []>} : vector<16x32xbf16>, vector<32x32xbf16>, vector<16x32xf32> -> vector<16x32xf32>
    %88 = vector.broadcast %3 : vector<1x32xf32> to vector<16x32xf32>
    %89 = arith.addf %88, %87 : vector<16x32xf32>
    %90 = vector.extract_strided_slice %83 {offsets = [16, 0], sizes = [16, 32], strides = [1, 1]} : vector<144x32xf32> to vector<16x32xf32>
    %91 = arith.truncf %90 : vector<16x32xf32> to vector<16x32xbf16>
    %c320 = arith.constant 320 : index
    %c0_46 = arith.constant 0 : index
    %92 = vector.load %arg7[%c320, %c0_46] : memref<576x32xbf16, #tpu.memory_space<vmem>>, vector<32x32xbf16>
    %cst_47 = arith.constant dense<0.000000e+00> : vector<16x32xf32>
    %93 = tpu.matmul %91, %92, %cst_47 {dimension_numbers = #tpu.dot_dimension_numbers<[1], [0], [0], [1], [0, 0, 1, 1], [], []>} : vector<16x32xbf16>, vector<32x32xbf16>, vector<16x32xf32> -> vector<16x32xf32>
    %94 = arith.addf %89, %93 : vector<16x32xf32>
    %95 = vector.extract_strided_slice %83 {offsets = [32, 0], sizes = [16, 32], strides = [1, 1]} : vector<144x32xf32> to vector<16x32xf32>
    %96 = arith.truncf %95 : vector<16x32xf32> to vector<16x32xbf16>
    %c352 = arith.constant 352 : index
    %c0_48 = arith.constant 0 : index
    %97 = vector.load %arg7[%c352, %c0_48] : memref<576x32xbf16, #tpu.memory_space<vmem>>, vector<32x32xbf16>
    %cst_49 = arith.constant dense<0.000000e+00> : vector<16x32xf32>
    %98 = tpu.matmul %96, %97, %cst_49 {dimension_numbers = #tpu.dot_dimension_numbers<[1], [0], [0], [1], [0, 0, 1, 1], [], []>} : vector<16x32xbf16>, vector<32x32xbf16>, vector<16x32xf32> -> vector<16x32xf32>
    %99 = arith.addf %94, %98 : vector<16x32xf32>
    %100 = vector.extract_strided_slice %83 {offsets = [48, 0], sizes = [16, 32], strides = [1, 1]} : vector<144x32xf32> to vector<16x32xf32>
    %101 = arith.truncf %100 : vector<16x32xf32> to vector<16x32xbf16>
    %c384 = arith.constant 384 : index
    %c0_50 = arith.constant 0 : index
    %102 = vector.load %arg7[%c384, %c0_50] : memref<576x32xbf16, #tpu.memory_space<vmem>>, vector<32x32xbf16>
    %cst_51 = arith.constant dense<0.000000e+00> : vector<16x32xf32>
    %103 = tpu.matmul %101, %102, %cst_51 {dimension_numbers = #tpu.dot_dimension_numbers<[1], [0], [0], [1], [0, 0, 1, 1], [], []>} : vector<16x32xbf16>, vector<32x32xbf16>, vector<16x32xf32> -> vector<16x32xf32>
    %104 = arith.addf %99, %103 : vector<16x32xf32>
    %105 = vector.extract_strided_slice %83 {offsets = [64, 0], sizes = [16, 32], strides = [1, 1]} : vector<144x32xf32> to vector<16x32xf32>
    %106 = arith.truncf %105 : vector<16x32xf32> to vector<16x32xbf16>
    %c416 = arith.constant 416 : index
    %c0_52 = arith.constant 0 : index
    %107 = vector.load %arg7[%c416, %c0_52] : memref<576x32xbf16, #tpu.memory_space<vmem>>, vector<32x32xbf16>
    %cst_53 = arith.constant dense<0.000000e+00> : vector<16x32xf32>
    %108 = tpu.matmul %106, %107, %cst_53 {dimension_numbers = #tpu.dot_dimension_numbers<[1], [0], [0], [1], [0, 0, 1, 1], [], []>} : vector<16x32xbf16>, vector<32x32xbf16>, vector<16x32xf32> -> vector<16x32xf32>
    %109 = arith.addf %104, %108 : vector<16x32xf32>
    %110 = vector.extract_strided_slice %83 {offsets = [80, 0], sizes = [16, 32], strides = [1, 1]} : vector<144x32xf32> to vector<16x32xf32>
    %111 = arith.truncf %110 : vector<16x32xf32> to vector<16x32xbf16>
    %c448 = arith.constant 448 : index
    %c0_54 = arith.constant 0 : index
    %112 = vector.load %arg7[%c448, %c0_54] : memref<576x32xbf16, #tpu.memory_space<vmem>>, vector<32x32xbf16>
    %cst_55 = arith.constant dense<0.000000e+00> : vector<16x32xf32>
    %113 = tpu.matmul %111, %112, %cst_55 {dimension_numbers = #tpu.dot_dimension_numbers<[1], [0], [0], [1], [0, 0, 1, 1], [], []>} : vector<16x32xbf16>, vector<32x32xbf16>, vector<16x32xf32> -> vector<16x32xf32>
    %114 = arith.addf %109, %113 : vector<16x32xf32>
    %115 = vector.extract_strided_slice %83 {offsets = [96, 0], sizes = [16, 32], strides = [1, 1]} : vector<144x32xf32> to vector<16x32xf32>
    %116 = arith.truncf %115 : vector<16x32xf32> to vector<16x32xbf16>
    %c480 = arith.constant 480 : index
    %c0_56 = arith.constant 0 : index
    %117 = vector.load %arg7[%c480, %c0_56] : memref<576x32xbf16, #tpu.memory_space<vmem>>, vector<32x32xbf16>
    %cst_57 = arith.constant dense<0.000000e+00> : vector<16x32xf32>
    %118 = tpu.matmul %116, %117, %cst_57 {dimension_numbers = #tpu.dot_dimension_numbers<[1], [0], [0], [1], [0, 0, 1, 1], [], []>} : vector<16x32xbf16>, vector<32x32xbf16>, vector<16x32xf32> -> vector<16x32xf32>
    %119 = arith.addf %114, %118 : vector<16x32xf32>
    %120 = vector.extract_strided_slice %83 {offsets = [112, 0], sizes = [16, 32], strides = [1, 1]} : vector<144x32xf32> to vector<16x32xf32>
    %121 = arith.truncf %120 : vector<16x32xf32> to vector<16x32xbf16>
    %c512 = arith.constant 512 : index
    %c0_58 = arith.constant 0 : index
    %122 = vector.load %arg7[%c512, %c0_58] : memref<576x32xbf16, #tpu.memory_space<vmem>>, vector<32x32xbf16>
    %cst_59 = arith.constant dense<0.000000e+00> : vector<16x32xf32>
    %123 = tpu.matmul %121, %122, %cst_59 {dimension_numbers = #tpu.dot_dimension_numbers<[1], [0], [0], [1], [0, 0, 1, 1], [], []>} : vector<16x32xbf16>, vector<32x32xbf16>, vector<16x32xf32> -> vector<16x32xf32>
    %124 = arith.addf %119, %123 : vector<16x32xf32>
    %125 = vector.extract_strided_slice %83 {offsets = [128, 0], sizes = [16, 32], strides = [1, 1]} : vector<144x32xf32> to vector<16x32xf32>
    %126 = arith.truncf %125 : vector<16x32xf32> to vector<16x32xbf16>
    %c544 = arith.constant 544 : index
    %c0_60 = arith.constant 0 : index
    %127 = vector.load %arg7[%c544, %c0_60] : memref<576x32xbf16, #tpu.memory_space<vmem>>, vector<32x32xbf16>
    %cst_61 = arith.constant dense<0.000000e+00> : vector<16x32xf32>
    %128 = tpu.matmul %126, %127, %cst_61 {dimension_numbers = #tpu.dot_dimension_numbers<[1], [0], [0], [1], [0, 0, 1, 1], [], []>} : vector<16x32xbf16>, vector<32x32xbf16>, vector<16x32xf32> -> vector<16x32xf32>
    %129 = arith.addf %124, %128 : vector<16x32xf32>
    %c0_62 = arith.constant 0 : index
    %c0_63 = arith.constant 0 : index
    %c0_64 = arith.constant 0 : index
    %130 = vector.load %arg2[%c0_62, %c0_63, %c0_64] : memref<1x64x64xbf16, #tpu.memory_space<vmem>>, vector<1x64x64xbf16>
    %131 = vector.shape_cast %130 : vector<1x64x64xbf16> to vector<64x64xbf16>
    %c0_65 = arith.constant 0 : index
    %c0_66 = arith.constant 0 : index
    %132 = vector.load %arg6[%c0_65, %c0_66] : memref<144x64xbf16, #tpu.memory_space<vmem>>, vector<144x64xbf16>
    %cst_67 = arith.constant dense<0.000000e+00> : vector<144x64xf32>
    %133 = tpu.matmul %132, %131, %cst_67 {dimension_numbers = #tpu.dot_dimension_numbers<[1], [0], [0], [1], [0, 0, 1, 1], [], []>} : vector<144x64xbf16>, vector<64x64xbf16>, vector<144x64xf32> -> vector<144x64xf32>
    %134 = vector.extract_strided_slice %133 {offsets = [0, 0], sizes = [16, 64], strides = [1, 1]} : vector<144x64xf32> to vector<16x64xf32>
    %135 = arith.truncf %134 : vector<16x64xf32> to vector<16x64xbf16>
    %c0_68 = arith.constant 0 : index
    %c0_69 = arith.constant 0 : index
    %136 = vector.load %arg8[%c0_68, %c0_69] : memref<576x64xbf16, #tpu.memory_space<vmem>>, vector<64x64xbf16>
    %cst_70 = arith.constant dense<0.000000e+00> : vector<16x64xf32>
    %137 = tpu.matmul %135, %136, %cst_70 {dimension_numbers = #tpu.dot_dimension_numbers<[1], [0], [0], [1], [0, 0, 1, 1], [], []>} : vector<16x64xbf16>, vector<64x64xbf16>, vector<16x64xf32> -> vector<16x64xf32>
    %138 = vector.broadcast %4 : vector<1x64xf32> to vector<16x64xf32>
    %139 = arith.addf %138, %137 : vector<16x64xf32>
    %140 = vector.extract_strided_slice %133 {offsets = [16, 0], sizes = [16, 64], strides = [1, 1]} : vector<144x64xf32> to vector<16x64xf32>
    %141 = arith.truncf %140 : vector<16x64xf32> to vector<16x64xbf16>
    %c64_71 = arith.constant 64 : index
    %c0_72 = arith.constant 0 : index
    %142 = vector.load %arg8[%c64_71, %c0_72] : memref<576x64xbf16, #tpu.memory_space<vmem>>, vector<64x64xbf16>
    %cst_73 = arith.constant dense<0.000000e+00> : vector<16x64xf32>
    %143 = tpu.matmul %141, %142, %cst_73 {dimension_numbers = #tpu.dot_dimension_numbers<[1], [0], [0], [1], [0, 0, 1, 1], [], []>} : vector<16x64xbf16>, vector<64x64xbf16>, vector<16x64xf32> -> vector<16x64xf32>
    %144 = arith.addf %139, %143 : vector<16x64xf32>
    %145 = vector.extract_strided_slice %133 {offsets = [32, 0], sizes = [16, 64], strides = [1, 1]} : vector<144x64xf32> to vector<16x64xf32>
    %146 = arith.truncf %145 : vector<16x64xf32> to vector<16x64xbf16>
    %c128_74 = arith.constant 128 : index
    %c0_75 = arith.constant 0 : index
    %147 = vector.load %arg8[%c128_74, %c0_75] : memref<576x64xbf16, #tpu.memory_space<vmem>>, vector<64x64xbf16>
    %cst_76 = arith.constant dense<0.000000e+00> : vector<16x64xf32>
    %148 = tpu.matmul %146, %147, %cst_76 {dimension_numbers = #tpu.dot_dimension_numbers<[1], [0], [0], [1], [0, 0, 1, 1], [], []>} : vector<16x64xbf16>, vector<64x64xbf16>, vector<16x64xf32> -> vector<16x64xf32>
    %149 = arith.addf %144, %148 : vector<16x64xf32>
    %150 = vector.extract_strided_slice %133 {offsets = [48, 0], sizes = [16, 64], strides = [1, 1]} : vector<144x64xf32> to vector<16x64xf32>
    %151 = arith.truncf %150 : vector<16x64xf32> to vector<16x64xbf16>
    %c192_77 = arith.constant 192 : index
    %c0_78 = arith.constant 0 : index
    %152 = vector.load %arg8[%c192_77, %c0_78] : memref<576x64xbf16, #tpu.memory_space<vmem>>, vector<64x64xbf16>
    %cst_79 = arith.constant dense<0.000000e+00> : vector<16x64xf32>
    %153 = tpu.matmul %151, %152, %cst_79 {dimension_numbers = #tpu.dot_dimension_numbers<[1], [0], [0], [1], [0, 0, 1, 1], [], []>} : vector<16x64xbf16>, vector<64x64xbf16>, vector<16x64xf32> -> vector<16x64xf32>
    %154 = arith.addf %149, %153 : vector<16x64xf32>
    %155 = vector.extract_strided_slice %133 {offsets = [64, 0], sizes = [16, 64], strides = [1, 1]} : vector<144x64xf32> to vector<16x64xf32>
    %156 = arith.truncf %155 : vector<16x64xf32> to vector<16x64xbf16>
    %c256_80 = arith.constant 256 : index
    %c0_81 = arith.constant 0 : index
    %157 = vector.load %arg8[%c256_80, %c0_81] : memref<576x64xbf16, #tpu.memory_space<vmem>>, vector<64x64xbf16>
    %cst_82 = arith.constant dense<0.000000e+00> : vector<16x64xf32>
    %158 = tpu.matmul %156, %157, %cst_82 {dimension_numbers = #tpu.dot_dimension_numbers<[1], [0], [0], [1], [0, 0, 1, 1], [], []>} : vector<16x64xbf16>, vector<64x64xbf16>, vector<16x64xf32> -> vector<16x64xf32>
    %159 = arith.addf %154, %158 : vector<16x64xf32>
    %160 = vector.extract_strided_slice %133 {offsets = [80, 0], sizes = [16, 64], strides = [1, 1]} : vector<144x64xf32> to vector<16x64xf32>
    %161 = arith.truncf %160 : vector<16x64xf32> to vector<16x64xbf16>
    %c320_83 = arith.constant 320 : index
    %c0_84 = arith.constant 0 : index
    %162 = vector.load %arg8[%c320_83, %c0_84] : memref<576x64xbf16, #tpu.memory_space<vmem>>, vector<64x64xbf16>
    %cst_85 = arith.constant dense<0.000000e+00> : vector<16x64xf32>
    %163 = tpu.matmul %161, %162, %cst_85 {dimension_numbers = #tpu.dot_dimension_numbers<[1], [0], [0], [1], [0, 0, 1, 1], [], []>} : vector<16x64xbf16>, vector<64x64xbf16>, vector<16x64xf32> -> vector<16x64xf32>
    %164 = arith.addf %159, %163 : vector<16x64xf32>
    %165 = vector.extract_strided_slice %133 {offsets = [96, 0], sizes = [16, 64], strides = [1, 1]} : vector<144x64xf32> to vector<16x64xf32>
    %166 = arith.truncf %165 : vector<16x64xf32> to vector<16x64xbf16>
    %c384_86 = arith.constant 384 : index
    %c0_87 = arith.constant 0 : index
    %167 = vector.load %arg8[%c384_86, %c0_87] : memref<576x64xbf16, #tpu.memory_space<vmem>>, vector<64x64xbf16>
    %cst_88 = arith.constant dense<0.000000e+00> : vector<16x64xf32>
    %168 = tpu.matmul %166, %167, %cst_88 {dimension_numbers = #tpu.dot_dimension_numbers<[1], [0], [0], [1], [0, 0, 1, 1], [], []>} : vector<16x64xbf16>, vector<64x64xbf16>, vector<16x64xf32> -> vector<16x64xf32>
    %169 = arith.addf %164, %168 : vector<16x64xf32>
    %170 = vector.extract_strided_slice %133 {offsets = [112, 0], sizes = [16, 64], strides = [1, 1]} : vector<144x64xf32> to vector<16x64xf32>
    %171 = arith.truncf %170 : vector<16x64xf32> to vector<16x64xbf16>
    %c448_89 = arith.constant 448 : index
    %c0_90 = arith.constant 0 : index
    %172 = vector.load %arg8[%c448_89, %c0_90] : memref<576x64xbf16, #tpu.memory_space<vmem>>, vector<64x64xbf16>
    %cst_91 = arith.constant dense<0.000000e+00> : vector<16x64xf32>
    %173 = tpu.matmul %171, %172, %cst_91 {dimension_numbers = #tpu.dot_dimension_numbers<[1], [0], [0], [1], [0, 0, 1, 1], [], []>} : vector<16x64xbf16>, vector<64x64xbf16>, vector<16x64xf32> -> vector<16x64xf32>
    %174 = arith.addf %169, %173 : vector<16x64xf32>
    %175 = vector.extract_strided_slice %133 {offsets = [128, 0], sizes = [16, 64], strides = [1, 1]} : vector<144x64xf32> to vector<16x64xf32>
    %176 = arith.truncf %175 : vector<16x64xf32> to vector<16x64xbf16>
    %c512_92 = arith.constant 512 : index
    %c0_93 = arith.constant 0 : index
    %177 = vector.load %arg8[%c512_92, %c0_93] : memref<576x64xbf16, #tpu.memory_space<vmem>>, vector<64x64xbf16>
    %cst_94 = arith.constant dense<0.000000e+00> : vector<16x64xf32>
    %178 = tpu.matmul %176, %177, %cst_94 {dimension_numbers = #tpu.dot_dimension_numbers<[1], [0], [0], [1], [0, 0, 1, 1], [], []>} : vector<16x64xbf16>, vector<64x64xbf16>, vector<16x64xf32> -> vector<16x64xf32>
    %179 = arith.addf %174, %178 : vector<16x64xf32>
    %180 = arith.truncf %129 : vector<16x32xf32> to vector<16x32xbf16>
    %c0_95 = arith.constant 0 : index
    %c0_96 = arith.constant 0 : index
    %181 = vector.load %arg9[%c0_95, %c0_96] : memref<224x128xbf16, #tpu.memory_space<vmem>>, vector<32x128xbf16>
    %cst_97 = arith.constant dense<0.000000e+00> : vector<16x128xf32>
    %182 = tpu.matmul %180, %181, %cst_97 {dimension_numbers = #tpu.dot_dimension_numbers<[1], [0], [0], [1], [0, 0, 1, 1], [], []>} : vector<16x32xbf16>, vector<32x128xbf16>, vector<16x128xf32> -> vector<16x128xf32>
    %183 = arith.truncf %179 : vector<16x64xf32> to vector<16x64xbf16>
    %c32_98 = arith.constant 32 : index
    %c0_99 = arith.constant 0 : index
    %184 = vector.load %arg9[%c32_98, %c0_99] : memref<224x128xbf16, #tpu.memory_space<vmem>>, vector<64x128xbf16>
    %cst_100 = arith.constant dense<0.000000e+00> : vector<16x128xf32>
    %185 = tpu.matmul %183, %184, %cst_100 {dimension_numbers = #tpu.dot_dimension_numbers<[1], [0], [0], [1], [0, 0, 1, 1], [], []>} : vector<16x64xbf16>, vector<64x128xbf16>, vector<16x128xf32> -> vector<16x128xf32>
    %186 = arith.addf %182, %185 : vector<16x128xf32>
    %c0_101 = arith.constant 0 : index
    %c0_102 = arith.constant 0 : index
    %c0_103 = arith.constant 0 : index
    %187 = vector.load %arg3[%c0_101, %c0_102, %c0_103] : memref<1x16x128xbf16, #tpu.memory_space<vmem>>, vector<1x16x128xbf16>
    %188 = vector.shape_cast %187 : vector<1x16x128xbf16> to vector<16x128xbf16>
    %c96_104 = arith.constant 96 : index
    %c0_105 = arith.constant 0 : index
    %189 = vector.load %arg9[%c96_104, %c0_105] : memref<224x128xbf16, #tpu.memory_space<vmem>>, vector<128x128xbf16>
    %cst_106 = arith.constant dense<0.000000e+00> : vector<16x128xf32>
    %190 = tpu.matmul %188, %189, %cst_106 {dimension_numbers = #tpu.dot_dimension_numbers<[1], [0], [0], [1], [0, 0, 1, 1], [], []>} : vector<16x128xbf16>, vector<128x128xbf16>, vector<16x128xf32> -> vector<16x128xf32>
    %191 = arith.addf %186, %190 : vector<16x128xf32>
    %192 = vector.broadcast %5 : vector<1x128xf32> to vector<16x128xf32>
    %193 = arith.addf %191, %192 : vector<16x128xf32>
    %cst_107 = arith.constant dense<0.000000e+00> : vector<128xf32>
    %194 = vector.multi_reduction <add>, %193, %cst_107 [0] : vector<16x128xf32> to vector<128xf32>
    %195 = vector.shape_cast %194 : vector<128xf32> to vector<1x128xf32>
    %cst_108 = arith.constant dense<0.000000e+00> : vector<1x128xf32>
    %196 = tpu.matmul %195, %10, %cst_108 {dimension_numbers = #tpu.dot_dimension_numbers<[1], [0], [0], [1], [0, 0, 1, 1], [], []>} : vector<1x128xf32>, vector<128x128xf32>, vector<1x128xf32> -> vector<1x128xf32>
    %197 = vector.broadcast %196 : vector<1x128xf32> to vector<16x128xf32>
    %198 = arith.subf %193, %197 : vector<16x128xf32>
    %199 = arith.mulf %198, %198 : vector<16x128xf32>
    %cst_109 = arith.constant dense<0.000000e+00> : vector<128xf32>
    %200 = vector.multi_reduction <add>, %199, %cst_109 [0] : vector<16x128xf32> to vector<128xf32>
    %201 = vector.shape_cast %200 : vector<128xf32> to vector<1x128xf32>
    %cst_110 = arith.constant dense<0.000000e+00> : vector<1x128xf32>
    %202 = tpu.matmul %201, %10, %cst_110 {dimension_numbers = #tpu.dot_dimension_numbers<[1], [0], [0], [1], [0, 0, 1, 1], [], []>} : vector<1x128xf32>, vector<128x128xf32>, vector<1x128xf32> -> vector<1x128xf32>
    %cst_111 = arith.constant 9.99999974E-6 : f32
    %203 = vector.broadcast %cst_111 : f32 to vector<1x128xf32>
    %204 = arith.addf %202, %203 : vector<1x128xf32>
    %205 = math.rsqrt %204 : vector<1x128xf32>
    %206 = vector.broadcast %205 : vector<1x128xf32> to vector<16x128xf32>
    %207 = arith.mulf %198, %206 : vector<16x128xf32>
    %208 = vector.broadcast %6 : vector<1x128xf32> to vector<16x128xf32>
    %209 = arith.mulf %207, %208 : vector<16x128xf32>
    %210 = vector.broadcast %7 : vector<1x128xf32> to vector<16x128xf32>
    %211 = arith.addf %209, %210 : vector<16x128xf32>
    %cst_112 = arith.constant 0.000000e+00 : f32
    %212 = vector.broadcast %cst_112 : f32 to vector<16x128xf32>
    %213 = arith.maximumf %211, %212 : vector<16x128xf32>
    %c0_113 = arith.constant 0 : index
    %c0_114 = arith.constant 0 : index
    %c0_115 = arith.constant 0 : index
    %214 = vector.load %arg15[%c0_113, %c0_114, %c0_115] : memref<1x16x128xf32, #tpu.memory_space<vmem>>, vector<1x16x128xf32>
    %215 = vector.shape_cast %214 : vector<1x16x128xf32> to vector<16x128xf32>
    %216 = vector.shape_cast %213 : vector<16x128xf32> to vector<1x16x128xf32>
    tpu.vector_store %arg15[%c0_113, %c0_114, %c0_115], %216 {strides = array<i32>} : memref<1x16x128xf32, #tpu.memory_space<vmem>>, vector<1x16x128xf32>,
    %c0_116 = arith.constant 0 : index
    %c0_117 = arith.constant 0 : index
    %c0_118 = arith.constant 0 : index
    %217 = vector.load %arg4[%c0_116, %c0_117, %c0_118] : memref<1x8x1024xbf16, #tpu.memory_space<vmem>>, vector<1x8x1024xbf16>
    %218 = vector.shape_cast %217 : vector<1x8x1024xbf16> to vector<8x1024xbf16>
    %c0_119 = arith.constant 0 : index
    %c0_120 = arith.constant 0 : index
    %219 = vector.load %arg10[%c0_119, %c0_120] : memref<1024x512xi8, #tpu.memory_space<vmem>>, vector<1024x512xi8>
    %220 = arith.sitofp %219 : vector<1024x512xi8> to vector<1024x512xbf16>
    %c0_121 = arith.constant 0 : index
    %c0_122 = arith.constant 0 : index
    %221 = vector.load %arg11[%c0_121, %c0_122] : memref<8x512xf32, #tpu.memory_space<vmem>>, vector<1x512xf32>
    %c1_123 = arith.constant 1 : index
    %c0_124 = arith.constant 0 : index
    %222 = vector.load %arg11[%c1_123, %c0_124] : memref<8x512xf32, #tpu.memory_space<vmem>>, vector<1x512xf32>
    %cst_125 = arith.constant dense<0.000000e+00> : vector<8x512xf32>
    %223 = tpu.matmul %218, %220, %cst_125 {dimension_numbers = #tpu.dot_dimension_numbers<[1], [0], [0], [1], [0, 0, 1, 1], [], []>} : vector<8x1024xbf16>, vector<1024x512xbf16>, vector<8x512xf32> -> vector<8x512xf32>
    %224 = vector.broadcast %221 : vector<1x512xf32> to vector<8x512xf32>
    %225 = arith.mulf %223, %224 : vector<8x512xf32>
    %226 = vector.broadcast %222 : vector<1x512xf32> to vector<8x512xf32>
    %227 = arith.addf %225, %226 : vector<8x512xf32>
    %cst_126 = arith.constant 5.000000e-01 : f32
    %228 = vector.broadcast %cst_126 : f32 to vector<8x512xf32>
    %229 = arith.mulf %228, %227 : vector<8x512xf32>
    %cst_127 = arith.constant 4.471500e-02 : f32
    %230 = vector.broadcast %cst_127 : f32 to vector<8x512xf32>
    %231 = arith.mulf %230, %227 : vector<8x512xf32>
    %232 = arith.mulf %231, %227 : vector<8x512xf32>
    %233 = arith.mulf %232, %227 : vector<8x512xf32>
    %234 = arith.addf %227, %233 : vector<8x512xf32>
    %cst_128 = arith.constant 0.797884583 : f32
    %235 = vector.broadcast %cst_128 : f32 to vector<8x512xf32>
    %236 = arith.mulf %235, %234 : vector<8x512xf32>
    %237 = math.tanh %236 : vector<8x512xf32>
    %cst_129 = arith.constant 1.000000e+00 : f32
    %238 = vector.broadcast %cst_129 : f32 to vector<8x512xf32>
    %239 = arith.addf %238, %237 : vector<8x512xf32>
    %240 = arith.mulf %229, %239 : vector<8x512xf32>
    %241 = arith.truncf %240 : vector<8x512xf32> to vector<8x512xbf16>
    %c0_130 = arith.constant 0 : index
    %c0_131 = arith.constant 0 : index
    %242 = vector.load %arg12[%c0_130, %c0_131] : memref<512x128xbf16, #tpu.memory_space<vmem>>, vector<512x128xbf16>
    %cst_132 = arith.constant dense<0.000000e+00> : vector<8x128xf32>
    %243 = tpu.matmul %241, %242, %cst_132 {dimension_numbers = #tpu.dot_dimension_numbers<[1], [0], [0], [1], [0, 0, 1, 1], [], []>} : vector<8x512xbf16>, vector<512x128xbf16>, vector<8x128xf32> -> vector<8x128xf32>
    %244 = vector.broadcast %8 : vector<1x128xf32> to vector<8x128xf32>
    %245 = arith.addf %243, %244 : vector<8x128xf32>
    %246 = tpu.iota {dimensions = array<i32: 1>} : vector<8x128xi32>
    %c100_i32 = arith.constant 100 : i32
    %247 = vector.broadcast %c100_i32 : i32 to vector<8x128xi32>
    %248 = arith.cmpi slt, %246, %247 : vector<8x128xi32>
    %cst_133 = arith.constant -1.000000e+30 : f32
    %249 = vector.broadcast %cst_133 : f32 to vector<8x128xf32>
    %250 = arith.select %248, %245, %249 : vector<8x128xi1>, vector<8x128xf32>
    %cst_134 = arith.constant dense<0xFF800000> : vector<8xf32>
    %251 = vector.multi_reduction <maximumf>, %250, %cst_134 [1] : vector<8x128xf32> to vector<8xf32>
    %252 = vector.shape_cast %251 : vector<8xf32> to vector<8x1xf32>
    %253 = vector.broadcast %252 : vector<8x1xf32> to vector<8x128xf32>
    %254 = arith.subf %250, %253 : vector<8x128xf32>
    %255 = math.exp %254 : vector<8x128xf32>
    %cst_135 = arith.constant dense<0.000000e+00> : vector<8xf32>
    %256 = vector.multi_reduction <add>, %255, %cst_135 [1] : vector<8x128xf32> to vector<8xf32>
    %257 = vector.shape_cast %256 : vector<8xf32> to vector<8x1xf32>
    %258 = vector.broadcast %257 : vector<8x1xf32> to vector<8x128xf32>
    %259 = arith.divf %255, %258 : vector<8x128xf32>
    %260 = arith.truncf %259 : vector<8x128xf32> to vector<8x128xbf16>
    %c0_136 = arith.constant 0 : index
    %c0_137 = arith.constant 0 : index
    %261 = vector.load %arg13[%c0_136, %c0_137] : memref<128x128xbf16, #tpu.memory_space<vmem>>, vector<128x128xbf16>
    %cst_138 = arith.constant dense<0.000000e+00> : vector<8x128xf32>
    %262 = tpu.matmul %260, %261, %cst_138 {dimension_numbers = #tpu.dot_dimension_numbers<[1], [0], [0], [1], [0, 0, 1, 1], [], []>} : vector<8x128xbf16>, vector<128x128xbf16>, vector<8x128xf32> -> vector<8x128xf32>
    %c0_139 = arith.constant 0 : index
    %c0_140 = arith.constant 0 : index
    %c0_141 = arith.constant 0 : index
    %263 = vector.load %arg16[%c0_139, %c0_140, %c0_141] : memref<1x8x128xf32, #tpu.memory_space<vmem>>, vector<1x8x128xf32>
    %264 = vector.shape_cast %263 : vector<1x8x128xf32> to vector<8x128xf32>
    %265 = vector.shape_cast %262 : vector<8x128xf32> to vector<1x8x128xf32>
    tpu.vector_store %arg16[%c0_139, %c0_140, %c0_141], %265 {strides = array<i32>} : memref<1x8x128xf32, #tpu.memory_space<vmem>>, vector<1x8x128xf32>,
    return
  }
  func.func @transform_0(%arg0: i32) -> (i32, i32, i32) {
    %c0_i32 = arith.constant 0 : i32
    %c0_i32_0 = arith.constant 0 : i32
    %c0_i32_1 = arith.constant 0 : i32
    return %arg0, %c0_i32, %c0_i32_0 : i32, i32, i32
  }
  func.func @transform_1(%arg0: i32) -> (i32, i32, i32) {
    %c0_i32 = arith.constant 0 : i32
    %c0_i32_0 = arith.constant 0 : i32
    %c0_i32_1 = arith.constant 0 : i32
    return %arg0, %c0_i32, %c0_i32_0 : i32, i32, i32
  }
  func.func @transform_2(%arg0: i32) -> (i32, i32, i32) {
    %c0_i32 = arith.constant 0 : i32
    %c0_i32_0 = arith.constant 0 : i32
    %c0_i32_1 = arith.constant 0 : i32
    return %arg0, %c0_i32, %c0_i32_0 : i32, i32, i32
  }
  func.func @transform_3(%arg0: i32) -> (i32, i32, i32) {
    %c0_i32 = arith.constant 0 : i32
    %c0_i32_0 = arith.constant 0 : i32
    %c0_i32_1 = arith.constant 0 : i32
    return %arg0, %c0_i32, %c0_i32_0 : i32, i32, i32
  }
  func.func @transform_4(%arg0: i32) -> (i32, i32) {
    %c0_i32 = arith.constant 0 : i32
    %c0_i32_0 = arith.constant 0 : i32
    %c0_i32_1 = arith.constant 0 : i32
    return %c0_i32, %c0_i32_0 : i32, i32
  }
  func.func @transform_5(%arg0: i32) -> (i32, i32) {
    %c0_i32 = arith.constant 0 : i32
    %c0_i32_0 = arith.constant 0 : i32
    %c0_i32_1 = arith.constant 0 : i32
    return %c0_i32, %c0_i32_0 : i32, i32
  }
  func.func @transform_6(%arg0: i32) -> (i32, i32) {
    %c0_i32 = arith.constant 0 : i32
    %c0_i32_0 = arith.constant 0 : i32
    %c0_i32_1 = arith.constant 0 : i32
    return %c0_i32, %c0_i32_0 : i32, i32
  }
  func.func @transform_7(%arg0: i32) -> (i32, i32) {
    %c0_i32 = arith.constant 0 : i32
    %c0_i32_0 = arith.constant 0 : i32
    %c0_i32_1 = arith.constant 0 : i32
    return %c0_i32, %c0_i32_0 : i32, i32
  }
  func.func @transform_8(%arg0: i32) -> (i32, i32) {
    %c0_i32 = arith.constant 0 : i32
    %c0_i32_0 = arith.constant 0 : i32
    %c0_i32_1 = arith.constant 0 : i32
    return %c0_i32, %c0_i32_0 : i32, i32
  }
  func.func @transform_9(%arg0: i32) -> (i32, i32) {
    %c0_i32 = arith.constant 0 : i32
    %c0_i32_0 = arith.constant 0 : i32
    %c0_i32_1 = arith.constant 0 : i32
    return %c0_i32, %c0_i32_0 : i32, i32
  }
  func.func @transform_10(%arg0: i32) -> (i32, i32) {
    %c0_i32 = arith.constant 0 : i32
    %c0_i32_0 = arith.constant 0 : i32
    %c0_i32_1 = arith.constant 0 : i32
    return %c0_i32, %c0_i32_0 : i32, i32
  }
  func.func @transform_11(%arg0: i32) -> (i32, i32) {
    %c0_i32 = arith.constant 0 : i32
    %c0_i32_0 = arith.constant 0 : i32
    %c0_i32_1 = arith.constant 0 : i32
    return %c0_i32, %c0_i32_0 : i32, i32
  }
  func.func @transform_12(%arg0: i32) -> (i32, i32) {
    %c0_i32 = arith.constant 0 : i32
    %c0_i32_0 = arith.constant 0 : i32
    %c0_i32_1 = arith.constant 0 : i32
    return %c0_i32, %c0_i32_0 : i32, i32
  }
  func.func @transform_13(%arg0: i32) -> (i32, i32) {
    %c0_i32 = arith.constant 0 : i32
    %c0_i32_0 = arith.constant 0 : i32
    %c0_i32_1 = arith.constant 0 : i32
    return %c0_i32, %c0_i32_0 : i32, i32
  }
  func.func @transform_14(%arg0: i32) -> (i32, i32, i32) {
    %c0_i32 = arith.constant 0 : i32
    %c0_i32_0 = arith.constant 0 : i32
    %c0_i32_1 = arith.constant 0 : i32
    return %arg0, %c0_i32, %c0_i32_0 : i32, i32, i32
  }
  func.func @transform_15(%arg0: i32) -> (i32, i32, i32) {
    %c0_i32 = arith.constant 0 : i32
    %c0_i32_0 = arith.constant 0 : i32
    %c0_i32_1 = arith.constant 0 : i32
    return %arg0, %c0_i32, %c0_i32_0 : i32, i32, i32
  }
}

</mosaic_0001>

<bundles_post_ra>
// kernel: ecodepth_encoder_forward.1
= control target key start
LH: loop header
LB: loop body
LE: loop exit
PB: predicated region body
PF: predicated region fallthrough
CT: control target
= control target key end

     0   :  { %s9979_s0 = inlined_call_operand.vmem [shape: bf16[2,256,32], index: 0, kind: input, shape index: {}]   ;;  %s9980_s1 = inlined_call_operand.vmem [shape: bf16[2,64,64], index: 1, kind: input, shape index: {}]   ;;  %s9981_s2 = inlined_call_operand.vmem [shape: bf16[2,16,128], index: 2, kind: input, shape index: {}]   ;;  %s9982_s3 = inlined_call_operand.vmem [shape: bf16[2,8,1024], index: 3, kind: input, shape index: {}]   ;;  %s9983_s4 = inlined_call_operand.vmem [shape: bf16[576,256], index: 4, kind: input, shape index: {}]   ;;  %s9984_s5 = inlined_call_operand.vmem [shape: bf16[144,64], index: 5, kind: input, shape index: {}]   ;;  %s9985_s6 = inlined_call_operand.vmem [shape: bf16[576,32], index: 6, kind: input, shape index: {}]   ;;  %s9986_s7 = inlined_call_operand.vmem [shape: bf16[576,64], index: 7, kind: input, shape index: {}]   ;;  %s9987_s8 = inlined_call_operand.vmem [shape: bf16[224,128], index: 8, kind: input, shape index: {}]   ;;  %s9988_s9 = inlined_call_operand.vmem [shape: s8[1024,512], index: 9, kind: input, shape index: {}]   ;;  %s9989_s10 = inlined_call_operand.hbm [shape: f32[8,512], index: 10, kind: input, shape index: {}]   ;;  %s9990_s11 = inlined_call_operand.hbm [shape: bf16[512,128], index: 11, kind: input, shape index: {}]   ;;  %s9991_s12 = inlined_call_operand.hbm [shape: bf16[128,128], index: 12, kind: input, shape index: {}]   ;;  %s9992_s13 = inlined_call_operand.hbm [shape: f32[176,128], index: 13, kind: input, shape index: {}]   ;;  %s9993_s14 = inlined_call_operand.hbm [shape: f32[2,16,128], index: 14, kind: output, shape index: {0}]   ;;  %s9994_s15 = inlined_call_operand.vmem [shape: f32[2,8,128], index: 15, kind: output, shape index: {1}]  }
   0x1   :  { %10009 = sst [smem:[#allocation23_spill]] %s9982_s3 }
   0x2   :  { %10010 = sst [smem:[#allocation24_spill]] %s9993_s14 }
   0x3   :  { %10011 = sst [smem:[#allocation25_spill]] %s9994_s15 }
   0x4   :  { %21 = vsyncpa [#allocation3], 0 }
   0x5   :  { %22 = vsyncpa [#allocation6], 0 }
   0x6   :  { %23 = vsyncpa [#allocation9], 0 }
   0x7   :  { %24 = vsyncpa [#allocation4], 0 }
   0x8   :  { %26 = vsyncpa [#allocation4 + $0x1], 0  ;;  %s8314_s18 = smov 0   ;;  %s8316_s19 = smov 0  }
   0x9   :  { %s8318_s20 = smov 0   ;;  %s8320_s21 = smov 0  }
   0xa LB: > { %10012 = sst [smem:[#allocation15_spill]] %s8205_s18  ;;  %s8335_s22 = sadd.s32 4294967295, %s8217_s21   ;;  %s8217_s21 = sphi %s8320_s21, %s10042_s21   ;;  %s8213_s20 = sphi %s8318_s20, %s10045_s20   ;;  %s8209_s19 = sphi %s8316_s19, %s10044_s19   ;;  %s8205_s18 = sphi %s8314_s18, %s10043_s18  }
   0xb   : > { %10013 = sst [smem:[#allocation16_spill]] %s8209_s19  ;;  %s6282_s23 = sadd.s32 4294967294, %s8217_s21  }
   0xc   : > { %10014 = sst [smem:[#allocation17_spill]] %s8213_s20  ;;  %s8339_s24 = sadd.s32 1, %s8217_s21  }
   0xd   : > { %10015 = sst [smem:[#allocation18_spill]] %s8217_s21  ;;  %s353_s25 = sadd.s32 1, %s8213_s20 }
   0xe   : > { %10016 = sst [smem:[#allocation19_spill]] %s8339_s24  ;;  %s350_s26 = ssub.s32 %s8217_s21, %s8339_s24 }
   0xf   : > { %p363_p0 = scmp.ne.s32.totalorder %s8213_s20, %s8209_s19  ;;  %p351_p1 = scmp.eq.s32.totalorder %s350_s26, 0 }
  0x10   : > { %p364_p2 = scmp.eq.s32.totalorder %s8335_s22, 1  ;;  %p369_p3 = scmp.ne.s32.totalorder %s8209_s19, %s8205_s18 }
  0x11   : > { %p370_p4 = scmp.eq.s32.totalorder %s6282_s23, 1  ;;  %p6283_p7 = scmp.ge.s32.totalorder %s8217_s21, 1 }
  0x12   : > { %s8350_s27 = scalar_select %p351_p1, %s8213_s20, %s353_s25  }
  0x13   : > { %p8352_p5 = por %p364_p2, %p363_p0  ;;  %p8356_p6 = por %p370_p4, %p369_p3 }
  0x14   : > { %10017 = sst [smem:[#allocation20_spill]] %s8350_s27  ;;  %p403_p8 = scmp.lt.s32.totalorder %s8217_s21, 3 }
  0x15   : > { %s10018_s28 = scalar_select %p8352_p5, 1, 0 }
  0x16   : > { %s10020_s29 = scalar_select %p8356_p6, 1, 0 }
  0x17   : > { %10019 = sst [smem:[#allocation21_spill]] %s10018_s28  ;;  %p10001_p9 = scmp.eq.s32.totalorder %s8335_s22, 0 }
  0x18   : > { %10021 = sst [smem:[#allocation22_spill]] %s10020_s29  ;;  %p8363_p10 = pnand %p6283_p7, %p403_p8 }
  0x19   : > { %s8219_s16 = smov [#allocation5]   ;;  %s8220_s25 = smov [#allocation2]  }
  0x1a   : > { %s10022_s30 = scalar_select %p8363_p10, 1, 0 }
  0x1b   : > { %s444_s17 = sshll.u32 %s8219_s16, 4  ;;  %p7671_p11 = pneg %p8363_p10  ;;  %s8369_s17 = int_to_ptr.vmem [resolvable:$true] %s444_s17 }
  0x1c   : > { %s434_s26 = sshll.u32 %s8220_s25, 4  ;;  %s8221_s27 = smov [#allocation7]   ;;  %s8377_s26 = int_to_ptr.vmem [resolvable:$true] %s434_s26 }
  0x1d   : > { %p8373_p12 = pnand %p10001_p9, %p7671_p11  ;;  %s8379_s20 = sshll.u32 %s8221_s27, 4  ;;  %s458_s20 = int_to_ptr.vmem [resolvable:$true] %s8379_s20 }
  0x1e   : > { %s8031_s16 = scalar_lea.hbm %s9990_s11, 4096 }
  0x1f   : > { %p8032_p13 = scmp.ne.s32.totalorder %s9990_s11, %s8031_s16  ;;  %p8389_p0 = pneg %p8373_p12 }
  0x20   : > { %p8038_p3 = scmp.lt.u32.totalorder %s8031_s16, %s9990_s11 }
  0x21   : > { %p8034_p1 = pnand %p8389_p0, %p8032_p13 }
  0x23   : > { %p8035_p2 = pneg %p8034_p1 }
  0x25   : > { %p8040_p4 = pnand %p8038_p3, %p8035_p2 }
  0x27   : > { %8043 = shalt.err (!%p8040_p4)
}
  0x28   : > { %s8044_s18 = scalar_lea.vmem %s8369_s17, 4096  ;;  %p8052_p9 = scmp.lt.s32.totalorder %s8369_s17, %s8369_s17 }
  0x29   : > { %p8045_p7 = scmp.ne.s32.totalorder %s8369_s17, %s8044_s18  ;;  %p8053_p6 = scmp.lt.s32.totalorder %s8044_s18, %s8044_s18 }
  0x2b   : > { %p8047_p8 = pnand %p8045_p7, %p8389_p0  ;;  %p8054_p13 = por %p8053_p6, %p8052_p9 }
  0x2d   : > { %p8048_p11 = pneg %p8047_p8 }
  0x2f   : > { %p8055_p1 = pnand %p8054_p13, %p8048_p11 }
  0x31   : > { %8058 = shalt.err (!%p8055_p1)
}
  0x32   : > { %s8222_s21 = smov 64   ;;  %s8223_s24 = smov 4  }
  0x33   : > { %7677 = dma.hbm_to_vmem [thread:$0]  (!%p8373_p12), %s9990_s11, 4096, %s8369_s17, [#allocation6], %s8222_s21, %s8222_s21, %s8223_s24  }
  0x34   : > { %s8059_s18 = scalar_lea.hbm %s9989_s10, 512 }
  0x35   : > { %p8060_p6 = scmp.ne.s32.totalorder %s9989_s10, %s8059_s18  ;;  %p8066_p3 = scmp.lt.u32.totalorder %s8059_s18, %s9989_s10 }
  0x37   : > { %p8062_p9 = pnand %p8060_p6, %p8389_p0 }
  0x39   : > { %p8063_p2 = pneg %p8062_p9 }
  0x3b   : > { %p8068_p4 = pnand %p8066_p3, %p8063_p2 }
  0x3d   : > { %8071 = shalt.err (!%p8068_p4)
}
  0x3e   : > { %s8072_s17 = scalar_lea.vmem %s8377_s26, 512  ;;  %p8080_p13 = scmp.lt.s32.totalorder %s8377_s26, %s8377_s26 }
  0x3f   : > { %p8073_p7 = scmp.ne.s32.totalorder %s8377_s26, %s8072_s17  ;;  %p8081_p1 = scmp.lt.s32.totalorder %s8072_s17, %s8072_s17 }
  0x41   : > { %p8075_p8 = pnand %p8073_p7, %p8389_p0  ;;  %p8082_p6 = por %p8081_p1, %p8080_p13 }
  0x43   : > { %p8076_p11 = pneg %p8075_p8 }
  0x45   : > { %p8083_p9 = pnand %p8082_p6, %p8076_p11 }
  0x47   : > { %8086 = shalt.err (!%p8083_p9)
}
  0x48   : > { %7674 = dma.hbm_to_vmem [thread:$0]  (!%p8373_p12), %s9989_s10, 512, %s8377_s26, [#allocation3]  }
  0x49   : > { %s8087_s29 = scalar_lea.hbm %s9991_s12, 1024 }
  0x4a   : > { %p8088_p2 = scmp.ne.s32.totalorder %s9991_s12, %s8087_s29  ;;  %p8094_p7 = scmp.lt.u32.totalorder %s8087_s29, %s9991_s12 }
  0x4c   : > { %p8090_p3 = pnand %p8088_p2, %p8389_p0 }
  0x4e   : > { %p8091_p4 = pneg %p8090_p3 }
  0x50   : > { %p8096_p8 = pnand %p8094_p7, %p8091_p4 }
  0x52   : > { %8099 = shalt.err (!%p8096_p8)
}
  0x53   : > { %s8100_s17 = scalar_lea.vmem %s458_s20, 1024  ;;  %p8108_p6 = scmp.lt.s32.totalorder %s458_s20, %s458_s20 }
  0x54   : > { %p8101_p11 = scmp.ne.s32.totalorder %s458_s20, %s8100_s17  ;;  %p8109_p9 = scmp.lt.s32.totalorder %s8100_s17, %s8100_s17 }
  0x56   : > { %p8103_p13 = pnand %p8101_p11, %p8389_p0  ;;  %p8110_p5 = por %p8109_p9, %p8108_p6 }
  0x58   : > { %p8104_p1 = pneg %p8103_p13 }
  0x5a   : > { %p8111_p10 = pnand %p8110_p5, %p8104_p1 }
  0x5c   : > { %8114 = shalt.err (!%p8111_p10)
}
  0x5d   : > { %7680 = dma.hbm_to_vmem [thread:$0]  (!%p8373_p12), %s9991_s12, 1024, %s458_s20, [#allocation6], %s8222_s21, %s8222_s21, %s8223_s24  }
  0x5e   : > { %s8224_s14 = smov [#allocation8]   ;;  %s8115_s16 = scalar_lea.hbm %s9992_s13, 2816 }
  0x5f   : > { %s470_s19 = sshll.u32 %s8224_s14, 4  ;;  %p8116_p5 = scmp.ne.s32.totalorder %s9992_s13, %s8115_s16  ;;  %s471_s19 = int_to_ptr.vmem [resolvable:$true] %s470_s19 }
  0x60   : > { %p8122_p3 = scmp.lt.u32.totalorder %s8115_s16, %s9992_s13 }
  0x61   : > { %p8118_p10 = pnand %p8116_p5, %p8389_p0 }
  0x63   : > { %p8119_p2 = pneg %p8118_p10 }
  0x65   : > { %p8124_p4 = pnand %p8122_p3, %p8119_p2 }
  0x67   : > { %8127 = shalt.err (!%p8124_p4)
}
  0x68   : > { %s8128_s20 = scalar_lea.vmem %s471_s19, 2816  ;;  %p8136_p13 = scmp.lt.s32.totalorder %s471_s19, %s471_s19 }
  0x69   : > { %p8129_p7 = scmp.ne.s32.totalorder %s471_s19, %s8128_s20  ;;  %p8137_p1 = scmp.lt.s32.totalorder %s8128_s20, %s8128_s20 }
  0x6b   : > { %p8131_p8 = pnand %p8129_p7, %p8389_p0  ;;  %p8138_p6 = por %p8137_p1, %p8136_p13 }
  0x6d   : > { %p8132_p11 = pneg %p8131_p8 }
  0x6f   : > { %p8139_p9 = pnand %p8138_p6, %p8132_p11 }
  0x71   : > { %8142 = shalt.err (!%p8139_p9)
}
  0x72   : > { %s8225_s21 = smov 128   ;;  %s8226_s24 = smov 8  }
  0x73   : > { %7683 = dma.hbm_to_vmem [thread:$0]  (!%p8373_p12), %s9992_s13, 2816, %s471_s19, [#allocation9], %s8225_s21, %s8225_s21, %s8226_s24  }
  0x74   : > { %p10025_p5 = scmp.ne.s32.totalorder %s10022_s30, 0 }
  0x75   : > { %p10026_p10 = scmp.eq.s32.totalorder (!%p10025_p5), %s8335_s22, 0 }
  0x76   : > { %518 = sbr.rel (%p10025_p5) target bundleno = 4074 (0xfea), region = 76 }
  0x7d   : > { %8188 = dma.done.wait (%p10026_p10), [#allocation3], 512   ;;  %p10027_p0 = pmov %p10026_p10 }
  0x7f   : > { %8190 = vsyncadd (%p10027_p0), [#allocation3], 4294966784  ;;  %p10028_p2 = pmov %p10027_p0 }
  0x80   : > { %p10029_p3 = pmov %p10027_p0 }
  0x81   : > { %8192 = dma.done.wait (%p10028_p2), [#allocation6], 5120  }
  0x82   : > { %8194 = vsyncadd (%p10029_p3), [#allocation6], 4294962176  ;;  %p10030_p4 = pmov %p10027_p0 }
  0x83   : > { %p10031_p12 = pmov %p10027_p0 }
  0x84   : > { %8196 = dma.done.wait (%p10030_p4), [#allocation9], 2816  }
  0x85   : > { %8198 = vsyncadd (%p10031_p12), [#allocation9], 4294964480  ;;  %p597_p7 = scmp.lt.s32.totalorder %s8335_s22, 1  ;;  %v8227_v0 = vmov 0   ;;  %v7761_v6 = vld [vmem:[%s9983_s4 + $0x4] ss:$8 sps:$4 sm:$0xff]  }
  0x86   : > { %1211 = vmatprep.subr.bf16.mxu0 %v8227_v0  ;;  %1243 = vmatprep.mubr.bf16.mxu0 %v7761_v6  ;;  %v7759_v18 = vld [vmem:[%s9983_s4] ss:$8 sps:$4 sm:$0xff]   ;;  %v7762_v19 = vld [vmem:[%s9983_s4 + $0x14] ss:$8 sps:$4 sm:$0xff]   ;;  %v7764_v20 = vld [vmem:[%s9983_s4 + $0x10] ss:$8 sps:$4 sm:$0xff]  }
  0x87   : > { %s8492_s15 = scalar_select %p597_p7, %s8335_s22, 1  ;;  %v7765_v21 = vld [vmem:[%s9983_s4 + $0x24] ss:$8 sps:$4 sm:$0xff]   ;;  %v7767_v22 = vld [vmem:[%s9983_s4 + $0x20] ss:$8 sps:$4 sm:$0xff]   ;;  %v8624_v52 = vld [vmem:[%s9985_s6 + $0x10] sm:$0xff]  }
  0x88   : > { %v7768_v23 = vld [vmem:[%s9983_s4 + $0x34] ss:$8 sps:$4 sm:$0xff]   ;;  %v7770_v24 = vld [vmem:[%s9983_s4 + $0x30] ss:$8 sps:$4 sm:$0xff]   ;;  %v7771_v25 = vld [vmem:[%s9983_s4 + $0x44] ss:$8 sps:$4 sm:$0xff]  }
  0x89   : > { %s6630_s30 = sshll.u32 %s8492_s15, 7  ;;  %v7773_v26 = vld [vmem:[%s9983_s4 + $0x40] ss:$8 sps:$4 sm:$0xff]   ;;  %v7774_v27 = vld [vmem:[%s9983_s4 + $0x54] ss:$8 sps:$4 sm:$0xff]   ;;  %vm1552_vm0 = vcmask 261120  }
  0x8a   : > { %s8498_s19 = scalar_lea.vmem %s9979_s0, %s6630_s30  ;;  %v7776_v28 = vld [vmem:[%s9983_s4 + $0x50] ss:$8 sps:$4 sm:$0xff]   ;;  %v7777_v29 = vld [vmem:[%s9983_s4 + $0x64] ss:$8 sps:$4 sm:$0xff]   ;;  %v7779_v30 = vld [vmem:[%s9983_s4 + $0x60] ss:$8 sps:$4 sm:$0xff]  }
  0x8b   : > { %v7743_v1 = vld [vmem:[%s8498_s19] sm:$0xff]   ;;  %v7744_v2 = vld [vmem:[%s8498_s19 + $0x8] sm:$0xff]   ;;  %v7745_v3 = vld [vmem:[%s8498_s19 + $0x10] sm:$0xff]   ;;  %vm8229_vm1 = vmmov 0   ;;  %vm2802_vm2 = vcmask 523264   ;;  %s6631_s30 = sshll.u32 %s8492_s15, 5 }
  0x8c   : > { %1212 = vmatpush1.bf16.msra.mxu0 %v7743_v1  ;;  %v7746_v4 = vld [vmem:[%s8498_s19 + $0x18] sm:$0xff]   ;;  %v7747_v5 = vld [vmem:[%s8498_s19 + $0x20] sm:$0xff]   ;;  %v7748_v7 = vld [vmem:[%s8498_s19 + $0x28] sm:$0xff]   ;;  %s6632_s20 = sshll.u32 %s8492_s15, 3  ;;  %s10032_s3 = sld [smem:[#allocation23_spill]] }
  0x8d   : > { %1213 = vmatprep.subr.bf16.mxu0 %v8227_v0  ;;  %v7749_v8 = vld [vmem:[%s8498_s19 + $0x30] sm:$0xff]   ;;  %v7750_v9 = vld [vmem:[%s8498_s19 + $0x38] sm:$0xff]   ;;  %v7751_v10 = vld [vmem:[%s8498_s19 + $0x40] sm:$0xff]   ;;  %s10033_s16 = sld [smem:[#allocation16_spill]]  ;;  %s10034_s18 = sld [smem:[#allocation21_spill]] }
  0x8e   : > { %v7752_v11 = vld [vmem:[%s8498_s19 + $0x48] sm:$0xff]   ;;  %v7753_v12 = vld [vmem:[%s8498_s19 + $0x50] sm:$0xff]   ;;  %v7754_v13 = vld [vmem:[%s8498_s19 + $0x58] sm:$0xff]   ;;  %s6634_s17 = sshll.u32 %s8335_s22, 8  ;;  %s8231_s22 = smov [#allocation10]  }
  0x8f   : > { %v7755_v14 = vld [vmem:[%s8498_s19 + $0x60] sm:$0xff]   ;;  %v7756_v15 = vld [vmem:[%s8498_s19 + $0x68] sm:$0xff]   ;;  %v7757_v16 = vld [vmem:[%s8498_s19 + $0x70] sm:$0xff]  }
  0x90   : > { %1214 = vmatpush1.bf16.msra.mxu0 %v7744_v2  ;;  %v7758_v17 = vld [vmem:[%s8498_s19 + $0x78] sm:$0xff]   ;;  %v7783_v33 = vld [vmem:[%s9983_s4 + $0x84] ss:$8 sps:$4 sm:$0xff]   ;;  %v7785_v34 = vld [vmem:[%s9983_s4 + $0x80] ss:$8 sps:$4 sm:$0xff]   ;;  %s8969_s19 = scalar_lea.vmem %s9980_s1, %s6631_s30 }
  0x91   : > { %1215 = vmatprep.subr.bf16.mxu0 %v8227_v0  ;;  %v7780_v31 = vld [vmem:[%s9983_s4 + $0x74] ss:$8 sps:$4 sm:$0xff]   ;;  %v7782_v32 = vld [vmem:[%s9983_s4 + $0x70] ss:$8 sps:$4 sm:$0xff]   ;;  %v7789_v37 = vld [vmem:[%s9983_s4 + $0xa4] ss:$8 sps:$4 sm:$0xff]  }
  0x92   : > { %v7786_v35 = vld [vmem:[%s9983_s4 + $0x94] ss:$8 sps:$4 sm:$0xff]   ;;  %v7788_v36 = vld [vmem:[%s9983_s4 + $0x90] ss:$8 sps:$4 sm:$0xff]   ;;  %v7791_v38 = vld [vmem:[%s9983_s4 + $0xa0] ss:$8 sps:$4 sm:$0xff]   ;;  %s9401_s23 = scalar_lea.vmem %s10032_s3, %s6631_s30 }
  0x93   : > { %v7792_v39 = vld [vmem:[%s9983_s4 + $0xb4] ss:$8 sps:$4 sm:$0xff]   ;;  %v7794_v40 = vld [vmem:[%s9983_s4 + $0xb0] ss:$8 sps:$4 sm:$0xff]   ;;  %v7795_v41 = vld [vmem:[%s9983_s4 + $0xc4] ss:$8 sps:$4 sm:$0xff]  }
  0x94   : > { %1216 = vmatpush1.bf16.msra.mxu0 %v7745_v3  ;;  %v7843_v42 = vld [vmem:[%s9985_s6] sm:$0xff]   ;;  %v7844_v43 = vld [vmem:[%s9985_s6 + $0x8] sm:$0xff]   ;;  %v7798_v45 = vld [vmem:[%s9983_s4 + $0xd4] ss:$8 sps:$4 sm:$0xff]   ;;  %s588_s24 = sand.u32 1, %s10033_s16   ;;  %s10035_s3 = sld [smem:[#allocation24_spill]] }
  0x95   : > { %1217 = vmatprep.subr.bf16.mxu0 %v8227_v0  ;;  %6901 = vmatprep.subr.bf16.mxu1 %v7843_v42  ;;  %v7797_v44 = vld [vmem:[%s9983_s4 + $0xc0] ss:$8 sps:$4 sm:$0xff]   ;;  %v7800_v46 = vld [vmem:[%s9983_s4 + $0xd0] ss:$8 sps:$4 sm:$0xff]   ;;  %v7801_v47 = vld [vmem:[%s9983_s4 + $0xe4] ss:$8 sps:$4 sm:$0xff]  }
  0x96   : > { %6902 = vmatpush3.bf16.msra.mxu1 %v7843_v42  ;;  %v7803_v48 = vld [vmem:[%s9983_s4 + $0xe0] ss:$8 sps:$4 sm:$0xff]   ;;  %v7804_v49 = vld [vmem:[%s9983_s4 + $0xf4] ss:$8 sps:$4 sm:$0xff]   ;;  %v7806_v50 = vld [vmem:[%s9983_s4 + $0xf0] ss:$8 sps:$4 sm:$0xff]  }
  0x97   : > { %6903 = vmatprep.subr.bf16.mxu1 %v7844_v43  ;;  %v7807_v51 = vld [vmem:[%s9983_s4 + $0x104] ss:$8 sps:$4 sm:$0xff]   ;;  %v7809_v53 = vld [vmem:[%s9983_s4 + $0x100] ss:$8 sps:$4 sm:$0xff]   ;;  %v7810_v54 = vld [vmem:[%s9983_s4 + $0x114] ss:$8 sps:$4 sm:$0xff]  }
  0x98   : > { %1218 = vmatpush1.bf16.msra.mxu0 %v7746_v4  ;;  %v7812_v55 = vld [vmem:[%s9983_s4 + $0x110] ss:$8 sps:$4 sm:$0xff]   ;;  %v7813_v56 = vld [vmem:[%s9983_s4 + $0x124] ss:$8 sps:$4 sm:$0xff]   ;;  %v7815_v57 = vld [vmem:[%s9983_s4 + $0x120] ss:$8 sps:$4 sm:$0xff]  }
  0x99   : > { %1219 = vmatprep.subr.bf16.mxu0 %v8227_v0  ;;  %v7816_v58 = vld [vmem:[%s9983_s4 + $0x134] ss:$8 sps:$4 sm:$0xff]   ;;  %v7818_v59 = vld [vmem:[%s9983_s4 + $0x130] ss:$8 sps:$4 sm:$0xff]   ;;  %v7819_v60 = vld [vmem:[%s9983_s4 + $0x144] ss:$8 sps:$4 sm:$0xff]  }
  0x9a   : > { %6904 = vmatpush3.bf16.msra.mxu1 %v7844_v43  ;;  %v7821_v61 = vld [vmem:[%s9983_s4 + $0x140] ss:$8 sps:$4 sm:$0xff]   ;;  %v7822_v62 = vld [vmem:[%s9983_s4 + $0x154] ss:$8 sps:$4 sm:$0xff]   ;;  %v7824_v63 = vld [vmem:[%s9983_s4 + $0x150] ss:$8 sps:$4 sm:$0xff]   ;;  %s9927_s14 = scalar_lea.hbm %s10035_s3, %s6634_s17 }
  0x9b   : > { %6913 = vmatprep.subr.bf16.mxu1 %v8624_v52  ;;  %v7827_v1 = vld [vmem:[%s9983_s4 + $0x160] ss:$8 sps:$4 sm:$0xff]   ;;  %v7828_v2 = vld [vmem:[%s9983_s4 + $0x174] ss:$8 sps:$4 sm:$0xff]   ;;  %v7830_v3 = vld [vmem:[%s9983_s4 + $0x170] ss:$8 sps:$4 sm:$0xff]  }
  0x9c   : > { %1220 = vmatpush1.bf16.msra.mxu0 %v7747_v5  ;;  %v7831_v4 = vld [vmem:[%s9983_s4 + $0x184] ss:$8 sps:$4 sm:$0xff]   ;;  %v7833_v5 = vld [vmem:[%s9983_s4 + $0x180] ss:$8 sps:$4 sm:$0xff]   ;;  %v7834_v6 = vld [vmem:[%s9983_s4 + $0x194] ss:$8 sps:$4 sm:$0xff]  }
  0x9d   : > { %1221 = vmatprep.subr.bf16.mxu0 %v8227_v0  ;;  %v7856_v43 = vld [vmem:[%s9983_s4 + $0x1f0] ss:$8 sps:$4 sm:$0xff]   ;;  %s9933_s28 = scalar_lea.sflag [#allocation4], %s588_s24  ;;  %p10036_p11 = scmp.ne.s32.totalorder %s10034_s18, 0 }
  0xa0   : > { %1222 = vmatpush1.bf16.msra.mxu0 %v7748_v7  ;;  %v7836_v7 = vld [vmem:[%s9983_s4 + $0x190] ss:$8 sps:$4 sm:$0xff]  }
  0xa1   : > { %1223 = vmatprep.subr.bf16.mxu0 %v8227_v0 }
  0xa4   : > { %1224 = vmatpush1.bf16.msra.mxu0 %v7749_v8  ;;  %v7837_v8 = vld [vmem:[%s9983_s4 + $0x1a4] ss:$8 sps:$4 sm:$0xff]  }
  0xa5   : > { %1225 = vmatprep.subr.bf16.mxu0 %v8227_v0 }
  0xa8   : > { %1226 = vmatpush1.bf16.msra.mxu0 %v7750_v9  ;;  %v7839_v9 = vld [vmem:[%s9983_s4 + $0x1a0] ss:$8 sps:$4 sm:$0xff]  }
  0xa9   : > { %1227 = vmatprep.subr.bf16.mxu0 %v8227_v0 }
  0xac   : > { %1228 = vmatpush1.bf16.msra.mxu0 %v7751_v10  ;;  %v7840_v10 = vld [vmem:[%s9983_s4 + $0x1b4] ss:$8 sps:$4 sm:$0xff]  }
  0xad   : > { %1229 = vmatprep.subr.bf16.mxu0 %v8227_v0 }
  0xb0   : > { %1230 = vmatpush1.bf16.msra.mxu0 %v7752_v11 }
  0xb1   : > { %1231 = vmatprep.subr.bf16.mxu0 %v8227_v0 }
  0xb4   : > { %1232 = vmatpush1.bf16.msra.mxu0 %v7753_v12 }
  0xb5   : > { %1233 = vmatprep.subr.bf16.mxu0 %v8227_v0 }
  0xb8   : > { %1234 = vmatpush1.bf16.msra.mxu0 %v7754_v13  ;;  %v7842_v13 = vld [vmem:[%s9983_s4 + $0x1b0] ss:$8 sps:$4 sm:$0xff]  }
  0xb9   : > { %1235 = vmatprep.subr.bf16.mxu0 %v8227_v0 }
  0xbc   : > { %1236 = vmatpush1.bf16.msra.mxu0 %v7755_v14 }
  0xbd   : > { %1237 = vmatprep.subr.bf16.mxu0 %v8227_v0 }
  0xc0   : > { %1238 = vmatpush1.bf16.msra.mxu0 %v7756_v15  ;;  %v7845_v15 = vld [vmem:[%s9983_s4 + $0x1c4] ss:$8 sps:$4 sm:$0xff]  }
  0xc1   : > { %1239 = vmatprep.subr.bf16.mxu0 %v8227_v0 }
  0xc4   : > { %1240 = vmatpush1.bf16.msra.mxu0 %v7757_v16 }
  0xc5   : > { %1241 = vmatprep.subr.bf16.mxu0 %v8227_v0  ;;  %v7825_v0 = vld [vmem:[%s9983_s4 + $0x164] ss:$8 sps:$4 sm:$0xff]  }
  0xc8   : > { %1242 = vmatpush1.bf16.msra.mxu0 %v7758_v17 }
  0xcb   : > { %1244 = vmatmul.mubr.bf16.vlgmr.msra.gmra.mrb[0].mxu0 %v7759_v18 }
  0xcc   : > { %1251 = vmatprep.mubr.bf16.mxu0 %v7762_v19 }
  0xd3   : > { %1252 = vmatmul.mubr.bf16.gmra.mrb[4].mxu0 %v7764_v20  ;;  %v7847_v20 = vld [vmem:[%s9983_s4 + $0x1c0] ss:$8 sps:$4 sm:$0xff]  }
  0xd4   : > { %1259 = vmatprep.mubr.bf16.mxu0 %v7765_v21 }
  0xdb   : > { %1260 = vmatmul.mubr.bf16.gmra.mrb[8].mxu0 %v7767_v22  ;;  %v7848_v22 = vld [vmem:[%s9983_s4 + $0x1d4] ss:$8 sps:$4 sm:$0xff]  }
  0xdc   : > { %1267 = vmatprep.mubr.bf16.mxu0 %v7768_v23 }
  0xe3   : > { %1268 = vmatmul.mubr.bf16.gmra.mrb[12].mxu0 %v7770_v24 }
  0xe4   : > { %1275 = vmatprep.mubr.bf16.mxu0 %v7771_v25  ;;  %v7858_v25 = vld [vmem:[%s9985_s6 + $0x18] sm:$0xff]  }
  0xeb   : > { %1276 = vmatmul.mubr.bf16.gmra.mrb[16].mxu0 %v7773_v26  ;;  %v7871_v26 = vld [vmem:[%s9985_s6 + $0x20] sm:$0xff]  }
  0xec   : > { %1283 = vmatprep.mubr.bf16.mxu0 %v7774_v27 }
  0xf3   : > { %1284 = vmatmul.mubr.bf16.gmra.mrb[20].mxu0 %v7776_v28 }
  0xf4   : > { %1291 = vmatprep.mubr.bf16.mxu0 %v7777_v29  ;;  %v7850_v29 = vld [vmem:[%s9983_s4 + $0x1d0] ss:$8 sps:$4 sm:$0xff]  }
  0xfb   : > { %1292 = vmatmul.mubr.bf16.gmra.mrb[24].mxu0 %v7779_v30 }
  0xfc   : > { %1299 = vmatprep.mubr.bf16.mxu0 %v7780_v31  ;;  %v7851_v31 = vld [vmem:[%s9983_s4 + $0x1e4] ss:$8 sps:$4 sm:$0xff]  }
 0x103   : > { %1300 = vmatmul.mubr.bf16.gmra.mrb[28].mxu0 %v7782_v32 }
 0x104   : > { %1307 = vmatprep.mubr.bf16.mxu0 %v7783_v33 }
 0x10b   : > { %1308 = vmatmul.mubr.bf16.gmra.mrb[32].mxu0 %v7785_v34 }
 0x10c   : > { %1315 = vmatprep.mubr.bf16.mxu0 %v7786_v35 }
 0x113   : > { %1316 = vmatmul.mubr.bf16.gmra.mrb[36].mxu0 %v7788_v36  ;;  %v7853_v36 = vld [vmem:[%s9983_s4 + $0x1e0] ss:$8 sps:$4 sm:$0xff]  }
 0x114   : > { %1323 = vmatprep.mubr.bf16.mxu0 %v7789_v37 }
 0x11b   : > { %1324 = vmatmul.mubr.bf16.gmra.mrb[40].mxu0 %v7791_v38  ;;  %v7854_v38 = vld [vmem:[%s9983_s4 + $0x1f4] ss:$8 sps:$4 sm:$0xff]  }
 0x11c   : > { %1331 = vmatprep.mubr.bf16.mxu0 %v7792_v39 }
 0x123   : > { %1332 = vmatmul.mubr.bf16.gmra.mrb[44].mxu0 %v7794_v40 }
 0x124   : > { %1339 = vmatprep.mubr.bf16.mxu0 %v7795_v41 }
 0x12b   : > { %1340 = vmatmul.mubr.bf16.gmra.mrb[48].mxu0 %v7797_v44 }
 0x12c   : > { %1347 = vmatprep.mubr.bf16.mxu0 %v7798_v45  ;;  %v7859_v45 = vld [vmem:[%s9983_s4 + $0x204] ss:$8 sps:$4 sm:$0xff]  }
 0x133   : > { %1348 = vmatmul.mubr.bf16.gmra.mrb[52].mxu0 %v7800_v46 }
 0x134   : > { %1355 = vmatprep.mubr.bf16.mxu0 %v7801_v47 }
 0x13b   : > { %1356 = vmatmul.mubr.bf16.gmra.mrb[56].mxu0 %v7803_v48 }
 0x13c   : > { %1363 = vmatprep.mubr.bf16.mxu0 %v7804_v49 }
 0x143   : > { %1364 = vmatmul.mubr.bf16.gmra.mrb[60].mxu0 %v7806_v50  ;;  %v7861_v50 = vld [vmem:[%s9983_s4 + $0x200] ss:$8 sps:$4 sm:$0xff]  }
 0x144   : > { %1371 = vmatprep.mubr.bf16.mxu0 %v7807_v51 }
 0x14b   : > { %1372 = vmatmul.mubr.bf16.gmra.mrb[64].mxu0 %v7809_v53 }
 0x14c   : > { %1379 = vmatprep.mubr.bf16.mxu0 %v7810_v54 }
 0x153   : > { %1380 = vmatmul.mubr.bf16.gmra.mrb[68].mxu0 %v7812_v55  ;;  %v7872_v55 = vld [vmem:[%s9985_s6 + $0x28] sm:$0xff]  }
 0x154   : > { %1387 = vmatprep.mubr.bf16.mxu0 %v7813_v56  ;;  %v7873_v56 = vld [vmem:[%s9985_s6 + $0x30] sm:$0xff]  }
 0x15b   : > { %1388 = vmatmul.mubr.bf16.gmra.mrb[72].mxu0 %v7815_v57 }
 0x15c   : > { %1395 = vmatprep.mubr.bf16.mxu0 %v7816_v58 }
 0x163   : > { %1396 = vmatmul.mubr.bf16.gmra.mrb[76].mxu0 %v7818_v59  ;;  %v7864_v59 = vld [vmem:[%s9983_s4 + $0x210] ss:$8 sps:$4 sm:$0xff]  }
 0x164   : > { %1403 = vmatprep.mubr.bf16.mxu0 %v7819_v60 }
 0x16b   : > { %1404 = vmatmul.mubr.bf16.gmra.mrb[80].mxu0 %v7821_v61  ;;  %v7865_v61 = vld [vmem:[%s9983_s4 + $0x224] ss:$8 sps:$4 sm:$0xff]  }
 0x16c   : > { %1411 = vmatprep.mubr.bf16.mxu0 %v7822_v62 }
 0x173   : > { %1412 = vmatmul.mubr.bf16.gmra.mrb[84].mxu0 %v7824_v63 }
 0x174   : > { %1419 = vmatprep.mubr.bf16.mxu0 %v7825_v0 }
 0x17b   : > { %1420 = vmatmul.mubr.bf16.gmra.mrb[88].mxu0 %v7827_v1 }
 0x17c   : > { %1427 = vmatprep.mubr.bf16.mxu0 %v7828_v2  ;;  %v7867_v2 = vld [vmem:[%s9983_s4 + $0x220] ss:$8 sps:$4 sm:$0xff]  }
 0x183   : > { %1428 = vmatmul.mubr.bf16.gmra.mrb[92].mxu0 %v7830_v3 }
 0x184   : > { %1435 = vmatprep.mubr.bf16.mxu0 %v7831_v4  ;;  %v7868_v4 = vld [vmem:[%s9983_s4 + $0x234] ss:$8 sps:$4 sm:$0xff]  }
 0x18b   : > { %1436 = vmatmul.mubr.bf16.gmra.mrb[96].mxu0 %v7833_v5 }
 0x18c   : > { %1443 = vmatprep.mubr.bf16.mxu0 %v7834_v6 }
 0x193   : > { %1444 = vmatmul.mubr.bf16.gmra.mrb[100].mxu0 %v7836_v7 }
 0x194   : > { %1451 = vmatprep.mubr.bf16.mxu0 %v7837_v8 }
 0x19b   : > { %1452 = vmatmul.mubr.bf16.gmra.mrb[104].mxu0 %v7839_v9  ;;  %v7870_v9 = vld [vmem:[%s9983_s4 + $0x230] ss:$8 sps:$4 sm:$0xff]  }
 0x19c   : > { %1459 = vmatprep.mubr.bf16.mxu0 %v7840_v10 }
 0x19e   : > { %v1245_v11 = vpop.f32.mrb[0].mxu0 }
 0x19f   : > { %v1247_v12 = vpop.f32.mrb[1].mxu0 }
 0x1a0   : > { %v1248_v14 = vpop.f32.mrb[2].mxu0 }
 0x1a1   : > { %v1532_v16 = vpack.c.bf16 %v1248_v14, %v1245_v11  ;;  %v1250_v17 = vpop.f32.mrb[3].mxu0 }
 0x1a3   : > { %1460 = vmatmul.mubr.bf16.gmra.mrb[108].mxu0 %v7842_v13  ;;  %6905 = vmatprep.mubr.msk.bf16.mxu1 %vm1552_vm0, %v1532_v16 }
 0x1a4   : > { %1467 = vmatprep.mubr.bf16.mxu0 %v7845_v15 }
 0x1a6   : > { %v1253_v18 = vpop.f32.mrb[4].mxu0 }
 0x1a7   : > { %v1255_v19 = vpop.f32.mrb[5].mxu0 }
 0x1a8   : > { %v1256_v21 = vpop.f32.mrb[6].mxu0  ;;  %v7875_v19 = vld [vmem:[%s9985_s6 + $0x40] sm:$0xff]  }
 0x1a9   : > { %v1533_v23 = vpack.c.bf16 %v1256_v21, %v1253_v18  ;;  %v1258_v24 = vpop.f32.mrb[7].mxu0  ;;  %v7874_v18 = vld [vmem:[%s9985_s6 + $0x38] sm:$0xff]  }
 0x1ab   : > { %1468 = vmatmul.mubr.bf16.gmra.mrb[112].mxu0 %v7847_v20  ;;  %6906 = vmatmul.mubr.msk.bf16.vlgmr.msra.gmra.mrb[0].mxu1 %vm1552_vm0, %v1533_v23 }
 0x1ac   : > { %1475 = vmatprep.mubr.bf16.mxu0 %v7848_v22  ;;  %6914 = vmatpush3.bf16.msra.mxu1 %v8624_v52  ;;  %v7862_v52 = vld [vmem:[%s9983_s4 + $0x214] ss:$8 sps:$4 sm:$0xff]  }
 0x1ad   : > { %6915 = vmatprep.subr.bf16.mxu1 %v7858_v25 }
 0x1ae   : > { %v1261_v27 = vpop.f32.mrb[8].mxu0 }
 0x1af   : > { %v1263_v28 = vpop.f32.mrb[9].mxu0 }
 0x1b0   : > { %v1264_v30 = vpop.f32.mrb[10].mxu0  ;;  %6916 = vmatpush3.bf16.msra.mxu1 %v7858_v25 }
 0x1b1   : > { %v1534_v32 = vpack.c.bf16 %v1264_v30, %v1261_v27  ;;  %v1266_v33 = vpop.f32.mrb[11].mxu0  ;;  %6925 = vmatprep.subr.bf16.mxu1 %v7871_v26 }
 0x1b3   : > { %1476 = vmatmul.mubr.bf16.gmra.mrb[116].mxu0 %v7850_v29  ;;  %6909 = vmatprep.mubr.msk.bf16.mxu1 %vm1552_vm0, %v1534_v32 }
 0x1b4   : > { %1483 = vmatprep.mubr.bf16.mxu0 %v7851_v31 }
 0x1b6   : > { %v1269_v34 = vpop.f32.mrb[12].mxu0 }
 0x1b7   : > { %v1271_v35 = vpop.f32.mrb[13].mxu0 }
 0x1b8   : > { %v1272_v37 = vpop.f32.mrb[14].mxu0 }
 0x1b9   : > { %v1535_v39 = vpack.c.bf16 %v1272_v37, %v1269_v34  ;;  %v1274_v40 = vpop.f32.mrb[15].mxu0 }
 0x1ba   : > { %v7876_v40 = vld [vmem:[%s9985_s6 + $0x48] sm:$0xff]  }
 0x1bb   : > { %1484 = vmatmul.mubr.bf16.gmra.mrb[120].mxu0 %v7853_v36  ;;  %6910 = vmatmul.mubr.msk.bf16.gmra.mrb[4].mxu1 %vm1552_vm0, %v1535_v39 }
 0x1bc   : > { %1491 = vmatprep.mubr.bf16.mxu0 %v7854_v38 }
 0x1be   : > { %v1277_v41 = vpop.f32.mrb[16].mxu0 }
 0x1bf   : > { %v1279_v42 = vpop.f32.mrb[17].mxu0 }
 0x1c0   : > { %v1280_v44 = vpop.f32.mrb[18].mxu0 }
 0x1c1   : > { %v1642_v46 = vpack.c.bf16 %v1280_v44, %v1277_v41  ;;  %v1282_v47 = vpop.f32.mrb[19].mxu0  ;;  %v7877_v41 = vld [vmem:[%s9985_s6 + $0x50] sm:$0xff]  }
 0x1c3   : > { %1492 = vmatmul.mubr.bf16.gmra.mrb[124].mxu0 %v7856_v43  ;;  %6917 = vmatprep.mubr.msk.bf16.mxu1 %vm1552_vm0, %v1642_v46 }
 0x1c4   : > { %1499 = vmatprep.mubr.bf16.mxu0 %v7859_v45 }
 0x1c6   : > { %v1285_v48 = vpop.f32.mrb[20].mxu0 }
 0x1c7   : > { %v1287_v49 = vpop.f32.mrb[21].mxu0 }
 0x1c8   : > { %v1288_v51 = vpop.f32.mrb[22].mxu0 }
 0x1c9   : > { %v1643_v53 = vpack.c.bf16 %v1288_v51, %v1285_v48  ;;  %v1290_v54 = vpop.f32.mrb[23].mxu0 }
 0x1cb   : > { %1500 = vmatmul.mubr.bf16.gmra.mrb[128].mxu0 %v7861_v50  ;;  %6918 = vmatmul.mubr.msk.bf16.vlgmr.msra.gmra.mrb[0].mxu1 %vm1552_vm0, %v1643_v53 }
 0x1cc   : > { %1507 = vmatprep.mubr.bf16.mxu0 %v7862_v52  ;;  %6926 = vmatpush3.bf16.msra.mxu1 %v7871_v26 }
 0x1cd   : > { %6927 = vmatprep.subr.bf16.mxu1 %v7872_v55 }
 0x1ce   : > { %v1293_v57 = vpop.f32.mrb[24].mxu0 }
 0x1cf   : > { %v1295_v58 = vpop.f32.mrb[25].mxu0 }
 0x1d0   : > { %v1296_v60 = vpop.f32.mrb[26].mxu0  ;;  %6928 = vmatpush3.bf16.msra.mxu1 %v7872_v55 }
 0x1d1   : > { %v1644_v62 = vpack.c.bf16 %v1296_v60, %v1293_v57  ;;  %v1298_v63 = vpop.f32.mrb[27].mxu0  ;;  %6937 = vmatprep.subr.bf16.mxu1 %v7873_v56 }
 0x1d2   : > { %v7879_v63 = vld [vmem:[%s9985_s6 + $0x60] sm:$0xff]  }
 0x1d3   : > { %1508 = vmatmul.mubr.bf16.gmra.mrb[132].mxu0 %v7864_v59  ;;  %6921 = vmatprep.mubr.msk.bf16.mxu1 %vm1552_vm0, %v1644_v62  ;;  %v7878_v62 = vld [vmem:[%s9985_s6 + $0x58] sm:$0xff]  }
 0x1d4   : > { %1515 = vmatprep.mubr.bf16.mxu0 %v7865_v61 }
 0x1d6   : > { %v1301_v0 = vpop.f32.mrb[28].mxu0 }
 0x1d7   : > { %v1303_v1 = vpop.f32.mrb[29].mxu0 }
 0x1d8   : > { %v1304_v3 = vpop.f32.mrb[30].mxu0 }
 0x1d9   : > { %v1645_v5 = vpack.c.bf16 %v1304_v3, %v1301_v0  ;;  %v1306_v6 = vpop.f32.mrb[31].mxu0 }
 0x1db   : > { %1516 = vmatmul.mubr.bf16.gmra.mrb[136].mxu0 %v7867_v2  ;;  %6922 = vmatmul.mubr.msk.bf16.gmra.mrb[4].mxu1 %vm1552_vm0, %v1645_v5 }
 0x1dc   : > { %1523 = vmatprep.mubr.bf16.mxu0 %v7868_v4 }
 0x1de   : > { %v1309_v7 = vpop.f32.mrb[32].mxu0 }
 0x1df   : > { %v1311_v8 = vpop.f32.mrb[33].mxu0 }
 0x1e0   : > { %v1312_v10 = vpop.f32.mrb[34].mxu0 }
 0x1e1   : > { %v1747_v11 = vpack.c.bf16 %v1312_v10, %v1309_v7  ;;  %v1314_v12 = vpop.f32.mrb[35].mxu0 }
 0x1e3   : > { %1524 = vmatmul.mubr.bf16.gmra.mrb[140].mxu0 %v7870_v9  ;;  %6929 = vmatprep.mubr.msk.bf16.mxu1 %vm1552_vm0, %v1747_v11 }
 0x1e6   : > { %v1317_v13 = vpop.f32.mrb[36].mxu0 }
 0x1e7   : > { %v1319_v14 = vpop.f32.mrb[37].mxu0 }
 0x1e8   : > { %v1320_v15 = vpop.f32.mrb[38].mxu0 }
 0x1e9   : > { %v1748_v16 = vpack.c.bf16 %v1320_v15, %v1317_v13  ;;  %v1322_v17 = vpop.f32.mrb[39].mxu0 }
 0x1eb   : > { %6930 = vmatmul.mubr.msk.bf16.vlgmr.msra.gmra.mrb[0].mxu1 %vm1552_vm0, %v1748_v16 }
 0x1ec   : > { %6938 = vmatpush3.bf16.msra.mxu1 %v7873_v56 }
 0x1ed   : > { %6939 = vmatprep.subr.bf16.mxu1 %v7874_v18 }
 0x1ee   : > { %v1325_v20 = vpop.f32.mrb[40].mxu0 }
 0x1ef   : > { %v1327_v21 = vpop.f32.mrb[41].mxu0 }
 0x1f0   : > { %v1328_v22 = vpop.f32.mrb[42].mxu0  ;;  %6940 = vmatpush3.bf16.msra.mxu1 %v7874_v18  ;;  %v7881_v21 = vld [vmem:[%s9985_s6 + $0x70] sm:$0xff]  }
 0x1f1   : > { %v1749_v23 = vpack.c.bf16 %v1328_v22, %v1325_v20  ;;  %v1330_v24 = vpop.f32.mrb[43].mxu0  ;;  %6949 = vmatprep.subr.bf16.mxu1 %v7875_v19  ;;  %v7880_v20 = vld [vmem:[%s9985_s6 + $0x68] sm:$0xff]  }
 0x1f3   : > { %6933 = vmatprep.mubr.msk.bf16.mxu1 %vm1552_vm0, %v1749_v23 }
 0x1f6   : > { %v1333_v25 = vpop.f32.mrb[44].mxu0 }
 0x1f7   : > { %v1335_v26 = vpop.f32.mrb[45].mxu0 }
 0x1f8   : > { %v1336_v27 = vpop.f32.mrb[46].mxu0 }
 0x1f9   : > { %v1750_v28 = vpack.c.bf16 %v1336_v27, %v1333_v25  ;;  %v1338_v29 = vpop.f32.mrb[47].mxu0 }
 0x1fb   : > { %6934 = vmatmul.mubr.msk.bf16.gmra.mrb[4].mxu1 %vm1552_vm0, %v1750_v28 }
 0x1fe   : > { %v1341_v30 = vpop.f32.mrb[48].mxu0 }
 0x1ff   : > { %v1343_v31 = vpop.f32.mrb[49].mxu0 }
 0x200   : > { %v1344_v32 = vpop.f32.mrb[50].mxu0 }
 0x201   : > { %v1852_v33 = vpack.c.bf16 %v1344_v32, %v1341_v30  ;;  %v1346_v34 = vpop.f32.mrb[51].mxu0 }
 0x203   : > { %6941 = vmatprep.mubr.msk.bf16.mxu1 %vm1552_vm0, %v1852_v33 }
 0x206   : > { %v1349_v35 = vpop.f32.mrb[52].mxu0 }
 0x207   : > { %v1351_v36 = vpop.f32.mrb[53].mxu0 }
 0x208   : > { %v1352_v37 = vpop.f32.mrb[54].mxu0 }
 0x209   : > { %v1853_v38 = vpack.c.bf16 %v1352_v37, %v1349_v35  ;;  %v1354_v39 = vpop.f32.mrb[55].mxu0 }
 0x20b   : > { %6942 = vmatmul.mubr.msk.bf16.vlgmr.msra.gmra.mrb[0].mxu1 %vm1552_vm0, %v1853_v38 }
 0x20c   : > { %6950 = vmatpush3.bf16.msra.mxu1 %v7875_v19 }
 0x20d   : > { %6951 = vmatprep.subr.bf16.mxu1 %v7876_v40 }
 0x20e   : > { %v1357_v42 = vpop.f32.mrb[56].mxu0 }
 0x20f   : > { %v1359_v43 = vpop.f32.mrb[57].mxu0 }
 0x210   : > { %v1360_v44 = vpop.f32.mrb[58].mxu0  ;;  %6952 = vmatpush3.bf16.msra.mxu1 %v7876_v40  ;;  %v7883_v43 = vld [vmem:[%s9985_s6 + $0x80] sm:$0xff]  }
 0x211   : > { %v1854_v45 = vpack.c.bf16 %v1360_v44, %v1357_v42  ;;  %v1362_v46 = vpop.f32.mrb[59].mxu0  ;;  %6961 = vmatprep.subr.bf16.mxu1 %v7877_v41  ;;  %v7882_v42 = vld [vmem:[%s9985_s6 + $0x78] sm:$0xff]  }
 0x213   : > { %6945 = vmatprep.mubr.msk.bf16.mxu1 %vm1552_vm0, %v1854_v45 }
 0x216   : > { %v1365_v47 = vpop.f32.mrb[60].mxu0 }
 0x217   : > { %v1367_v48 = vpop.f32.mrb[61].mxu0 }
 0x218   : > { %v1368_v49 = vpop.f32.mrb[62].mxu0 }
 0x219   : > { %v1855_v50 = vpack.c.bf16 %v1368_v49, %v1365_v47  ;;  %v1370_v51 = vpop.f32.mrb[63].mxu0 }
 0x21b   : > { %6946 = vmatmul.mubr.msk.bf16.gmra.mrb[4].mxu1 %vm1552_vm0, %v1855_v50 }
 0x21e   : > { %v1373_v52 = vpop.f32.mrb[64].mxu0 }
 0x21f   : > { %v1375_v53 = vpop.f32.mrb[65].mxu0 }
 0x220   : > { %v1376_v54 = vpop.f32.mrb[66].mxu0 }
 0x221   : > { %v1957_v55 = vpack.c.bf16 %v1376_v54, %v1373_v52  ;;  %v1378_v56 = vpop.f32.mrb[67].mxu0 }
 0x223   : > { %6953 = vmatprep.mubr.msk.bf16.mxu1 %vm1552_vm0, %v1957_v55 }
 0x226   : > { %v1381_v57 = vpop.f32.mrb[68].mxu0 }
 0x227   : > { %v1383_v58 = vpop.f32.mrb[69].mxu0 }
 0x228   : > { %v1384_v59 = vpop.f32.mrb[70].mxu0 }
 0x229   : > { %v1958_v60 = vpack.c.bf16 %v1384_v59, %v1381_v57  ;;  %v1386_v61 = vpop.f32.mrb[71].mxu0 }
 0x22b   : > { %6954 = vmatmul.mubr.msk.bf16.vlgmr.msra.gmra.mrb[0].mxu1 %vm1552_vm0, %v1958_v60 }
 0x22c   : > { %6962 = vmatpush3.bf16.msra.mxu1 %v7877_v41 }
 0x22d   : > { %6963 = vmatprep.subr.bf16.mxu1 %v7878_v62 }
 0x22e   : > { %v1389_v0 = vpop.f32.mrb[72].mxu0 }
 0x22f   : > { %v1391_v1 = vpop.f32.mrb[73].mxu0 }
 0x230   : > { %v1392_v2 = vpop.f32.mrb[74].mxu0  ;;  %6964 = vmatpush3.bf16.msra.mxu1 %v7878_v62 }
 0x231   : > { %v1959_v3 = vpack.c.bf16 %v1392_v2, %v1389_v0  ;;  %v1394_v4 = vpop.f32.mrb[75].mxu0  ;;  %6973 = vmatprep.subr.bf16.mxu1 %v7879_v63  ;;  %v7884_v0 = vld [vmem:[%s9985_s6 + $0x88] sm:$0xff]  }
 0x233   : > { %6957 = vmatprep.mubr.msk.bf16.mxu1 %vm1552_vm0, %v1959_v3 }
 0x236   : > { %v1397_v5 = vpop.f32.mrb[76].mxu0 }
 0x237   : > { %v1399_v6 = vpop.f32.mrb[77].mxu0 }
 0x238   : > { %v1400_v7 = vpop.f32.mrb[78].mxu0 }
 0x239   : > { %v1960_v8 = vpack.c.bf16 %v1400_v7, %v1397_v5  ;;  %v1402_v9 = vpop.f32.mrb[79].mxu0 }
 0x23b   : > { %6958 = vmatmul.mubr.msk.bf16.gmra.mrb[4].mxu1 %vm1552_vm0, %v1960_v8 }
 0x23e   : > { %v1405_v10 = vpop.f32.mrb[80].mxu0 }
 0x23f   : > { %v1407_v11 = vpop.f32.mrb[81].mxu0 }
 0x240   : > { %v1408_v12 = vpop.f32.mrb[82].mxu0 }
 0x241   : > { %v2062_v13 = vpack.c.bf16 %v1408_v12, %v1405_v10  ;;  %v1410_v14 = vpop.f32.mrb[83].mxu0 }
 0x243   : > { %6965 = vmatprep.mubr.msk.bf16.mxu1 %vm1552_vm0, %v2062_v13 }
 0x246   : > { %v1413_v15 = vpop.f32.mrb[84].mxu0 }
 0x247   : > { %v1415_v16 = vpop.f32.mrb[85].mxu0 }
 0x248   : > { %v1416_v17 = vpop.f32.mrb[86].mxu0 }
 0x249   : > { %v2063_v18 = vpack.c.bf16 %v1416_v17, %v1413_v15  ;;  %v1418_v19 = vpop.f32.mrb[87].mxu0 }
 0x24b   : > { %6966 = vmatmul.mubr.msk.bf16.vlgmr.msra.gmra.mrb[0].mxu1 %vm1552_vm0, %v2063_v18 }
 0x24c   : > { %6974 = vmatpush3.bf16.msra.mxu1 %v7879_v63 }
 0x24d   : > { %6975 = vmatprep.subr.bf16.mxu1 %v7880_v20 }
 0x24e   : > { %v1421_v22 = vpop.f32.mrb[88].mxu0 }
 0x24f   : > { %v1423_v23 = vpop.f32.mrb[89].mxu0 }
 0x250   : > { %v1424_v24 = vpop.f32.mrb[90].mxu0  ;;  %6976 = vmatpush3.bf16.msra.mxu1 %v7880_v20 }
 0x251   : > { %v2064_v25 = vpack.c.bf16 %v1424_v24, %v1421_v22  ;;  %v1426_v26 = vpop.f32.mrb[91].mxu0  ;;  %6985 = vmatprep.subr.bf16.mxu1 %v7881_v21 }
 0x253   : > { %6969 = vmatprep.mubr.msk.bf16.mxu1 %vm1552_vm0, %v2064_v25 }
 0x256   : > { %v1429_v27 = vpop.f32.mrb[92].mxu0 }
 0x257   : > { %v1431_v28 = vpop.f32.mrb[93].mxu0 }
 0x258   : > { %v1432_v29 = vpop.f32.mrb[94].mxu0 }
 0x259   : > { %v2065_v30 = vpack.c.bf16 %v1432_v29, %v1429_v27  ;;  %v1434_v31 = vpop.f32.mrb[95].mxu0 }
 0x25a   : > { %v631_v31 = vld [vmem:[#allocation8 + $0x10] sm:$0xff] }
 0x25b   : > { %6970 = vmatmul.mubr.msk.bf16.gmra.mrb[4].mxu1 %vm1552_vm0, %v2065_v30 }
 0x25e   : > { %v1437_v32 = vpop.f32.mrb[96].mxu0 }
 0x25f   : > { %v1439_v33 = vpop.f32.mrb[97].mxu0 }
 0x260   : > { %v1440_v34 = vpop.f32.mrb[98].mxu0 }
 0x261   : > { %v2167_v35 = vpack.c.bf16 %v1440_v34, %v1437_v32  ;;  %v1442_v36 = vpop.f32.mrb[99].mxu0  ;;  %v632_v32 = vld [vmem:[#allocation8 + $0x18] sm:$0xff]  ;;  %v8228_v34 = vmov 0.0|0.0  }
 0x262   : > { %v7430_v33 = vpack.c.bf16 %v632_v32, %v631_v31  ;;  %v634_v36 = vld [vmem:[#allocation8 + $0x28] sm:$0xff] }
 0x263   : > { %6977 = vmatprep.mubr.msk.bf16.mxu1 %vm1552_vm0, %v2167_v35  ;;  %v633_v35 = vld [vmem:[#allocation8 + $0x20] sm:$0xff] }
 0x266   : > { %v1445_v37 = vpop.f32.mrb[100].mxu0 }
 0x267   : > { %v1447_v38 = vpop.f32.mrb[101].mxu0 }
 0x268   : > { %v1448_v39 = vpop.f32.mrb[102].mxu0  ;;  %v8230_v38 = vmov 0.0  }
 0x269   : > { %v2168_v40 = vpack.c.bf16 %v1448_v39, %v1445_v37  ;;  %v1450_v41 = vpop.f32.mrb[103].mxu0  ;;  %v7433_v37 = vpack.c.bf16 %v634_v36, %v633_v35  ;;  %7191 = vmatprep.subr.bf16.mxu0 %v8230_v38  ;;  %7199 = vmatprep.mubr.msk.bf16.mxu0 %vm8229_vm1, %v8230_v38 }
 0x26b   : > { %6978 = vmatmul.mubr.msk.bf16.vlgmr.msra.gmra.mrb[0].mxu1 %vm1552_vm0, %v2168_v40 }
 0x26c   : > { %6986 = vmatpush3.bf16.msra.mxu1 %v7881_v21 }
 0x26d   : > { %6987 = vmatprep.subr.bf16.mxu1 %v7882_v42 }
 0x26e   : > { %v1453_v44 = vpop.f32.mrb[104].mxu0 }
 0x26f   : > { %v1455_v45 = vpop.f32.mrb[105].mxu0 }
 0x270   : > { %v1456_v46 = vpop.f32.mrb[106].mxu0  ;;  %6988 = vmatpush3.bf16.msra.mxu1 %v7882_v42  ;;  %v6398_v42 = vld [vmem:[#allocation8] ss:$0 sm:$0xff] }
 0x271   : > { %v2169_v47 = vpack.c.bf16 %v1456_v46, %v1453_v44  ;;  %v1458_v48 = vpop.f32.mrb[107].mxu0  ;;  %6997 = vmatprep.subr.bf16.mxu1 %v7883_v43 }
 0x273   : > { %6981 = vmatprep.mubr.msk.bf16.mxu1 %vm1552_vm0, %v2169_v47 }
 0x276   : > { %v1461_v49 = vpop.f32.mrb[108].mxu0 }
 0x277   : > { %v1463_v50 = vpop.f32.mrb[109].mxu0 }
 0x278   : > { %v1464_v51 = vpop.f32.mrb[110].mxu0 }
 0x279   : > { %v2170_v52 = vpack.c.bf16 %v1464_v51, %v1461_v49  ;;  %v1466_v53 = vpop.f32.mrb[111].mxu0 }
 0x27b   : > { %6982 = vmatmul.mubr.msk.bf16.gmra.mrb[4].mxu1 %vm1552_vm0, %v2170_v52 }
 0x27e   : > { %v1469_v54 = vpop.f32.mrb[112].mxu0 }
 0x27f   : > { %v1471_v55 = vpop.f32.mrb[113].mxu0 }
 0x280   : > { %v1472_v56 = vpop.f32.mrb[114].mxu0 }
 0x281   : > { %v2272_v57 = vpack.c.bf16 %v1472_v56, %v1469_v54  ;;  %v1474_v58 = vpop.f32.mrb[115].mxu0 }
 0x283   : > { %6989 = vmatprep.mubr.msk.bf16.mxu1 %vm1552_vm0, %v2272_v57 }
 0x286   : > { %v1477_v59 = vpop.f32.mrb[116].mxu0 }
 0x287   : > { %v1479_v60 = vpop.f32.mrb[117].mxu0 }
 0x288   : > { %v1480_v61 = vpop.f32.mrb[118].mxu0 }
 0x289   : > { %v2273_v62 = vpack.c.bf16 %v1480_v61, %v1477_v59  ;;  %v1482_v63 = vpop.f32.mrb[119].mxu0 }
 0x28b   : > { %6990 = vmatmul.mubr.msk.bf16.vlgmr.msra.gmra.mrb[0].mxu1 %vm1552_vm0, %v2273_v62 }
 0x28c   : > { %6998 = vmatpush3.bf16.msra.mxu1 %v7883_v43 }
 0x28d   : > { %6999 = vmatprep.subr.bf16.mxu1 %v7884_v0 }
 0x28e   : > { %v1485_v1 = vpop.f32.mrb[120].mxu0 }
 0x28f   : > { %v1487_v2 = vpop.f32.mrb[121].mxu0 }
 0x290   : > { %v1488_v3 = vpop.f32.mrb[122].mxu0  ;;  %7000 = vmatpush3.bf16.msra.mxu1 %v7884_v0 }
 0x291   : > { %v2274_v4 = vpack.c.bf16 %v1488_v3, %v1485_v1  ;;  %v1490_v5 = vpop.f32.mrb[123].mxu0  ;;  %7429 = vmatprep.subr.bf16.mxu1 %v8228_v34 }
 0x293   : > { %6993 = vmatprep.mubr.msk.bf16.mxu1 %vm1552_vm0, %v2274_v4 }
 0x296   : > { %v1493_v6 = vpop.f32.mrb[124].mxu0 }
 0x297   : > { %v1495_v7 = vpop.f32.mrb[125].mxu0 }
 0x298   : > { %v1496_v8 = vpop.f32.mrb[126].mxu0 }
 0x299   : > { %v2275_v9 = vpack.c.bf16 %v1496_v8, %v1493_v6  ;;  %v1498_v10 = vpop.f32.mrb[127].mxu0 }
 0x29b   : > { %6994 = vmatmul.mubr.msk.bf16.gmra.mrb[4].mxu1 %vm1552_vm0, %v2275_v9 }
 0x29e   : > { %v1501_v11 = vpop.f32.mrb[128].mxu0 }
 0x29f   : > { %v1503_v12 = vpop.f32.mrb[129].mxu0 }
 0x2a0   : > { %v1504_v13 = vpop.f32.mrb[130].mxu0 }
 0x2a1   : > { %v2377_v14 = vpack.c.bf16 %v1504_v13, %v1501_v11  ;;  %v1506_v15 = vpop.f32.mrb[131].mxu0  ;;  %v2576_v13 = vlaneseq }
 0x2a3   : > { %7001 = vmatprep.mubr.msk.bf16.mxu1 %vm1552_vm0, %v2377_v14  ;;  %v8848_v14 = vshrl.u32 %v2576_v13, 7 }
 0x2a5   : > { %v8851_v15 = vsub.s32 0, %v8848_v14 }
 0x2a6   : > { %v1509_v16 = vpop.f32.mrb[132].mxu0 }
 0x2a7   : > { %v1511_v17 = vpop.f32.mrb[133].mxu0 }
 0x2a8   : > { %v1512_v18 = vpop.f32.mrb[134].mxu0 }
 0x2a9   : > { %v2378_v19 = vpack.c.bf16 %v1512_v18, %v1509_v16  ;;  %v1514_v20 = vpop.f32.mrb[135].mxu0 }
 0x2ab   : > { %7002 = vmatmul.mubr.msk.bf16.vlgmr.msra.gmra.mrb[0].mxu1 %vm1552_vm0, %v2378_v19 }
 0x2ac   : > { %7431 = vmatpush3.bf16.msra.mxu1 %v7430_v33 }
 0x2ad   : > { %7432 = vmatprep.subr.bf16.mxu1 %v8228_v34 }
 0x2ae   : > { %v1517_v21 = vpop.f32.mrb[136].mxu0 }
 0x2af   : > { %v1519_v22 = vpop.f32.mrb[137].mxu0 }
 0x2b0   : > { %v1520_v23 = vpop.f32.mrb[138].mxu0  ;;  %7434 = vmatpush3.bf16.msra.mxu1 %v7433_v37 }
 0x2b1   : > { %v2379_v24 = vpack.c.bf16 %v1520_v23, %v1517_v21  ;;  %v1522_v25 = vpop.f32.mrb[139].mxu0  ;;  %7435 = vmatprep.subr.bf16.mxu1 %v8228_v34 }
 0x2b3   : > { %7005 = vmatprep.mubr.msk.bf16.mxu1 %vm1552_vm0, %v2379_v24 }
 0x2b6   : > { %v1525_v26 = vpop.f32.mrb[140].mxu0 }
 0x2b7   : > { %v1527_v27 = vpop.f32.mrb[141].mxu0 }
 0x2b8   : > { %v1528_v28 = vpop.f32.mrb[142].mxu0 }
 0x2b9   : > { %v2380_v29 = vpack.c.bf16 %v1528_v28, %v1525_v26  ;;  %v1530_v30 = vpop.f32.mrb[143].mxu0 }
 0x2bb   : > { %7006 = vmatmul.mubr.msk.bf16.gmra.mrb[4].mxu1 %vm1552_vm0, %v2380_v29 }
 0x2bc   : > { %7017 = vmatprep.mubr.msk.f32.mxu1 %vm8229_vm1, %v8230_v38 }
 0x37e   : > { %v7003_v39 = vpop.f32.mrb[0].mxu1 }
 0x37f   : > { %v2443_v40 = vpop.f32.mrb[1].mxu1  ;;  %v7489_v47 = vadd.f32 %v7003_v39, %v6398_v42 }
 0x380   : > { %v7004_v41 = vpop.f32.mrb[2].mxu1  ;;  %v7490_v45 = vadd.f32 %v6398_v42, %v2443_v40 }
 0x381   : > { %v2446_v43 = vpop.f32.mrb[3].mxu1  ;;  %v2485_v50 = vsel %vm1552_vm0, %v7489_v47, 0.0  ;;  %v7491_v51 = vadd.f32 %v7004_v41, %v6398_v42 }
 0x382   : > { %v7492_v44 = vadd.f32 %v6398_v42, %v2446_v43  ;;  %v2482_v48 = vsel %vm1552_vm0, %v7490_v45, 0.0 }
 0x383   : > { %v2487_v55 = vsel %vm1552_vm0, %v7491_v51, 0.0 }
 0x384   : > { %v2483_v46 = vsel %vm1552_vm0, %v7492_v44, 0.0 }
 0x385   : > { %v2484_v49 = vadd.f32 %v2483_v46, %v2482_v48 }
 0x387   : > { %v2486_v52 = vadd.f32 %v2485_v50, %v2484_v49 }
 0x389   : > { %v2488_v58 = vadd.f32 %v2487_v55, %v2486_v52 }
 0x38e   : > { %v7007_v53 = vpop.f32.mrb[4].mxu1 }
 0x38f   : > { %v2459_v54 = vpop.f32.mrb[5].mxu1  ;;  %v7493_v60 = vadd.f32 %v7007_v53, %v6398_v42 }
 0x390   : > { %v7494_v56 = vadd.f32 %v6398_v42, %v2459_v54  ;;  %v7008_v57 = vpop.f32.mrb[6].mxu1 }
 0x391   : > { %v2462_v59 = vpop.f32.mrb[7].mxu1  ;;  %v7495_v0 = vadd.f32 %v7008_v57, %v6398_v42  ;;  %v2493_v3 = vsel %vm1552_vm0, %v7493_v60, 0.0 }
 0x392   : > { %v2489_v61 = vsel %vm1552_vm0, %v7494_v56, 0.0  ;;  %v7496_v62 = vadd.f32 %v6398_v42, %v2462_v59 }
 0x393   : > { %v2490_v63 = vadd.f32 %v2489_v61, %v2488_v58  ;;  %v2495_v5 = vsel %vm1552_vm0, %v7495_v0, 0.0 }
 0x394   : > { %v2491_v1 = vsel %vm1552_vm0, %v7496_v62, 0.0 }
 0x395   : > { %v2492_v2 = vadd.f32 %v2491_v1, %v2490_v63  ;;  %v6449_v63 = vld [vmem:[#allocation8 + $0x1] ss:$0 sm:$0xff] }
 0x397   : > { %v2494_v4 = vadd.f32 %v2493_v3, %v2492_v2 }
 0x399   : > { %v2496_v6 = vadd.f32 %v2495_v5, %v2494_v4  ;;  %v6450_v4 = vld [vmem:[#allocation8 + $0x2] ss:$0 sm:$0xff] }
 0x39b   : > { %v2497_v7 = vrot.slane %v2496_v6, 4 }
 0x39d   : > { %v2498_v8 = vadd.f32 %v2497_v7, %v2496_v6 }
 0x39f   : > { %v2499_v9 = vrot.slane %v2498_v8, 2 }
 0x3a1   : > { %v2500_v10 = vadd.f32 %v2499_v9, %v2498_v8 }
 0x3a3   : > { %v2501_v11 = vrot.slane %v2500_v10, 1 }
 0x3a5   : > { %v2502_v12 = vadd.f32 %v2501_v11, %v2500_v10 }
 0x3a7   : > { %7018 = vmatmul.mubr.msk.f32.vlgmr.msra.gmra.mrb[8].mxu1 %vm1552_vm0, %v2502_v12 }
 0x3a8   : > { %7437 = vmatpush3.bf16.msra.mxu1 %v7430_v33  ;;  %7028 = vmatprep.mubr.msk.f32.mxu1 %vm8229_vm1, %v8230_v38 }
 0x3a9   : > { %7438 = vmatprep.subr.bf16.mxu1 %v8228_v34 }
 0x3ac   : > { %7440 = vmatpush3.bf16.msra.mxu1 %v7433_v37 }
 0x3ad   : > { %7031 = vmatprep.subr.bf16.mxu1 %v8230_v38 }
 0x47a   : > { %v2572_v16 = vpop.f32.mrb[8].mxu1 }
 0x47b   : > { %v2579_v17 = vrot.slane %v2572_v16, %v8851_v15  ;;  %v7019_v18 = vpop.f32.mrb[9].mxu1 }
 0x47d   : > { %v2580_v19 = vsub.f32 %v7490_v45, %v2579_v17  ;;  %v2581_v20 = vsub.f32 %v7492_v44, %v2579_v17  ;;  %v2582_v21 = vsub.f32 %v7489_v47, %v2579_v17  ;;  %v2583_v22 = vsub.f32 %v7491_v51, %v2579_v17 }
 0x47e   : > { %v2584_v23 = vsub.f32 %v7494_v56, %v2579_v17  ;;  %v2585_v27 = vsub.f32 %v7496_v62, %v2579_v17  ;;  %v2586_v32 = vsub.f32 %v7493_v60, %v2579_v17  ;;  %v2587_v37 = vsub.f32 %v7495_v0, %v2579_v17 }
 0x47f   : > { %v2588_v24 = vmul.f32 %v2580_v19, %v2580_v19  ;;  %v2589_v25 = vmul.f32 %v2581_v20, %v2581_v20  ;;  %v2590_v26 = vmul.f32 %v2582_v21, %v2582_v21  ;;  %v2591_v28 = vmul.f32 %v2583_v22, %v2583_v22 }
 0x480   : > { %v2592_v33 = vmul.f32 %v2584_v23, %v2584_v23  ;;  %v2593_v39 = vmul.f32 %v2585_v27, %v2585_v27  ;;  %v2594_v42 = vmul.f32 %v2586_v32, %v2586_v32  ;;  %v2595_v45 = vmul.f32 %v2587_v37, %v2587_v37 }
 0x481   : > { %v2596_v29 = vsel %vm1552_vm0, %v2588_v24, 0.0  ;;  %v2597_v30 = vsel %vm1552_vm0, %v2589_v25, 0.0  ;;  %v2599_v35 = vsel %vm1552_vm0, %v2590_v26, 0.0  ;;  %v2601_v40 = vsel %vm1552_vm0, %v2591_v28, 0.0 }
 0x482   : > { %v2598_v31 = vadd.f32 %v2597_v30, %v2596_v29  ;;  %v2603_v43 = vsel %vm1552_vm0, %v2592_v33, 0.0  ;;  %v2605_v46 = vsel %vm1552_vm0, %v2593_v39, 0.0  ;;  %v2607_v48 = vsel %vm1552_vm0, %v2594_v42, 0.0  ;;  %v8872_v42 = vld [vmem:[%s9984_s5] sm:$0xff]  }
 0x483   : > { %v2609_v50 = vsel %vm1552_vm0, %v2595_v45, 0.0  ;;  %v8889_v45 = vld [vmem:[%s9984_s5 + $0x8] sm:$0xff]  }
 0x484   : > { %v2600_v36 = vadd.f32 %v2599_v35, %v2598_v31 }
 0x486   : > { %v2602_v41 = vadd.f32 %v2601_v40, %v2600_v36 }
 0x488   : > { %v2604_v44 = vadd.f32 %v2603_v43, %v2602_v41  ;;  %v7894_v43 = vld [vmem:[%s9985_s6 + $0x90] sm:$0xff]  }
 0x48a   : > { %v2606_v47 = vadd.f32 %v2605_v46, %v2604_v44  ;;  %v7895_v44 = vld [vmem:[%s9985_s6 + $0x98] sm:$0xff]   ;;  %v8899_v46 = vld [vmem:[%s9984_s5 + $0x10] sm:$0xff]  }
 0x48c   : > { %v2608_v49 = vadd.f32 %v2607_v48, %v2606_v47  ;;  %v8908_v47 = vld [vmem:[%s9984_s5 + $0x18] sm:$0xff]   ;;  %v8917_v48 = vld [vmem:[%s9984_s5 + $0x20] sm:$0xff]  }
 0x48e   : > { %v2610_v51 = vadd.f32 %v2609_v50, %v2608_v49  ;;  %v8926_v49 = vld [vmem:[%s9984_s5 + $0x28] sm:$0xff]   ;;  %v8935_v50 = vld [vmem:[%s9984_s5 + $0x30] sm:$0xff]  }
 0x490   : > { %v2611_v52 = vrot.slane %v2610_v51, 4 }
 0x492   : > { %v2612_v53 = vadd.f32 %v2611_v52, %v2610_v51  ;;  %v8944_v51 = vld [vmem:[%s9984_s5 + $0x38] sm:$0xff]   ;;  %v8953_v52 = vld [vmem:[%s9984_s5 + $0x40] sm:$0xff]  }
 0x494   : > { %v2613_v54 = vrot.slane %v2612_v53, 2 }
 0x496   : > { %v2614_v55 = vadd.f32 %v2613_v54, %v2612_v53  ;;  %v7903_v53 = vld [vmem:[%s9986_s7] sm:$0xff]   ;;  %v7917_v54 = vld [vmem:[%s9986_s7 + $0x8] sm:$0xff]  }
 0x497   : > { %7192 = vmatpush3.bf16.msra.mxu0 %v7903_v53 }
 0x498   : > { %v2615_v56 = vrot.slane %v2614_v55, 1  ;;  %7193 = vmatprep.subr.bf16.mxu0 %v8230_v38 }
 0x49a   : > { %v2616_v57 = vadd.f32 %v2615_v56, %v2614_v55 }
 0x49b   : > { %7194 = vmatpush3.bf16.msra.mxu0 %v7917_v54 }
 0x49c   : > { %7029 = vmatmul.mubr.msk.f32.vlgmr.msra.gmra.mrb[10].mxu1 %vm1552_vm0, %v2616_v57  ;;  %7195 = vmatprep.subr.bf16.mxu0 %v8230_v38 }
 0x49d   : > { %7039 = vmatprep.mubr.msk.bf16.mxu1 %vm8229_vm1, %v8230_v38 }
 0x56f   : > { %v2686_v58 = vpop.f32.mrb[10].mxu1 }
 0x570   : > { %v2687_v59 = vadd.f32 1e-05, %v2686_v58  ;;  %v7030_v60 = vpop.f32.mrb[11].mxu1  ;;  %v7896_v58 = vld [vmem:[%s9985_s6 + $0xa0] sm:$0xff]  }
 0x572   : > { %8015 = vrsqrt.f32 %v2687_v59 }
 0x57c   : > { %v8016_v61 = vpop.eup %8015 }
 0x57d   : > { %v2694_v62 = vrot.slane %v8016_v61, %v8851_v15  ;;  %v7897_v61 = vld [vmem:[%s9985_s6 + $0xa8] sm:$0xff]  }
 0x57f   : > { %v2695_v0 = vmul.f32 %v2694_v62, %v2580_v19  ;;  %v2696_v1 = vmul.f32 %v2694_v62, %v2581_v20  ;;  %v2697_v2 = vmul.f32 %v2694_v62, %v2582_v21  ;;  %v2698_v3 = vmul.f32 %v2694_v62, %v2583_v22 }
 0x580   : > { %v2699_v5 = vmul.f32 %v2694_v62, %v2584_v23  ;;  %v2700_v6 = vmul.f32 %v2694_v62, %v2585_v27  ;;  %v2701_v16 = vmul.f32 %v2694_v62, %v2586_v32  ;;  %v2702_v17 = vmul.f32 %v2694_v62, %v2587_v37 }
 0x581   : > { %v2707_v7 = vmul.f32 %v6449_v63, %v2695_v0  ;;  %v2708_v8 = vmul.f32 %v6449_v63, %v2696_v1  ;;  %v2709_v9 = vmul.f32 %v6449_v63, %v2697_v2  ;;  %v2710_v10 = vmul.f32 %v6449_v63, %v2698_v3  ;;  %v7898_v3 = vld [vmem:[%s9985_s6 + $0xb0] sm:$0xff]  }
 0x582   : > { %v2711_v11 = vmul.f32 %v6449_v63, %v2699_v5  ;;  %v2712_v12 = vmul.f32 %v6449_v63, %v2700_v6  ;;  %v2713_v21 = vmul.f32 %v6449_v63, %v2701_v16  ;;  %v2714_v22 = vmul.f32 %v6449_v63, %v2702_v17  ;;  %v7900_v16 = vld [vmem:[%s9985_s6 + $0xc0] sm:$0xff]  }
 0x583   : > { %v2719_v18 = vadd.f32 %v6450_v4, %v2707_v7  ;;  %v2720_v24 = vadd.f32 %v6450_v4, %v2708_v8  ;;  %v2721_v25 = vadd.f32 %v6450_v4, %v2709_v9  ;;  %v2722_v26 = vadd.f32 %v6450_v4, %v2710_v10  ;;  %v7899_v7 = vld [vmem:[%s9985_s6 + $0xb8] sm:$0xff]   ;;  %v7918_v10 = vld [vmem:[%s9986_s7 + $0x10] sm:$0xff]  }
 0x584   : > { %v2723_v20 = vadd.f32 %v6450_v4, %v2711_v11  ;;  %v2724_v30 = vadd.f32 %v6450_v4, %v2712_v12  ;;  %v2725_v31 = vadd.f32 %v6450_v4, %v2713_v21  ;;  %v2726_v36 = vadd.f32 %v6450_v4, %v2714_v22  ;;  %7196 = vmatpush3.bf16.msra.mxu0 %v7918_v10  ;;  %v7902_v22 = vld [vmem:[%s9985_s6 + $0xd0] sm:$0xff]  }
 0x585   : > { %v2727_v28 = vmax.f32 %v2719_v18, 0.0  ;;  %v2728_v19 = vmax.f32 %v2720_v24, 0.0  ;;  %v2729_v23 = vmax.f32 %v2721_v25, 0.0  ;;  %v2730_v27 = vmax.f32 %v2722_v26, 0.0  ;;  %7197 = vmatprep.subr.bf16.mxu0 %v8230_v38  ;;  %v7901_v25 = vld [vmem:[%s9985_s6 + $0xc8] sm:$0xff]  }
 0x586   : > { %v2731_v32 = vmax.f32 %v2723_v20, 0.0  ;;  %v2732_v35 = vmax.f32 %v2724_v30, 0.0  ;;  %v2733_v39 = vmax.f32 %v2725_v31, 0.0  ;;  %v2734_v40 = vmax.f32 %v2726_v36, 0.0  ;;  %v7905_v36 = vld [vmem:[%s9985_s6 + $0xe0] sm:$0xff]  }
 0x587   : > { %v2735_v29 = vpack.c.bf16 %v2728_v19, %v2727_v28  ;;  %v2736_v33 = vpack.c.bf16 %v2730_v27, %v2729_v23  ;;  %v7904_v27 = vld [vmem:[%s9985_s6 + $0xd8] sm:$0xff]  }
 0x588   : > { %v2737_v37 = vpack.c.bf16 %v2732_v35, %v2731_v32  ;;  %v2738_v41 = vpack.c.bf16 %v2734_v40, %v2733_v39 }
 0x589   : > { %7032 = vmatpush3.bf16.msra.mxu1 %v2735_v29 }
 0x58a   : > { %7033 = vmatprep.subr.bf16.mxu1 %v8230_v38 }
 0x58d   : > { %7034 = vmatpush3.bf16.msra.mxu1 %v2736_v33 }
 0x58e   : > { %7035 = vmatprep.subr.bf16.mxu1 %v8230_v38 }
 0x591   : > { %7036 = vmatpush3.bf16.msra.mxu1 %v2737_v37 }
 0x592   : > { %7037 = vmatprep.subr.bf16.mxu1 %v8230_v38 }
 0x595   : > { %7038 = vmatpush3.bf16.msra.mxu1 %v2738_v41  ;;  %v7919_v41 = vld [vmem:[%s9986_s7 + $0x18] sm:$0xff]  }
 0x596   : > { %7075 = vmatprep.subr.bf16.mxu1 %v8230_v38  ;;  %7198 = vmatpush3.bf16.msra.mxu0 %v7919_v41 }
 0x597   : > { %7203 = vmatprep.subr.bf16.mxu0 %v8230_v38 }
 0x598   : > { %7040 = vmatmul.mubr.msk.bf16.vlgmr.msra.gmra.mrb[12].mxu1 %vm2802_vm2, %v8872_v42 }
 0x599   : > { %7043 = vmatprep.mubr.msk.bf16.mxu1 %vm8229_vm1, %v8230_v38  ;;  %7076 = vmatpush3.bf16.msra.mxu1 %v7894_v43  ;;  %v7906_v43 = vld [vmem:[%s9985_s6 + $0xe8] sm:$0xff]  }
 0x59a   : > { %7077 = vmatprep.subr.bf16.mxu1 %v8230_v38 }
 0x59d   : > { %7078 = vmatpush3.bf16.msra.mxu1 %v7895_v44 }
 0x59e   : > { %7083 = vmatprep.subr.bf16.mxu1 %v8230_v38 }
 0x5a0   : > { %7044 = vmatmul.mubr.msk.bf16.gmra.mrb[16].mxu1 %vm2802_vm2, %v8889_v45 }
 0x5a1   : > { %7047 = vmatprep.mubr.msk.bf16.mxu1 %vm8229_vm1, %v8230_v38 }
 0x5a8   : > { %7048 = vmatmul.mubr.msk.bf16.gmra.mrb[20].mxu1 %vm2802_vm2, %v8899_v46 }
 0x5a9   : > { %7051 = vmatprep.mubr.msk.bf16.mxu1 %vm8229_vm1, %v8230_v38 }
 0x5b0   : > { %7052 = vmatmul.mubr.msk.bf16.gmra.mrb[24].mxu1 %vm2802_vm2, %v8908_v47 }
 0x5b1   : > { %7055 = vmatprep.mubr.msk.bf16.mxu1 %vm8229_vm1, %v8230_v38 }
 0x5b8   : > { %7056 = vmatmul.mubr.msk.bf16.gmra.mrb[28].mxu1 %vm2802_vm2, %v8917_v48 }
 0x5b9   : > { %7059 = vmatprep.mubr.msk.bf16.mxu1 %vm8229_vm1, %v8230_v38 }
 0x5c0   : > { %7060 = vmatmul.mubr.msk.bf16.gmra.mrb[32].mxu1 %vm2802_vm2, %v8926_v49 }
 0x5c1   : > { %7063 = vmatprep.mubr.msk.bf16.mxu1 %vm8229_vm1, %v8230_v38 }
 0x5c8   : > { %7064 = vmatmul.mubr.msk.bf16.gmra.mrb[36].mxu1 %vm2802_vm2, %v8935_v50 }
 0x5c9   : > { %7067 = vmatprep.mubr.msk.bf16.mxu1 %vm8229_vm1, %v8230_v38 }
 0x5d0   : > { %7068 = vmatmul.mubr.msk.bf16.gmra.mrb[40].mxu1 %vm2802_vm2, %v8944_v51 }
 0x5d1   : > { %7071 = vmatprep.mubr.msk.bf16.mxu1 %vm8229_vm1, %v8230_v38 }
 0x5d8   : > { %7072 = vmatmul.mubr.msk.bf16.gmra.mrb[44].mxu1 %vm2802_vm2, %v8953_v52 }
 0x5d9   : > { %7079 = vmatprep.mubr.msk.bf16.mxu1 %vm8229_vm1, %v8230_v38 }
 0x66b   : > { %v2864_v55 = vpop.f32.mrb[12].mxu1 }
 0x66c   : > { %v7041_v56 = vpop.f32.mrb[13].mxu1 }
 0x66d   : > { %v2867_v57 = vpop.f32.mrb[14].mxu1 }
 0x66e   : > { %v2935_v59 = vpack.c.bf16 %v2867_v57, %v2864_v55  ;;  %v7042_v60 = vpop.f32.mrb[15].mxu1  ;;  %v7907_v57 = vld [vmem:[%s9985_s6 + $0xf0] sm:$0xff]  }
 0x66f   : > { %v7908_v60 = vld [vmem:[%s9985_s6 + $0xf8] sm:$0xff]  }
 0x670   : > { %7080 = vmatmul.mubr.msk.bf16.vlgmr.msra.gmra.mrb[48].mxu1 %vm1552_vm0, %v2935_v59 }
 0x671   : > { %7084 = vmatpush3.bf16.msra.mxu1 %v7896_v58  ;;  %7087 = vmatprep.mubr.msk.bf16.mxu1 %vm8229_vm1, %v8230_v38 }
 0x672   : > { %7085 = vmatprep.subr.bf16.mxu1 %v8230_v38 }
 0x673   : > { %v2872_v62 = vpop.f32.mrb[16].mxu1 }
 0x674   : > { %v7045_v63 = vpop.f32.mrb[17].mxu1 }
 0x675   : > { %v2875_v0 = vpop.f32.mrb[18].mxu1  ;;  %7086 = vmatpush3.bf16.msra.mxu1 %v7897_v61 }
 0x676   : > { %v3002_v1 = vpack.c.bf16 %v2875_v0, %v2872_v62  ;;  %v7046_v2 = vpop.f32.mrb[19].mxu1  ;;  %7091 = vmatprep.subr.bf16.mxu1 %v8230_v38  ;;  %v7909_v0 = vld [vmem:[%s9985_s6 + $0x100] sm:$0xff]  }
 0x677   : > { %v7911_v2 = vld [vmem:[%s9985_s6 + $0x110] sm:$0xff]  }
 0x67b   : > { %v2880_v4 = vpop.f32.mrb[20].mxu1 }
 0x67c   : > { %7088 = vmatmul.mubr.msk.bf16.vlgmr.msra.gmra.mrb[48].mxu1 %vm1552_vm0, %v3002_v1  ;;  %v7049_v5 = vpop.f32.mrb[21].mxu1  ;;  %v7910_v1 = vld [vmem:[%s9985_s6 + $0x108] sm:$0xff]  }
 0x67d   : > { %7092 = vmatpush3.bf16.msra.mxu1 %v7898_v3  ;;  %v2883_v6 = vpop.f32.mrb[22].mxu1  ;;  %7095 = vmatprep.mubr.msk.bf16.mxu1 %vm8229_vm1, %v8230_v38  ;;  %v7912_v3 = vld [vmem:[%s9985_s6 + $0x118] sm:$0xff]   ;;  %v7914_v5 = vld [vmem:[%s8969_s19 + $0x8] sm:$0xff]  }
 0x67e   : > { %7093 = vmatprep.subr.bf16.mxu1 %v8230_v38  ;;  %v3065_v8 = vpack.c.bf16 %v2883_v6, %v2880_v4  ;;  %v7050_v9 = vpop.f32.mrb[23].mxu1  ;;  %v7913_v4 = vld [vmem:[%s8969_s19] sm:$0xff]   ;;  %v7915_v6 = vld [vmem:[%s8969_s19 + $0x10] sm:$0xff]  }
 0x681   : > { %7094 = vmatpush3.bf16.msra.mxu1 %v7899_v7  ;;  %v7916_v7 = vld [vmem:[%s8969_s19 + $0x18] sm:$0xff]   ;;  %s9301_s19 = scalar_lea.vmem %s9981_s2, %s6632_s20 }
 0x682   : > { %7099 = vmatprep.subr.bf16.mxu1 %v8230_v38 }
 0x683   : > { %v2888_v11 = vpop.f32.mrb[24].mxu1 }
 0x684   : > { %v7053_v12 = vpop.f32.mrb[25].mxu1 }
 0x685   : > { %v2891_v17 = vpop.f32.mrb[26].mxu1 }
 0x686   : > { %v3128_v18 = vpack.c.bf16 %v2891_v17, %v2888_v11  ;;  %v7054_v24 = vpop.f32.mrb[27].mxu1  ;;  %v7921_v17 = vld [vmem:[%s9986_s7 + $0x28] sm:$0xff]  }
 0x688   : > { %7096 = vmatmul.mubr.msk.bf16.vlgmr.msra.gmra.mrb[48].mxu1 %vm1552_vm0, %v3065_v8 }
 0x689   : > { %7100 = vmatpush3.bf16.msra.mxu1 %v7900_v16  ;;  %7103 = vmatprep.mubr.msk.bf16.mxu1 %vm8229_vm1, %v8230_v38  ;;  %v7952_v16 = vld [vmem:[%s9987_s8 + $0x10] sm:$0xff]  }
 0x68a   : > { %7101 = vmatprep.subr.bf16.mxu1 %v8230_v38 }
 0x68b   : > { %v2896_v26 = vpop.f32.mrb[28].mxu1 }
 0x68c   : > { %v7057_v28 = vpop.f32.mrb[29].mxu1 }
 0x68d   : > { %7102 = vmatpush3.bf16.msra.mxu1 %v7901_v25  ;;  %v2899_v19 = vpop.f32.mrb[30].mxu1 }
 0x68e   : > { %7107 = vmatprep.subr.bf16.mxu1 %v8230_v38  ;;  %v3191_v20 = vpack.c.bf16 %v2899_v19, %v2896_v26  ;;  %v7058_v21 = vpop.f32.mrb[31].mxu1  ;;  %v7922_v26 = vld [vmem:[%s9986_s7 + $0x30] sm:$0xff]  }
 0x68f   : > { %v7954_v21 = vld [vmem:[%s9987_s8 + $0x20] sm:$0xff]  }
 0x693   : > { %v2904_v29 = vpop.f32.mrb[32].mxu1 }
 0x694   : > { %7104 = vmatmul.mubr.msk.bf16.vlgmr.msra.gmra.mrb[48].mxu1 %vm1552_vm0, %v3128_v18  ;;  %v7061_v23 = vpop.f32.mrb[33].mxu1  ;;  %v7953_v18 = vld [vmem:[%s9987_s8 + $0x18] sm:$0xff]  }
 0x695   : > { %7108 = vmatpush3.bf16.msra.mxu1 %v7902_v22  ;;  %7111 = vmatprep.mubr.msk.bf16.mxu1 %vm8229_vm1, %v8230_v38  ;;  %v2907_v30 = vpop.f32.mrb[34].mxu1  ;;  %v7923_v22 = vld [vmem:[%s9986_s7 + $0x38] sm:$0xff]  }
 0x696   : > { %7109 = vmatprep.subr.bf16.mxu1 %v8230_v38  ;;  %v3254_v31 = vpack.c.bf16 %v2907_v30, %v2904_v29  ;;  %v7062_v33 = vpop.f32.mrb[35].mxu1  ;;  %v7955_v29 = vld [vmem:[%s9987_s8 + $0x28] sm:$0xff]   ;;  %v7924_v30 = vld [vmem:[%s9986_s7 + $0x40] sm:$0xff]  }
 0x699   : > { %7110 = vmatpush3.bf16.msra.mxu1 %v7904_v27 }
 0x69a   : > { %7115 = vmatprep.subr.bf16.mxu1 %v8230_v38 }
 0x69b   : > { %v2912_v32 = vpop.f32.mrb[36].mxu1 }
 0x69c   : > { %v7065_v35 = vpop.f32.mrb[37].mxu1 }
 0x69d   : > { %v2915_v37 = vpop.f32.mrb[38].mxu1  ;;  %v7925_v35 = vld [vmem:[%s9986_s7 + $0x48] sm:$0xff]  }
 0x69e   : > { %v3317_v39 = vpack.c.bf16 %v2915_v37, %v2912_v32  ;;  %v7066_v40 = vpop.f32.mrb[39].mxu1 }
 0x6a0   : > { %7112 = vmatmul.mubr.msk.bf16.vlgmr.msra.gmra.mrb[48].mxu1 %vm1552_vm0, %v3191_v20 }
 0x6a1   : > { %7116 = vmatpush3.bf16.msra.mxu1 %v7905_v36  ;;  %7119 = vmatprep.mubr.msk.bf16.mxu1 %vm8229_vm1, %v8230_v38 }
 0x6a2   : > { %7117 = vmatprep.subr.bf16.mxu1 %v8230_v38 }
 0x6a3   : > { %v2920_v44 = vpop.f32.mrb[40].mxu1 }
 0x6a4   : > { %v7069_v53 = vpop.f32.mrb[41].mxu1 }
 0x6a5   : > { %7118 = vmatpush3.bf16.msra.mxu1 %v7906_v43  ;;  %v2923_v54 = vpop.f32.mrb[42].mxu1 }
 0x6a6   : > { %7123 = vmatprep.subr.bf16.mxu1 %v8230_v38  ;;  %v3380_v55 = vpack.c.bf16 %v2923_v54, %v2920_v44  ;;  %v7070_v56 = vpop.f32.mrb[43].mxu1  ;;  %v7927_v44 = vld [vmem:[%s9986_s7 + $0x58] sm:$0xff]  }
 0x6ab   : > { %v2928_v58 = vpop.f32.mrb[44].mxu1 }
 0x6ac   : > { %7120 = vmatmul.mubr.msk.bf16.vlgmr.msra.gmra.mrb[48].mxu1 %vm1552_vm0, %v3254_v31  ;;  %v7073_v59 = vpop.f32.mrb[45].mxu1 }
 0x6ad   : > { %7124 = vmatpush3.bf16.msra.mxu1 %v7907_v57  ;;  %7127 = vmatprep.mubr.msk.bf16.mxu1 %vm8229_vm1, %v8230_v38  ;;  %v2931_v61 = vpop.f32.mrb[46].mxu1  ;;  %v7929_v59 = vld [vmem:[%s9986_s7 + $0x68] sm:$0xff]  }
 0x6ae   : > { %7125 = vmatprep.subr.bf16.mxu1 %v8230_v38  ;;  %v3443_v62 = vpack.c.bf16 %v2931_v61, %v2928_v58  ;;  %v7074_v63 = vpop.f32.mrb[47].mxu1 }
 0x6b1   : > { %7126 = vmatpush3.bf16.msra.mxu1 %v7908_v60 }
 0x6b2   : > { %7131 = vmatprep.subr.bf16.mxu1 %v8230_v38 }
 0x6b8   : > { %7128 = vmatmul.mubr.msk.bf16.vlgmr.msra.gmra.mrb[48].mxu1 %vm1552_vm0, %v3317_v39  ;;  %v7926_v39 = vld [vmem:[%s9986_s7 + $0x50] sm:$0xff]  }
 0x6b9   : > { %7132 = vmatpush3.bf16.msra.mxu1 %v7909_v0  ;;  %7135 = vmatprep.mubr.msk.bf16.mxu1 %vm8229_vm1, %v8230_v38 }
 0x6ba   : > { %7133 = vmatprep.subr.bf16.mxu1 %v8230_v38 }
 0x6bd   : > { %7134 = vmatpush3.bf16.msra.mxu1 %v7910_v1 }
 0x6be   : > { %7139 = vmatprep.subr.bf16.mxu1 %v8230_v38 }
 0x6c4   : > { %7136 = vmatmul.mubr.msk.bf16.vlgmr.msra.gmra.mrb[48].mxu1 %vm1552_vm0, %v3380_v55  ;;  %v7928_v55 = vld [vmem:[%s9986_s7 + $0x60] sm:$0xff]  }
 0x6c5   : > { %7140 = vmatpush3.bf16.msra.mxu1 %v7911_v2  ;;  %7143 = vmatprep.mubr.msk.bf16.mxu1 %vm8229_vm1, %v8230_v38  ;;  %v7931_v2 = vld [vmem:[%s9986_s7 + $0x78] sm:$0xff]  }
 0x6c6   : > { %7141 = vmatprep.subr.bf16.mxu1 %v8230_v38 }
 0x6c9   : > { %7142 = vmatpush3.bf16.msra.mxu1 %v7912_v3 }
 0x6ca   : > { %7147 = vmatprep.subr.bf16.mxu1 %v8230_v38 }
 0x6d0   : > { %7144 = vmatmul.mubr.msk.bf16.vlgmr.msra.gmra.mrb[48].mxu1 %vm1552_vm0, %v3443_v62  ;;  %v7930_v62 = vld [vmem:[%s9986_s7 + $0x70] sm:$0xff]  }
 0x6d1   : > { %7148 = vmatpush3.bf16.msra.mxu1 %v7913_v4  ;;  %7155 = vmatprep.mubr.msk.bf16.mxu1 %vm8229_vm1, %v8230_v38 }
 0x6d2   : > { %7149 = vmatprep.subr.bf16.mxu1 %v8230_v38 }
 0x6d5   : > { %7150 = vmatpush3.bf16.msra.mxu1 %v7914_v5  ;;  %v7932_v5 = vld [vmem:[%s9986_s7 + $0x80] sm:$0xff]  }
 0x6d6   : > { %7151 = vmatprep.subr.bf16.mxu1 %v8230_v38 }
 0x6d9   : > { %7152 = vmatpush3.bf16.msra.mxu1 %v7915_v6 }
 0x6da   : > { %7153 = vmatprep.subr.bf16.mxu1 %v8230_v38 }
 0x6dd   : > { %7154 = vmatpush3.bf16.msra.mxu1 %v7916_v7 }
 0x6de   : > { %7299 = vmatprep.subr.bf16.mxu1 %v8230_v38 }
 0x6e0   : > { %7156 = vmatmul.mubr.msk.bf16.vlgmr.msra.gmra.mrb[52].mxu1 %vm2802_vm2, %v8872_v42  ;;  %v6472_v42 = vld [vmem:[#allocation8 + $0x3] ss:$0 sm:$0xff] }
 0x6e1   : > { %7159 = vmatprep.mubr.msk.bf16.mxu1 %vm8229_vm1, %v8230_v38  ;;  %7300 = vmatpush3.bf16.msra.mxu1 %v7952_v16  ;;  %v7936_v16 = vld [vmem:[%s9986_s7 + $0xa0] sm:$0xff]  }
 0x6e2   : > { %7301 = vmatprep.subr.bf16.mxu1 %v8230_v38 }
 0x6e5   : > { %7302 = vmatpush3.bf16.msra.mxu1 %v7953_v18 }
 0x6e6   : > { %7303 = vmatprep.subr.bf16.mxu1 %v8230_v38 }
 0x6e8   : > { %7160 = vmatmul.mubr.msk.bf16.gmra.mrb[56].mxu1 %vm2802_vm2, %v8889_v45 }
 0x6e9   : > { %7163 = vmatprep.mubr.msk.bf16.mxu1 %vm8229_vm1, %v8230_v38  ;;  %7304 = vmatpush3.bf16.msra.mxu1 %v7954_v21  ;;  %v7942_v21 = vld [vmem:[%s9986_s7 + $0xd0] sm:$0xff]  }
 0x6ea   : > { %7305 = vmatprep.subr.bf16.mxu1 %v8230_v38 }
 0x6ed   : > { %7306 = vmatpush3.bf16.msra.mxu1 %v7955_v29  ;;  %v7944_v29 = vld [vmem:[%s9986_s7 + $0xe0] sm:$0xff]  }
 0x6ee   : > { %7311 = vmatprep.subr.bf16.mxu1 %v8230_v38 }
 0x6f0   : > { %7164 = vmatmul.mubr.msk.bf16.gmra.mrb[60].mxu1 %vm2802_vm2, %v8899_v46 }
 0x6f1   : > { %7167 = vmatprep.mubr.msk.bf16.mxu1 %vm8229_vm1, %v8230_v38 }
 0x6f8   : > { %7168 = vmatmul.mubr.msk.bf16.gmra.mrb[64].mxu1 %vm2802_vm2, %v8908_v47 }
 0x6f9   : > { %7171 = vmatprep.mubr.msk.bf16.mxu1 %vm8229_vm1, %v8230_v38 }
 0x700   : > { %7172 = vmatmul.mubr.msk.bf16.gmra.mrb[68].mxu1 %vm2802_vm2, %v8917_v48 }
 0x701   : > { %7175 = vmatprep.mubr.msk.bf16.mxu1 %vm8229_vm1, %v8230_v38 }
 0x708   : > { %7176 = vmatmul.mubr.msk.bf16.gmra.mrb[72].mxu1 %vm2802_vm2, %v8926_v49 }
 0x709   : > { %7179 = vmatprep.mubr.msk.bf16.mxu1 %vm8229_vm1, %v8230_v38 }
 0x710   : > { %7180 = vmatmul.mubr.msk.bf16.gmra.mrb[76].mxu1 %vm2802_vm2, %v8935_v50 }
 0x711   : > { %7183 = vmatprep.mubr.msk.bf16.mxu1 %vm8229_vm1, %v8230_v38 }
 0x718   : > { %7184 = vmatmul.mubr.msk.bf16.gmra.mrb[80].mxu1 %vm2802_vm2, %v8944_v51 }
 0x719   : > { %7187 = vmatprep.mubr.msk.bf16.mxu1 %vm8229_vm1, %v8230_v38 }
 0x720   : > { %7188 = vmatmul.mubr.msk.bf16.gmra.mrb[84].mxu1 %vm2802_vm2, %v8953_v52  ;;  %v7920_v52 = vld [vmem:[%s9986_s7 + $0x20] sm:$0xff]  }
 0x721   : > { %7307 = vmatprep.mubr.msk.bf16.mxu1 %vm8229_vm1, %v8230_v38 }
 0x7a3   : > { %v3497_v45 = vpop.f32.mrb[48].mxu1 }
 0x7a4   : > { %v7145_v46 = vpop.f32.mrb[49].mxu1  ;;  %v9118_v48 = vadd.f32 %v6472_v42, %v3497_v45  ;;  %v7933_v45 = vld [vmem:[%s9986_s7 + $0x88] sm:$0xff]  }
 0x7a5   : > { %v3500_v47 = vpop.f32.mrb[50].mxu1 }
 0x7a6   : > { %v9120_v49 = vadd.f32 %v6472_v42, %v3500_v47  ;;  %v7146_v50 = vpop.f32.mrb[51].mxu1 }
 0x7a7   : > { %v7934_v50 = vld [vmem:[%s9986_s7 + $0x90] sm:$0xff]  }
 0x7a8   : > { %v4358_v51 = vpack.c.bf16 %v9120_v49, %v9118_v48  ;;  %v7961_v48 = vld [vmem:[%s9987_s8 + $0x48] sm:$0xff]   ;;  %v7962_v49 = vld [vmem:[%s9987_s8 + $0x50] sm:$0xff]  }
 0x7b3   : > { %v3572_v8 = vpop.f32.mrb[52].mxu1 }
 0x7b4   : > { %v7157_v9 = vpop.f32.mrb[53].mxu1 }
 0x7b5   : > { %v3575_v10 = vpop.f32.mrb[54].mxu1 }
 0x7b6   : > { %v3643_v11 = vpack.c.bf16 %v3575_v10, %v3572_v8  ;;  %v7158_v12 = vpop.f32.mrb[55].mxu1 }
 0x7b8   : > { %7200 = vmatmul.mubr.msk.bf16.vlgmr.msra.gmra.mrb[144].mxu0 %vm2802_vm2, %v3643_v11 }
 0x7b9   : > { %7204 = vmatpush3.bf16.msra.mxu0 %v7920_v52  ;;  %7211 = vmatprep.mubr.msk.bf16.mxu0 %vm8229_vm1, %v8230_v38  ;;  %v7935_v52 = vld [vmem:[%s9986_s7 + $0x98] sm:$0xff]  }
 0x7ba   : > { %7205 = vmatprep.subr.bf16.mxu0 %v8230_v38 }
 0x7bb   : > { %v3580_v24 = vpop.f32.mrb[56].mxu1 }
 0x7bc   : > { %v7161_v25 = vpop.f32.mrb[57].mxu1 }
 0x7bd   : > { %7206 = vmatpush3.bf16.msra.mxu0 %v7921_v17  ;;  %v3583_v28 = vpop.f32.mrb[58].mxu1  ;;  %v7937_v25 = vld [vmem:[%s9986_s7 + $0xa8] sm:$0xff]  }
 0x7be   : > { %7207 = vmatprep.subr.bf16.mxu0 %v8230_v38  ;;  %v3726_v19 = vpack.c.bf16 %v3583_v28, %v3580_v24  ;;  %v7162_v20 = vpop.f32.mrb[59].mxu1  ;;  %v7939_v28 = vld [vmem:[%s9986_s7 + $0xb8] sm:$0xff]  }
 0x7bf   : > { %v7941_v20 = vld [vmem:[%s9986_s7 + $0xc8] sm:$0xff]  }
 0x7c1   : > { %7208 = vmatpush3.bf16.msra.mxu0 %v7922_v26  ;;  %v7938_v26 = vld [vmem:[%s9986_s7 + $0xb0] sm:$0xff]  }
 0x7c2   : > { %7209 = vmatprep.subr.bf16.mxu0 %v8230_v38 }
 0x7c3   : > { %v3588_v23 = vpop.f32.mrb[60].mxu1 }
 0x7c4   : > { %v7165_v27 = vpop.f32.mrb[61].mxu1 }
 0x7c5   : > { %7210 = vmatpush3.bf16.msra.mxu0 %v7923_v22  ;;  %v3591_v31 = vpop.f32.mrb[62].mxu1  ;;  %v7943_v22 = vld [vmem:[%s9986_s7 + $0xd8] sm:$0xff]   ;;  %v7946_v27 = vld [vmem:[%s9986_s7 + $0xf0] sm:$0xff]  }
 0x7c6   : > { %7215 = vmatprep.subr.bf16.mxu0 %v8230_v38  ;;  %v3805_v33 = vpack.c.bf16 %v3591_v31, %v3588_v23  ;;  %v7166_v32 = vpop.f32.mrb[63].mxu1  ;;  %v7945_v23 = vld [vmem:[%s9986_s7 + $0xe8] sm:$0xff]   ;;  %v7948_v31 = vld [vmem:[%s9986_s7 + $0x100] sm:$0xff]  }
 0x7c7   : > { %v7950_v32 = vld [vmem:[%s9986_s7 + $0x110] sm:$0xff]  }
 0x7c8   : > { %7212 = vmatmul.mubr.msk.bf16.vlgmr.msra.gmra.mrb[144].mxu0 %vm2802_vm2, %v3726_v19  ;;  %v7940_v19 = vld [vmem:[%s9986_s7 + $0xc0] sm:$0xff]  }
 0x7c9   : > { %7216 = vmatpush3.bf16.msra.mxu0 %v7924_v30  ;;  %7223 = vmatprep.mubr.msk.bf16.mxu0 %vm8229_vm1, %v8230_v38  ;;  %v7947_v30 = vld [vmem:[%s9986_s7 + $0xf8] sm:$0xff]  }
 0x7ca   : > { %7217 = vmatprep.subr.bf16.mxu0 %v8230_v38 }
 0x7cb   : > { %v3596_v36 = vpop.f32.mrb[64].mxu1 }
 0x7cc   : > { %v7169_v37 = vpop.f32.mrb[65].mxu1 }
 0x7cd   : > { %7218 = vmatpush3.bf16.msra.mxu0 %v7925_v35  ;;  %v3599_v40 = vpop.f32.mrb[66].mxu1  ;;  %v7951_v35 = vld [vmem:[%s9986_s7 + $0x118] sm:$0xff]  }
 0x7ce   : > { %7219 = vmatprep.subr.bf16.mxu0 %v8230_v38  ;;  %v3884_v41 = vpack.c.bf16 %v3599_v40, %v3596_v36  ;;  %v7170_v43 = vpop.f32.mrb[67].mxu1  ;;  %v6515_v36 = vld [vmem:[#allocation8 + $0x4] ss:$0 sm:$0xff] }
 0x7d1   : > { %7220 = vmatpush3.bf16.msra.mxu0 %v7926_v39 }
 0x7d2   : > { %7221 = vmatprep.subr.bf16.mxu0 %v8230_v38 }
 0x7d3   : > { %v3604_v53 = vpop.f32.mrb[68].mxu1 }
 0x7d4   : > { %v7173_v54 = vpop.f32.mrb[69].mxu1 }
 0x7d5   : > { %7222 = vmatpush3.bf16.msra.mxu0 %v7927_v44  ;;  %v3607_v56 = vpop.f32.mrb[70].mxu1 }
 0x7d6   : > { %7227 = vmatprep.subr.bf16.mxu0 %v8230_v38  ;;  %v3963_v57 = vpack.c.bf16 %v3607_v56, %v3604_v53  ;;  %v7174_v58 = vpop.f32.mrb[71].mxu1  ;;  %v7956_v53 = vld [vmem:[%s9987_s8] sm:$0xff]   ;;  %v7958_v56 = vld [vmem:[%s9987_s8 + $0x30] sm:$0xff]  }
 0x7d7   : > { %v7960_v58 = vld [vmem:[%s9987_s8 + $0x40] sm:$0xff]  }
 0x7d8   : > { %7224 = vmatmul.mubr.msk.bf16.vlgmr.msra.gmra.mrb[144].mxu0 %vm2802_vm2, %v3805_v33  ;;  %v7949_v33 = vld [vmem:[%s9986_s7 + $0x108] sm:$0xff]  }
 0x7d9   : > { %7228 = vmatpush3.bf16.msra.mxu0 %v7928_v55  ;;  %7235 = vmatprep.mubr.msk.bf16.mxu0 %vm8229_vm1, %v8230_v38  ;;  %v7957_v55 = vld [vmem:[%s9987_s8 + $0x8] sm:$0xff]  }
 0x7da   : > { %7229 = vmatprep.subr.bf16.mxu0 %v8230_v38 }
 0x7db   : > { %v3612_v60 = vpop.f32.mrb[72].mxu1 }
 0x7dc   : > { %v7177_v61 = vpop.f32.mrb[73].mxu1 }
 0x7dd   : > { %7230 = vmatpush3.bf16.msra.mxu0 %v7929_v59  ;;  %v3615_v63 = vpop.f32.mrb[74].mxu1  ;;  %v7964_v59 = vld [vmem:[%s9987_s8 + $0x60] sm:$0xff]  }
 0x7de   : > { %7231 = vmatprep.subr.bf16.mxu0 %v8230_v38  ;;  %v4042_v0 = vpack.c.bf16 %v3615_v63, %v3612_v60  ;;  %v7178_v1 = vpop.f32.mrb[75].mxu1  ;;  %v7965_v60 = vld [vmem:[%s9987_s8 + $0x68] sm:$0xff]   ;;  %v7966_v61 = vld [vmem:[%s9301_s19] sm:$0xff]   ;;  %v636_v63 = vld [vmem:[#allocation8 + $0x38] sm:$0xff] }
 0x7e1   : > { %7232 = vmatpush3.bf16.msra.mxu0 %v7930_v62  ;;  %v635_v62 = vld [vmem:[#allocation8 + $0x30] sm:$0xff] }
 0x7e2   : > { %7233 = vmatprep.subr.bf16.mxu0 %v8230_v38  ;;  %v9355_v1 = vpack.c.bf16 %v636_v63, %v635_v62 }
 0x7e3   : > { %v3620_v3 = vpop.f32.mrb[76].mxu1 }
 0x7e4   : > { %v7181_v4 = vpop.f32.mrb[77].mxu1 }
 0x7e5   : > { %7234 = vmatpush3.bf16.msra.mxu0 %v7931_v2  ;;  %v3623_v6 = vpop.f32.mrb[78].mxu1  ;;  %v638_v2 = vld [vmem:[#allocation8 + $0x48] sm:$0xff]  ;;  %v639_v4 = vld [vmem:[#allocation8 + $0x50] sm:$0xff] }
 0x7e6   : > { %7239 = vmatprep.subr.bf16.mxu0 %v8230_v38  ;;  %v4121_v7 = vpack.c.bf16 %v3623_v6, %v3620_v3  ;;  %v7182_v42 = vpop.f32.mrb[79].mxu1 }
 0x7e7   : > { %v642_v42 = vld [vmem:[#allocation8 + $0x68] sm:$0xff] }
 0x7e8   : > { %7236 = vmatmul.mubr.msk.bf16.vlgmr.msra.gmra.mrb[144].mxu0 %vm2802_vm2, %v3884_v41 }
 0x7e9   : > { %7240 = vmatpush3.bf16.msra.mxu0 %v7932_v5  ;;  %7247 = vmatprep.mubr.msk.bf16.mxu0 %vm8229_vm1, %v8230_v38  ;;  %v640_v5 = vld [vmem:[#allocation8 + $0x58] sm:$0xff] }
 0x7ea   : > { %7241 = vmatprep.subr.bf16.mxu0 %v8230_v38  ;;  %v9362_v6 = vpack.c.bf16 %v640_v5, %v639_v4  ;;  %v4830_v5 = vld [vmem:[%s9988_s9 + $0xc0] sm:$0xff] }
 0x7eb   : > { %v3628_v46 = vpop.f32.mrb[80].mxu1 }
 0x7ec   : > { %v7185_v47 = vpop.f32.mrb[81].mxu1 }
 0x7ed   : > { %7242 = vmatpush3.bf16.msra.mxu0 %v7933_v45  ;;  %v3631_v8 = vpop.f32.mrb[82].mxu1  ;;  %v644_v47 = vld [vmem:[#allocation8 + $0x78] sm:$0xff] }
 0x7ee   : > { %7243 = vmatprep.subr.bf16.mxu0 %v8230_v38  ;;  %v4200_v9 = vpack.c.bf16 %v3631_v8, %v3628_v46  ;;  %v7186_v10 = vpop.f32.mrb[83].mxu1  ;;  %v643_v46 = vld [vmem:[#allocation8 + $0x70] sm:$0xff]  ;;  %v645_v8 = vld [vmem:[#allocation8 + $0x80] sm:$0xff] }
 0x7f1   : > { %7244 = vmatpush3.bf16.msra.mxu0 %v7934_v50  ;;  %v9371_v50 = vpack.c.bf16 %v644_v47, %v643_v46  ;;  %v4835_v46 = vld [vmem:[%s9988_s9 + $0xe8] sm:$0xff]  ;;  %v4986_v47 = vunpack.c.h.s8.bf16 %v4830_v5 }
 0x7f2   : > { %7245 = vmatprep.subr.bf16.mxu0 %v8230_v38 }
 0x7f3   : > { %v9215_v11 = vpop.f32.mrb[84].mxu1 }
 0x7f4   : > { %v7189_v12 = vpop.f32.mrb[85].mxu1 }
 0x7f5   : > { %7246 = vmatpush3.bf16.msra.mxu0 %v7935_v52  ;;  %v3639_v17 = vpop.f32.mrb[86].mxu1  ;;  %v647_v52 = vld [vmem:[#allocation8 + $0x90] sm:$0xff] }
 0x7f6   : > { %7251 = vmatprep.subr.bf16.mxu0 %v8230_v38  ;;  %v4279_v18 = vpack.c.bf16 %v3639_v17, %v9215_v11  ;;  %v7190_v24 = vpop.f32.mrb[87].mxu1  ;;  %v648_v11 = vld [vmem:[#allocation8 + $0x98] sm:$0xff]  ;;  %v650_v17 = vld [vmem:[#allocation8 + $0xa8] sm:$0xff] }
 0x7f7   : > { %v9379_v12 = vpack.c.bf16 %v648_v11, %v647_v52  ;;  %v4807_v24 = vld [vmem:[%s9988_s9 + $0x8] sm:$0xff]  ;;  %v4995_v11 = vunpack.c.h.s8.bf16 %v4835_v46 }
 0x7f8   : > { %7248 = vmatmul.mubr.msk.bf16.vlgmr.msra.gmra.mrb[144].mxu0 %vm2802_vm2, %v3963_v57  ;;  %v7959_v57 = vld [vmem:[%s9987_s8 + $0x38] sm:$0xff]  }
 0x7f9   : > { %7252 = vmatpush3.bf16.msra.mxu0 %v7936_v16  ;;  %7259 = vmatprep.mubr.msk.bf16.mxu0 %vm8229_vm1, %v8230_v38  ;;  %v649_v16 = vld [vmem:[#allocation8 + $0xa0] sm:$0xff] }
 0x7fa   : > { %7253 = vmatprep.subr.bf16.mxu0 %v8230_v38 }
 0x7fd   : > { %7254 = vmatpush3.bf16.msra.mxu0 %v7937_v25  ;;  %v4806_v25 = vld [vmem:[%s9988_s9] sm:$0xff] }
 0x7fe   : > { %7255 = vmatprep.subr.bf16.mxu0 %v8230_v38 }
 0x801   : > { %7256 = vmatpush3.bf16.msra.mxu0 %v7938_v26  ;;  %v4935_v26 = vunpack.c.l.s8.bf16 %v4807_v24 }
 0x802   : > { %7257 = vmatprep.subr.bf16.mxu0 %v8230_v38 }
 0x805   : > { %7258 = vmatpush3.bf16.msra.mxu0 %v7939_v28  ;;  %v4934_v28 = vunpack.c.l.s8.bf16 %v4806_v25 }
 0x806   : > { %7263 = vmatprep.subr.bf16.mxu0 %v8230_v38 }
 0x808   : > { %7260 = vmatmul.mubr.msk.bf16.vlgmr.msra.gmra.mrb[144].mxu0 %vm2802_vm2, %v4042_v0  ;;  %v637_v0 = vld [vmem:[#allocation8 + $0x40] sm:$0xff] }
 0x809   : > { %7264 = vmatpush3.bf16.msra.mxu0 %v7940_v19  ;;  %7271 = vmatprep.mubr.msk.bf16.mxu0 %vm8229_vm1, %v8230_v38  ;;  %v9358_v3 = vpack.c.bf16 %v638_v2, %v637_v0  ;;  %v4939_v19 = vunpack.c.h.s8.bf16 %v4807_v24  ;;  %v4831_v0 = vld [vmem:[%s9988_s9 + $0xc8] sm:$0xff] }
 0x80a   : > { %7265 = vmatprep.subr.bf16.mxu0 %v8230_v38  ;;  %v4983_v4 = vunpack.c.l.s8.bf16 %v4831_v0 }
 0x80d   : > { %7266 = vmatpush3.bf16.msra.mxu0 %v7941_v20  ;;  %v4811_v20 = vld [vmem:[%s9988_s9 + $0x28] sm:$0xff] }
 0x80e   : > { %7267 = vmatprep.subr.bf16.mxu0 %v8230_v38 }
 0x811   : > { %7268 = vmatpush3.bf16.msra.mxu0 %v7942_v21  ;;  %v4938_v21 = vunpack.c.h.s8.bf16 %v4806_v25  ;;  %v4838_v25 = vld [vmem:[%s9988_s9 + $0x100] sm:$0xff] }
 0x812   : > { %7269 = vmatprep.subr.bf16.mxu0 %v8230_v38 }
 0x815   : > { %7270 = vmatpush3.bf16.msra.mxu0 %v7943_v22  ;;  %v4943_v22 = vunpack.c.l.s8.bf16 %v4811_v20 }
 0x816   : > { %7275 = vmatprep.subr.bf16.mxu0 %v8230_v38 }
 0x818   : > { %7272 = vmatmul.mubr.msk.bf16.vlgmr.msra.gmra.mrb[144].mxu0 %vm2802_vm2, %v4121_v7  ;;  %v641_v7 = vld [vmem:[#allocation8 + $0x60] sm:$0xff] }
 0x819   : > { %7276 = vmatpush3.bf16.msra.mxu0 %v7944_v29  ;;  %7283 = vmatprep.mubr.msk.bf16.mxu0 %vm8229_vm1, %v8230_v38  ;;  %v9367_v45 = vpack.c.bf16 %v642_v42, %v641_v7  ;;  %v4810_v29 = vld [vmem:[%s9988_s9 + $0x20] sm:$0xff]  ;;  %v4982_v7 = vunpack.c.l.s8.bf16 %v4830_v5  ;;  %v4987_v42 = vunpack.c.h.s8.bf16 %v4831_v0 }
 0x81a   : > { %7277 = vmatprep.subr.bf16.mxu0 %v8230_v38 }
 0x81d   : > { %7278 = vmatpush3.bf16.msra.mxu0 %v7945_v23  ;;  %v9407_v23 = vld [vmem:[%s9401_s23] sm:$0xff] }
 0x81e   : > { %7279 = vmatprep.subr.bf16.mxu0 %v8230_v38 }
 0x821   : > { %7280 = vmatpush3.bf16.msra.mxu0 %v7946_v27  ;;  %v4942_v27 = vunpack.c.l.s8.bf16 %v4810_v29 }
 0x822   : > { %7281 = vmatprep.subr.bf16.mxu0 %v8230_v38 }
 0x825   : > { %7282 = vmatpush3.bf16.msra.mxu0 %v7947_v30  ;;  %v4947_v30 = vunpack.c.h.s8.bf16 %v4811_v20 }
 0x826   : > { %7287 = vmatprep.subr.bf16.mxu0 %v8230_v38 }
 0x828   : > { %7284 = vmatmul.mubr.msk.bf16.vlgmr.msra.gmra.mrb[144].mxu0 %vm2802_vm2, %v4200_v9  ;;  %v646_v9 = vld [vmem:[#allocation8 + $0x88] sm:$0xff] }
 0x829   : > { %7288 = vmatpush3.bf16.msra.mxu0 %v7948_v31  ;;  %7295 = vmatprep.mubr.msk.bf16.mxu0 %vm8229_vm1, %v8230_v38  ;;  %v9375_v10 = vpack.c.bf16 %v646_v9, %v645_v8  ;;  %v9411_v31 = vcombine.high %v9407_v23, %v9407_v23  ;;  %v4991_v8 = vunpack.c.l.s8.bf16 %v4835_v46  ;;  %v4834_v9 = vld [vmem:[%s9988_s9 + $0xe0] sm:$0xff] }
 0x82a   : > { %7289 = vmatprep.subr.bf16.mxu0 %v8230_v38  ;;  %v4990_v52 = vunpack.c.l.s8.bf16 %v4834_v9 }
 0x82d   : > { %7290 = vmatpush3.bf16.msra.mxu0 %v7949_v33  ;;  %v4815_v33 = vld [vmem:[%s9988_s9 + $0x48] sm:$0xff] }
 0x82e   : > { %7291 = vmatprep.subr.bf16.mxu0 %v8230_v38 }
 0x831   : > { %7292 = vmatpush3.bf16.msra.mxu0 %v7950_v32  ;;  %v4946_v32 = vunpack.c.h.s8.bf16 %v4810_v29 }
 0x832   : > { %7293 = vmatprep.subr.bf16.mxu0 %v8230_v38 }
 0x835   : > { %7294 = vmatpush3.bf16.msra.mxu0 %v7951_v35  ;;  %v4951_v35 = vunpack.c.l.s8.bf16 %v4815_v33 }
 0x836   : > { %5221 = vmatprep.subr.bf16.mxu0 %v4935_v26  ;;  %v9457_v26 = vld [vmem:[%s9401_s23 + $0x8] sm:$0xff] }
 0x837   : > { %v9465_v20 = vcombine.high %v9457_v26, %v9457_v26 }
 0x838   : > { %7296 = vmatmul.mubr.msk.bf16.vlgmr.msra.gmra.mrb[144].mxu0 %vm2802_vm2, %v4279_v18  ;;  %v9383_v18 = vpack.c.bf16 %v650_v17, %v649_v16  ;;  %v4839_v16 = vld [vmem:[%s9988_s9 + $0x108] sm:$0xff]  ;;  %v4994_v17 = vunpack.c.h.s8.bf16 %v4834_v9 }
 0x839   : > { %5222 = vmatpush1.bf16.msra.mxu0 %v4934_v28  ;;  %5253 = vmatprep.mubr.bf16.mxu0 %v9411_v31  ;;  %v4999_v24 = vunpack.c.l.s8.bf16 %v4839_v16  ;;  %v9461_v28 = vcombine.low %v9407_v23, %v9407_v23 }
 0x83a   : > { %5223 = vmatprep.subr.bf16.mxu0 %v4939_v19  ;;  %v4998_v19 = vunpack.c.l.s8.bf16 %v4838_v25 }
 0x83d   : > { %5224 = vmatpush1.bf16.msra.mxu0 %v4938_v21  ;;  %v5003_v21 = vunpack.c.h.s8.bf16 %v4839_v16 }
 0x83e   : > { %5225 = vmatprep.subr.bf16.mxu0 %v4943_v22  ;;  %v4843_v22 = vld [vmem:[%s9988_s9 + $0x128] sm:$0xff] }
 0x841   : > { %5226 = vmatpush1.bf16.msra.mxu0 %v4942_v27 }
 0x842   : > { %5227 = vmatprep.subr.bf16.mxu0 %v4947_v30  ;;  %v5002_v30 = vunpack.c.h.s8.bf16 %v4838_v25 }
 0x845   : > { %5228 = vmatpush1.bf16.msra.mxu0 %v4946_v32  ;;  %v4842_v32 = vld [vmem:[%s9988_s9 + $0x120] sm:$0xff] }
 0x846   : > { %5229 = vmatprep.subr.bf16.mxu0 %v4951_v35 }
 0x90b   : > { %v4349_v37 = vpop.f32.mrb[144].mxu0 }
 0x90c   : > { %v7297_v39 = vpop.f32.mrb[145].mxu0  ;;  %v7499_v41 = vadd.f32 %v6515_v36, %v4349_v37 }
 0x90d   : > { %v4352_v40 = vpop.f32.mrb[146].mxu0  ;;  %v4955_v39 = vunpack.c.h.s8.bf16 %v4815_v33  ;;  %v5007_v33 = vunpack.c.l.s8.bf16 %v4843_v22 }
 0x90e   : > { %v7500_v43 = vadd.f32 %v6515_v36, %v4352_v40  ;;  %v7298_v44 = vpop.f32.mrb[147].mxu0  ;;  %v4814_v36 = vld [vmem:[%s9988_s9 + $0x40] sm:$0xff]  ;;  %v4819_v40 = vld [vmem:[%s9988_s9 + $0x68] sm:$0xff] }
 0x90f   : > { %v4950_v37 = vunpack.c.l.s8.bf16 %v4814_v36  ;;  %v4818_v44 = vld [vmem:[%s9988_s9 + $0x60] sm:$0xff] }
 0x910   : > { %v4363_v54 = vpack.c.bf16 %v7500_v43, %v7499_v41  ;;  %v4954_v41 = vunpack.c.h.s8.bf16 %v4814_v36  ;;  %v4959_v43 = vunpack.c.l.s8.bf16 %v4819_v40  ;;  %v5006_v36 = vunpack.c.l.s8.bf16 %v4842_v32 }
 0x911   : > { %5230 = vmatpush1.bf16.msra.mxu0 %v4950_v37  ;;  %v5011_v37 = vunpack.c.h.s8.bf16 %v4843_v22 }
 0x912   : > { %7308 = vmatmul.mubr.msk.bf16.vlgmr.msra.gmra.mrb[88].mxu1 %vm2802_vm2, %v4363_v54  ;;  %5231 = vmatprep.subr.bf16.mxu0 %v4955_v39  ;;  %v4963_v54 = vunpack.c.h.s8.bf16 %v4819_v40  ;;  %v4847_v39 = vld [vmem:[%s9988_s9 + $0x148] sm:$0xff] }
 0x913   : > { %7312 = vmatpush3.bf16.msra.mxu1 %v7956_v53  ;;  %7315 = vmatprep.mubr.msk.bf16.mxu1 %vm8229_vm1, %v8230_v38  ;;  %v4958_v53 = vunpack.c.l.s8.bf16 %v4818_v44 }
 0x914   : > { %7313 = vmatprep.subr.bf16.mxu1 %v8230_v38 }
 0x915   : > { %5232 = vmatpush1.bf16.msra.mxu0 %v4954_v41 }
 0x916   : > { %5233 = vmatprep.subr.bf16.mxu0 %v4959_v43 }
 0x917   : > { %7314 = vmatpush3.bf16.msra.mxu1 %v7957_v55  ;;  %v4823_v55 = vld [vmem:[%s9988_s9 + $0x88] sm:$0xff] }
 0x918   : > { %7319 = vmatprep.subr.bf16.mxu1 %v8230_v38 }
 0x919   : > { %5234 = vmatpush1.bf16.msra.mxu0 %v4958_v53 }
 0x91a   : > { %7316 = vmatmul.mubr.msk.bf16.vlgmr.msra.gmra.mrb[92].mxu1 %vm1552_vm0, %v4358_v51  ;;  %v7963_v51 = vld [vmem:[%s9987_s8 + $0x58] sm:$0xff]   ;;  %5235 = vmatprep.subr.bf16.mxu0 %v4963_v54  ;;  %v5015_v54 = vunpack.c.l.s8.bf16 %v4847_v39 }
 0x91b   : > { %7320 = vmatpush3.bf16.msra.mxu1 %v7958_v56  ;;  %7335 = vmatprep.mubr.msk.bf16.mxu1 %vm8229_vm1, %v8230_v38  ;;  %v4962_v56 = vunpack.c.h.s8.bf16 %v4818_v44  ;;  %v5010_v44 = vunpack.c.h.s8.bf16 %v4842_v32 }
 0x91c   : > { %7321 = vmatprep.subr.bf16.mxu1 %v8230_v38 }
 0x91d   : > { %5236 = vmatpush1.bf16.msra.mxu0 %v4962_v56 }
 0x91f   : > { %7322 = vmatpush3.bf16.msra.mxu1 %v7959_v57  ;;  %v4967_v57 = vunpack.c.l.s8.bf16 %v4823_v55 }
 0x920   : > { %7323 = vmatprep.subr.bf16.mxu1 %v8230_v38 }
 0x921   : > { %5237 = vmatprep.subr.bf16.mxu0 %v4967_v57 }
 0x923   : > { %7324 = vmatpush3.bf16.msra.mxu1 %v7960_v58  ;;  %v4822_v58 = vld [vmem:[%s9988_s9 + $0x80] sm:$0xff] }
 0x924   : > { %7325 = vmatprep.subr.bf16.mxu1 %v8230_v38 }
 0x927   : > { %7326 = vmatpush3.bf16.msra.mxu1 %v7961_v48  ;;  %v4966_v48 = vunpack.c.l.s8.bf16 %v4822_v58 }
 0x928   : > { %7327 = vmatprep.subr.bf16.mxu1 %v8230_v38 }
 0x929   : > { %5238 = vmatpush1.bf16.msra.mxu0 %v4966_v48  ;;  %v5019_v48 = vunpack.c.h.s8.bf16 %v4847_v39 }
 0x92b   : > { %7328 = vmatpush3.bf16.msra.mxu1 %v7962_v49  ;;  %v4971_v49 = vunpack.c.h.s8.bf16 %v4823_v55  ;;  %v4846_v55 = vld [vmem:[%s9988_s9 + $0x140] sm:$0xff] }
 0x92c   : > { %7329 = vmatprep.subr.bf16.mxu1 %v8230_v38 }
 0x92d   : > { %5239 = vmatprep.subr.bf16.mxu0 %v4971_v49  ;;  %v4851_v49 = vld [vmem:[%s9988_s9 + $0x168] sm:$0xff] }
 0x92f   : > { %7330 = vmatpush3.bf16.msra.mxu1 %v7963_v51  ;;  %v4827_v51 = vld [vmem:[%s9988_s9 + $0xa8] sm:$0xff] }
 0x930   : > { %7331 = vmatprep.subr.bf16.mxu1 %v8230_v38  ;;  %v4979_v63 = vunpack.c.h.s8.bf16 %v4827_v51 }
 0x933   : > { %7332 = vmatpush3.bf16.msra.mxu1 %v7964_v59  ;;  %v4970_v59 = vunpack.c.h.s8.bf16 %v4822_v58  ;;  %v5014_v58 = vunpack.c.l.s8.bf16 %v4846_v55 }
 0x934   : > { %7333 = vmatprep.subr.bf16.mxu1 %v8230_v38 }
 0x935   : > { %5240 = vmatpush1.bf16.msra.mxu0 %v4970_v59  ;;  %v5023_v59 = vunpack.c.l.s8.bf16 %v4851_v49 }
 0x937   : > { %7334 = vmatpush3.bf16.msra.mxu1 %v7965_v60  ;;  %v4975_v60 = vunpack.c.l.s8.bf16 %v4827_v51  ;;  %v5018_v51 = vunpack.c.h.s8.bf16 %v4846_v55 }
 0x938   : > { %7441 = vmatprep.subr.bf16.mxu1 %v8228_v34 }
 0x939   : > { %5241 = vmatprep.subr.bf16.mxu0 %v4975_v60  ;;  %v4850_v60 = vld [vmem:[%s9988_s9 + $0x160] sm:$0xff] }
 0x93a   : > { %7336 = vmatmul.mubr.bf16.vlgmr.msra.gmra.mrb[96].mxu1 %v7966_v61  ;;  %v4826_v61 = vld [vmem:[%s9988_s9 + $0xa0] sm:$0xff]  ;;  %v5026_v0 = vunpack.c.h.s8.bf16 %v4850_v60 }
 0x93b   : > { %7371 = vmatprep.mubr.msk.f32.mxu1 %vm8229_vm1, %v8230_v38  ;;  %7443 = vmatpush3.bf16.msra.mxu1 %v9355_v1  ;;  %v4974_v62 = vunpack.c.l.s8.bf16 %v4826_v61  ;;  %v4978_v2 = vunpack.c.h.s8.bf16 %v4826_v61  ;;  %v5022_v61 = vunpack.c.l.s8.bf16 %v4850_v60 }
 0x93c   : > { %7444 = vmatprep.subr.bf16.mxu1 %v8228_v34 }
 0x93d   : > { %5242 = vmatpush1.bf16.msra.mxu0 %v4974_v62  ;;  %v5027_v62 = vunpack.c.h.s8.bf16 %v4851_v49 }
 0x93e   : > { %5243 = vmatprep.subr.bf16.mxu0 %v4979_v63  ;;  %v4855_v63 = vld [vmem:[%s9988_s9 + $0x188] sm:$0xff] }
 0x93f   : > { %7446 = vmatpush3.bf16.msra.mxu1 %v9358_v3 }
 0x940   : > { %7447 = vmatprep.subr.bf16.mxu1 %v8228_v34 }
 0x941   : > { %5244 = vmatpush1.bf16.msra.mxu0 %v4978_v2  ;;  %v5031_v2 = vunpack.c.l.s8.bf16 %v4855_v63 }
 0x942   : > { %5245 = vmatprep.subr.bf16.mxu0 %v4983_v4  ;;  %v4854_v4 = vld [vmem:[%s9988_s9 + $0x180] sm:$0xff] }
 0x943   : > { %7449 = vmatpush3.bf16.msra.mxu1 %v9362_v6  ;;  %v5030_v5 = vunpack.c.l.s8.bf16 %v4854_v4  ;;  %v5034_v46 = vunpack.c.h.s8.bf16 %v4854_v4 }
 0x944   : > { %7450 = vmatprep.subr.bf16.mxu1 %v8228_v34 }
 0x945   : > { %5246 = vmatpush1.bf16.msra.mxu0 %v4982_v7  ;;  %v5035_v7 = vunpack.c.h.s8.bf16 %v4855_v63 }
 0x946   : > { %5247 = vmatprep.subr.bf16.mxu0 %v4987_v42  ;;  %v4859_v42 = vld [vmem:[%s9988_s9 + $0x1a8] sm:$0xff] }
 0x947   : > { %7452 = vmatpush3.bf16.msra.mxu1 %v9367_v45 }
 0x948   : > { %7453 = vmatprep.subr.bf16.mxu1 %v8228_v34 }
 0x949   : > { %5248 = vmatpush1.bf16.msra.mxu0 %v4986_v47  ;;  %v5039_v47 = vunpack.c.l.s8.bf16 %v4859_v42 }
 0x94a   : > { %5249 = vmatprep.subr.bf16.mxu0 %v4991_v8  ;;  %v4858_v8 = vld [vmem:[%s9988_s9 + $0x1a0] sm:$0xff] }
 0x94b   : > { %7455 = vmatpush3.bf16.msra.mxu1 %v9371_v50  ;;  %v5038_v9 = vunpack.c.l.s8.bf16 %v4858_v8  ;;  %v5042_v25 = vunpack.c.h.s8.bf16 %v4858_v8 }
 0x94c   : > { %7456 = vmatprep.subr.bf16.mxu1 %v8228_v34 }
 0x94d   : > { %5250 = vmatpush1.bf16.msra.mxu0 %v4990_v52  ;;  %v5043_v52 = vunpack.c.h.s8.bf16 %v4859_v42  ;;  %v4879_v42 = vld [vmem:[%s9988_s9 + $0x248] sm:$0xff] }
 0x94e   : > { %5251 = vmatprep.subr.bf16.mxu0 %v4995_v11  ;;  %v4863_v11 = vld [vmem:[%s9988_s9 + $0x1c8] sm:$0xff]  ;;  %v5083_v8 = vunpack.c.h.s8.bf16 %v4879_v42 }
 0x94f   : > { %7458 = vmatpush3.bf16.msra.mxu1 %v9375_v10  ;;  %v5047_v22 = vunpack.c.l.s8.bf16 %v4863_v11 }
 0x950   : > { %7459 = vmatprep.subr.bf16.mxu1 %v8228_v34 }
 0x951   : > { %5252 = vmatpush1.bf16.msra.mxu0 %v4994_v17 }
 0x952   : > { %5262 = vmatprep.subr.bf16.mxu0 %v4999_v24 }
 0x953   : > { %7461 = vmatpush3.bf16.msra.mxu1 %v9379_v12 }
 0x954   : > { %7462 = vmatprep.subr.bf16.mxu1 %v8228_v34  ;;  %5254 = vmatmul.mubr.bf16.vlgmr.msra.gmra.mrb[148].mxu0 %v9461_v28 }
 0x955   : > { %5263 = vmatpush1.bf16.msra.mxu0 %v4998_v19  ;;  %5294 = vmatprep.mubr.bf16.mxu0 %v9465_v20  ;;  %v6573_v19 = vld [vmem:[#allocation8 + $0x5] ss:$0 sm:$0xff] }
 0x956   : > { %5264 = vmatprep.subr.bf16.mxu0 %v5003_v21 }
 0x957   : > { %7464 = vmatpush3.bf16.msra.mxu1 %v9383_v18 }
 0x958   : > { %7465 = vmatprep.subr.bf16.mxu1 %v8228_v34 }
 0x959   : > { %5265 = vmatpush1.bf16.msra.mxu0 %v5002_v30 }
 0x95a   : > { %5266 = vmatprep.subr.bf16.mxu0 %v5007_v33 }
 0x95d   : > { %5267 = vmatpush1.bf16.msra.mxu0 %v5006_v36 }
 0x95e   : > { %5268 = vmatprep.subr.bf16.mxu0 %v5011_v37  ;;  %v4867_v37 = vld [vmem:[%s9988_s9 + $0x1e8] sm:$0xff] }
 0x95f   : > { %v5059_v55 = vunpack.c.h.s8.bf16 %v4867_v37 }
 0x961   : > { %5269 = vmatpush1.bf16.msra.mxu0 %v5010_v44 }
 0x962   : > { %5270 = vmatprep.subr.bf16.mxu0 %v5015_v54 }
 0x965   : > { %5271 = vmatpush1.bf16.msra.mxu0 %v5014_v58 }
 0x966   : > { %5272 = vmatprep.subr.bf16.mxu0 %v5019_v48 }
 0x969   : > { %5273 = vmatpush1.bf16.msra.mxu0 %v5018_v51  ;;  %v4870_v51 = vld [vmem:[%s9988_s9 + $0x200] sm:$0xff] }
 0x96a   : > { %5274 = vmatprep.subr.bf16.mxu0 %v5023_v59  ;;  %v9524_v59 = vld [vmem:[%s9401_s23 + $0x10] sm:$0xff] }
 0x96b   : > { %v9532_v63 = vcombine.high %v9524_v59, %v9524_v59 }
 0x96d   : > { %5275 = vmatpush1.bf16.msra.mxu0 %v5022_v61  ;;  %v9528_v61 = vcombine.low %v9457_v26, %v9457_v26  ;;  %v5066_v26 = vunpack.c.h.s8.bf16 %v4870_v51 }
 0x96e   : > { %5276 = vmatprep.subr.bf16.mxu0 %v5027_v62  ;;  %v5062_v62 = vunpack.c.l.s8.bf16 %v4870_v51 }
 0x971   : > { %5277 = vmatpush1.bf16.msra.mxu0 %v5026_v0 }
 0x972   : > { %5278 = vmatprep.subr.bf16.mxu0 %v5031_v2  ;;  %v4875_v2 = vld [vmem:[%s9988_s9 + $0x228] sm:$0xff] }
 0x973   : > { %v5071_v4 = vunpack.c.l.s8.bf16 %v4875_v2 }
 0x975   : > { %5279 = vmatpush1.bf16.msra.mxu0 %v5030_v5 }
 0x976   : > { %5280 = vmatprep.subr.bf16.mxu0 %v5035_v7  ;;  %v5075_v7 = vunpack.c.h.s8.bf16 %v4875_v2 }
 0x979   : > { %5281 = vmatpush1.bf16.msra.mxu0 %v5034_v46 }
 0x97a   : > { %5282 = vmatprep.subr.bf16.mxu0 %v5039_v47  ;;  %v5079_v47 = vunpack.c.l.s8.bf16 %v4879_v42 }
 0x97d   : > { %5283 = vmatpush1.bf16.msra.mxu0 %v5038_v9  ;;  %v4883_v9 = vld [vmem:[%s9988_s9 + $0x268] sm:$0xff] }
 0x97e   : > { %5284 = vmatprep.subr.bf16.mxu0 %v5043_v52 }
 0x981   : > { %5285 = vmatpush1.bf16.msra.mxu0 %v5042_v25 }
 0x982   : > { %5286 = vmatprep.subr.bf16.mxu0 %v5047_v22 }
 0x9e5   : > { %v4433_v29 = vpop.f32.mrb[88].mxu1 }
 0x9e6   : > { %v7309_v27 = vpop.f32.mrb[89].mxu1 }
 0x9e7   : > { %v4436_v23 = vpop.f32.mrb[90].mxu1 }
 0x9e8   : > { %v7310_v35 = vpop.f32.mrb[91].mxu1 }
 0x9e9   : > { %v5051_v35 = vunpack.c.h.s8.bf16 %v4863_v11  ;;  %v5087_v11 = vunpack.c.l.s8.bf16 %v4883_v9 }
 0x9ed   : > { %v4489_v40 = vpop.f32.mrb[92].mxu1 }
 0x9ee   : > { %v4490_v41 = vadd.f32 %v4489_v40, %v4433_v29  ;;  %v7317_v43 = vpop.f32.mrb[93].mxu1  ;;  %v4862_v29 = vld [vmem:[%s9988_s9 + $0x1c0] sm:$0xff] }
 0x9ef   : > { %v4492_v53 = vpop.f32.mrb[94].mxu1  ;;  %v5046_v32 = vunpack.c.l.s8.bf16 %v4862_v29  ;;  %v5050_v40 = vunpack.c.h.s8.bf16 %v4862_v29  ;;  %v4866_v43 = vld [vmem:[%s9988_s9 + $0x1e0] sm:$0xff] }
 0x9f0   : > { %v4493_v56 = vadd.f32 %v4492_v53, %v4436_v23  ;;  %v7318_v57 = vpop.f32.mrb[95].mxu1  ;;  %v5054_v54 = vunpack.c.l.s8.bf16 %v4866_v43  ;;  %v5058_v48 = vunpack.c.h.s8.bf16 %v4866_v43  ;;  %v4890_v29 = vld [vmem:[%s9988_s9 + $0x2a0] sm:$0xff] }
 0x9f1   : > { %5287 = vmatpush1.bf16.msra.mxu0 %v5046_v32  ;;  %v4871_v57 = vld [vmem:[%s9988_s9 + $0x208] sm:$0xff]  ;;  %v5106_v32 = vunpack.c.h.s8.bf16 %v4890_v29 }
 0x9f2   : > { %5288 = vmatprep.subr.bf16.mxu0 %v5051_v35  ;;  %v5063_v49 = vunpack.c.l.s8.bf16 %v4871_v57  ;;  %v5067_v0 = vunpack.c.h.s8.bf16 %v4871_v57 }
 0x9f5   : > { %5289 = vmatpush1.bf16.msra.mxu0 %v5050_v40  ;;  %v4899_v40 = vld [vmem:[%s9988_s9 + $0x2e8] sm:$0xff] }
 0x9f6   : > { %v5119_v43 = vunpack.c.l.s8.bf16 %v4899_v40 }
 0xa0d   : > { %v4602_v16 = vpop.f32.mrb[96].mxu1 }
 0xa0e   : > { %v4609_v17 = vadd.f32 %v4602_v16, %v4490_v41  ;;  %v7337_v24 = vpop.f32.mrb[97].mxu1  ;;  %v5055_v41 = vunpack.c.l.s8.bf16 %v4867_v37  ;;  %v5091_v16 = vunpack.c.h.s8.bf16 %v4883_v9 }
 0xa0f   : > { %v4605_v21 = vpop.f32.mrb[98].mxu1 }
 0xa10   : > { %v4610_v27 = vadd.f32 %v4605_v21, %v4493_v56  ;;  %v7338_v30 = vpop.f32.mrb[99].mxu1  ;;  %v9505_v23 = vadd.f32 %v6573_v19, %v4609_v17  ;;  %5290 = vmatprep.subr.bf16.mxu0 %v5055_v41  ;;  %v4887_v17 = vld [vmem:[%s9988_s9 + $0x288] sm:$0xff] }
 0xa11   : > { %5291 = vmatpush1.bf16.msra.mxu0 %v5054_v54  ;;  %v5095_v25 = vunpack.c.l.s8.bf16 %v4887_v17  ;;  %v4891_v21 = vld [vmem:[%s9988_s9 + $0x2a8] sm:$0xff]  ;;  %v5123_v54 = vunpack.c.h.s8.bf16 %v4899_v40 }
 0xa12   : > { %v9507_v33 = vadd.f32 %v6573_v19, %v4610_v27  ;;  %5292 = vmatprep.subr.bf16.mxu0 %v5059_v55  ;;  %v5103_v22 = vunpack.c.l.s8.bf16 %v4891_v21  ;;  %v5102_v27 = vunpack.c.l.s8.bf16 %v4890_v29  ;;  %v4895_v30 = vld [vmem:[%s9988_s9 + $0x2c8] sm:$0xff] }
 0xa13   : > { %v5111_v35 = vunpack.c.l.s8.bf16 %v4895_v30  ;;  %v4903_v55 = vld [vmem:[%s9988_s9 + $0x308] sm:$0xff] }
 0xa14   : > { %v4617_v36 = vadd.f32 %v9507_v33, %v9505_v23  ;;  %v5127_v57 = vunpack.c.l.s8.bf16 %v4903_v55  ;;  %v5131_v51 = vunpack.c.h.s8.bf16 %v4903_v55 }
 0xa15   : > { %5293 = vmatpush1.bf16.msra.mxu0 %v5058_v48  ;;  %v9603_v48 = vcombine.low %v9524_v59, %v9524_v59  ;;  %v4906_v59 = vld [vmem:[%s9988_s9 + $0x320] sm:$0xff] }
 0xa16   : > { %v4618_v39 = vrot.slane %v4617_v36, 4  ;;  %5303 = vmatprep.subr.bf16.mxu0 %v5063_v49  ;;  %v5134_v2 = vunpack.c.l.s8.bf16 %v4906_v59 }
 0xa18   : > { %v4619_v44 = vadd.f32 %v4618_v39, %v4617_v36  ;;  %5295 = vmatmul.mubr.bf16.vlgmr.msra.gmra.mrb[148].mxu0 %v9528_v61  ;;  %v4894_v36 = vld [vmem:[%s9988_s9 + $0x2c0] sm:$0xff]  ;;  %v5115_v39 = vunpack.c.h.s8.bf16 %v4895_v30 }
 0xa19   : > { %5304 = vmatpush1.bf16.msra.mxu0 %v5062_v62  ;;  %5335 = vmatprep.mubr.bf16.mxu0 %v9532_v63  ;;  %v5110_v37 = vunpack.c.l.s8.bf16 %v4894_v36  ;;  %v5114_v41 = vunpack.c.h.s8.bf16 %v4894_v36  ;;  %v4907_v62 = vld [vmem:[%s9988_s9 + $0x328] sm:$0xff] }
 0xa1a   : > { %v4620_v53 = vrot.slane %v4619_v44, 2  ;;  %5305 = vmatprep.subr.bf16.mxu0 %v5067_v0  ;;  %v5135_v0 = vunpack.c.l.s8.bf16 %v4907_v62 }
 0xa1c   : > { %v4621_v56 = vadd.f32 %v4620_v53, %v4619_v44  ;;  %v4898_v44 = vld [vmem:[%s9988_s9 + $0x2e0] sm:$0xff] }
 0xa1d   : > { %5306 = vmatpush1.bf16.msra.mxu0 %v5066_v26  ;;  %v5118_v53 = vunpack.c.l.s8.bf16 %v4898_v44  ;;  %v5139_v26 = vunpack.c.h.s8.bf16 %v4907_v62 }
 0xa1e   : > { %v4622_v58 = vrot.slane %v4621_v56, 1  ;;  %5307 = vmatprep.subr.bf16.mxu0 %v5071_v4  ;;  %v5138_v4 = vunpack.c.h.s8.bf16 %v4906_v59 }
 0xa20   : > { %v4623_v60 = vadd.f32 %v4622_v58, %v4621_v56  ;;  %v5122_v56 = vunpack.c.h.s8.bf16 %v4898_v44  ;;  %v4902_v58 = vld [vmem:[%s9988_s9 + $0x300] sm:$0xff] }
 0xa21   : > { %v5126_v49 = vunpack.c.l.s8.bf16 %v4902_v58 }
 0xa22   : > { %7372 = vmatmul.mubr.f32.vlgmr.msra.gmra.mrb[100].mxu1 %v4623_v60  ;;  %v5130_v60 = vunpack.c.h.s8.bf16 %v4902_v58 }
 0xa23   : > { %7467 = vmatpush3.bf16.msra.mxu1 %v9355_v1  ;;  %7406 = vmatprep.mubr.msk.f32.mxu1 %vm8229_vm1, %v8230_v38  ;;  %v4874_v1 = vld [vmem:[%s9988_s9 + $0x220] sm:$0xff] }
 0xa24   : > { %7468 = vmatprep.subr.bf16.mxu1 %v8228_v34  ;;  %v5070_v5 = vunpack.c.l.s8.bf16 %v4874_v1  ;;  %v5074_v46 = vunpack.c.h.s8.bf16 %v4874_v1  ;;  %v4911_v1 = vld [vmem:[%s9988_s9 + $0x348] sm:$0xff] }
 0xa26   : > { %5308 = vmatpush1.bf16.msra.mxu0 %v5070_v5  ;;  %v5143_v5 = vunpack.c.l.s8.bf16 %v4911_v1 }
 0xa27   : > { %7470 = vmatpush3.bf16.msra.mxu1 %v9358_v3  ;;  %5309 = vmatprep.subr.bf16.mxu0 %v5075_v7  ;;  %v4878_v3 = vld [vmem:[%s9988_s9 + $0x240] sm:$0xff] }
 0xa28   : > { %7471 = vmatprep.subr.bf16.mxu1 %v8228_v34  ;;  %v5082_v52 = vunpack.c.h.s8.bf16 %v4878_v3  ;;  %v4910_v7 = vld [vmem:[%s9988_s9 + $0x340] sm:$0xff] }
 0xa29   : > { %v5142_v42 = vunpack.c.l.s8.bf16 %v4910_v7 }
 0xa2a   : > { %5310 = vmatpush1.bf16.msra.mxu0 %v5074_v46  ;;  %v5147_v46 = vunpack.c.h.s8.bf16 %v4911_v1 }
 0xa2b   : > { %7473 = vmatpush3.bf16.msra.mxu1 %v9362_v6  ;;  %v5078_v6 = vunpack.c.l.s8.bf16 %v4878_v3  ;;  %5311 = vmatprep.subr.bf16.mxu0 %v5079_v47  ;;  %v5146_v47 = vunpack.c.h.s8.bf16 %v4910_v7  ;;  %v4915_v3 = vld [vmem:[%s9988_s9 + $0x368] sm:$0xff] }
 0xa2c   : > { %7474 = vmatprep.subr.bf16.mxu1 %v8228_v34  ;;  %v5151_v9 = vunpack.c.l.s8.bf16 %v4915_v3 }
 0xa2e   : > { %5312 = vmatpush1.bf16.msra.mxu0 %v5078_v6  ;;  %v4914_v6 = vld [vmem:[%s9988_s9 + $0x360] sm:$0xff] }
 0xa2f   : > { %7476 = vmatpush3.bf16.msra.mxu1 %v9367_v45  ;;  %5313 = vmatprep.subr.bf16.mxu0 %v5083_v8  ;;  %v4882_v45 = vld [vmem:[%s9988_s9 + $0x260] sm:$0xff]  ;;  %v9627_v8 = vld [vmem:[%s9988_s9 + $0x18] sm:$0xff] }
 0xa30   : > { %7477 = vmatprep.subr.bf16.mxu1 %v8228_v34  ;;  %v5090_v24 = vunpack.c.h.s8.bf16 %v4882_v45 }
 0xa32   : > { %5314 = vmatpush1.bf16.msra.mxu0 %v5082_v52  ;;  %v5150_v52 = vunpack.c.l.s8.bf16 %v4914_v6 }
 0xa33   : > { %7479 = vmatpush3.bf16.msra.mxu1 %v9371_v50  ;;  %v5086_v50 = vunpack.c.l.s8.bf16 %v4882_v45  ;;  %5315 = vmatprep.subr.bf16.mxu0 %v5087_v11  ;;  %v4937_v11 = vunpack.c.l.s8.bf16 %v9627_v8  ;;  %v5155_v45 = vunpack.c.h.s8.bf16 %v4915_v3 }
 0xa34   : > { %7480 = vmatprep.subr.bf16.mxu1 %v8228_v34 }
 0xa36   : > { %5316 = vmatpush1.bf16.msra.mxu0 %v5086_v50  ;;  %v5154_v50 = vunpack.c.h.s8.bf16 %v4914_v6  ;;  %v4812_v6 = vld [vmem:[%s9988_s9 + $0x30] sm:$0xff] }
 0xa37   : > { %7482 = vmatpush3.bf16.msra.mxu1 %v9375_v10  ;;  %5317 = vmatprep.subr.bf16.mxu0 %v5091_v16  ;;  %v4886_v10 = vld [vmem:[%s9988_s9 + $0x280] sm:$0xff]  ;;  %v4919_v16 = vld [vmem:[%s9988_s9 + $0x388] sm:$0xff] }
 0xa38   : > { %7483 = vmatprep.subr.bf16.mxu1 %v8228_v34  ;;  %v5094_v19 = vunpack.c.l.s8.bf16 %v4886_v10 }
 0xa3a   : > { %5318 = vmatpush1.bf16.msra.mxu0 %v5090_v24  ;;  %v4918_v24 = vld [vmem:[%s9988_s9 + $0x380] sm:$0xff] }
 0xa3b   : > { %7485 = vmatpush3.bf16.msra.mxu1 %v9379_v12  ;;  %5319 = vmatprep.subr.bf16.mxu0 %v5095_v25  ;;  %v5099_v12 = vunpack.c.h.s8.bf16 %v4887_v17  ;;  %v5159_v17 = vunpack.c.l.s8.bf16 %v4919_v16  ;;  %v5158_v25 = vunpack.c.l.s8.bf16 %v4918_v24 }
 0xa3c   : > { %7486 = vmatprep.subr.bf16.mxu1 %v8228_v34  ;;  %v5098_v34 = vunpack.c.h.s8.bf16 %v4886_v10  ;;  %v5163_v10 = vunpack.c.h.s8.bf16 %v4919_v16 }
 0xa3e   : > { %5320 = vmatpush1.bf16.msra.mxu0 %v5094_v19  ;;  %v5162_v19 = vunpack.c.h.s8.bf16 %v4918_v24 }
 0xa3f   : > { %7488 = vmatpush3.bf16.msra.mxu1 %v9383_v18  ;;  %5321 = vmatprep.subr.bf16.mxu0 %v5099_v12  ;;  %v5107_v18 = vunpack.c.h.s8.bf16 %v4891_v21  ;;  %v4923_v12 = vld [vmem:[%s9988_s9 + $0x3a8] sm:$0xff] }
 0xa40   : > { %5385 = vmatprep.subr.bf16.mxu1 %v4937_v11  ;;  %v5167_v21 = vunpack.c.l.s8.bf16 %v4923_v12  ;;  %v5171_v29 = vunpack.c.h.s8.bf16 %v4923_v12  ;;  %v4948_v11 = vunpack.c.h.s8.bf16 %v4812_v6 }
 0xa42   : > { %5322 = vmatpush1.bf16.msra.mxu0 %v5098_v34  ;;  %v4922_v34 = vld [vmem:[%s9988_s9 + $0x3a0] sm:$0xff] }
 0xa43   : > { %5323 = vmatprep.subr.bf16.mxu0 %v5103_v22  ;;  %v5166_v22 = vunpack.c.l.s8.bf16 %v4922_v34 }
 0xa46   : > { %5324 = vmatpush1.bf16.msra.mxu0 %v5102_v27  ;;  %v5170_v27 = vunpack.c.h.s8.bf16 %v4922_v34 }
 0xa47   : > { %5325 = vmatprep.subr.bf16.mxu0 %v5107_v18  ;;  %v4927_v18 = vld [vmem:[%s9988_s9 + $0x3c8] sm:$0xff] }
 0xa48   : > { %v5175_v30 = vunpack.c.l.s8.bf16 %v4927_v18  ;;  %v5179_v36 = vunpack.c.h.s8.bf16 %v4927_v18 }
 0xa4a   : > { %5326 = vmatpush1.bf16.msra.mxu0 %v5106_v32  ;;  %v4926_v32 = vld [vmem:[%s9988_s9 + $0x3c0] sm:$0xff] }
 0xa4b   : > { %5327 = vmatprep.subr.bf16.mxu0 %v5111_v35  ;;  %v5174_v35 = vunpack.c.l.s8.bf16 %v4926_v32 }
 0xa4e   : > { %5328 = vmatpush1.bf16.msra.mxu0 %v5110_v37  ;;  %v5178_v37 = vunpack.c.h.s8.bf16 %v4926_v32 }
 0xa4f   : > { %5329 = vmatprep.subr.bf16.mxu0 %v5115_v39  ;;  %v4931_v39 = vld [vmem:[%s9988_s9 + $0x3e8] sm:$0xff] }
 0xa50   : > { %v5183_v40 = vunpack.c.l.s8.bf16 %v4931_v39  ;;  %v5187_v44 = vunpack.c.h.s8.bf16 %v4931_v39 }
 0xa52   : > { %5330 = vmatpush1.bf16.msra.mxu0 %v5114_v41  ;;  %v4930_v41 = vld [vmem:[%s9988_s9 + $0x3e0] sm:$0xff] }
 0xa53   : > { %5331 = vmatprep.subr.bf16.mxu0 %v5119_v43  ;;  %v5182_v43 = vunpack.c.l.s8.bf16 %v4930_v41 }
 0xa56   : > { %5332 = vmatpush1.bf16.msra.mxu0 %v5118_v53  ;;  %v5186_v53 = vunpack.c.h.s8.bf16 %v4930_v41 }
 0xa57   : > { %5333 = vmatprep.subr.bf16.mxu0 %v5123_v54  ;;  %v4805_v54 = vld [vmem:[%s9401_s23 + $0x18] sm:$0xff]  ;;  %s6294_s23 = sshll.u32 %s588_s24, 4 }
 0xa58   : > { %v9655_v55 = vcombine.low %v4805_v54, %v4805_v54  ;;  %s9897_s30 = scalar_lea.vmem [#allocation10], %s6294_s23 }
 0xa59   : > { %s6116_s21 = sshll.u32 %s9897_s30, 4  ;;  %s9929_s21 = int_to_ptr.vmem [resolvable:$true] %s6116_s21 }
 0xa5a   : > { %5334 = vmatpush1.bf16.msra.mxu0 %v5122_v56  ;;  %v9657_v56 = vcombine.high %v4805_v54, %v4805_v54  ;;  %s8143_s29 = scalar_lea.vmem %s9929_s21, 256 }
 0xa5b   : > { %5344 = vmatprep.subr.bf16.mxu0 %v5127_v57  ;;  %p8144_p8 = scmp.ne.s32.totalorder %s9929_s21, %s8143_s29 }
 0xa5d   : > { %5336 = vmatmul.mubr.bf16.vlgmr.msra.gmra.mrb[148].mxu0 %v9603_v48  ;;  %p8145_p13 = pnand %p8144_p8, %p10036_p11 }
 0xa5e   : > { %5345 = vmatpush1.bf16.msra.mxu0 %v5126_v49  ;;  %5376 = vmatprep.mubr.bf16.mxu0 %v9657_v56 }
 0xa5f   : > { %5346 = vmatprep.subr.bf16.mxu0 %v5131_v51  ;;  %p8146_p1 = pneg %p8145_p13 }
 0xa62   : > { %5347 = vmatpush1.bf16.msra.mxu0 %v5130_v60 }
 0xa63   : > { %5348 = vmatprep.subr.bf16.mxu0 %v5135_v0 }
 0xa66   : > { %5349 = vmatpush1.bf16.msra.mxu0 %v5134_v2 }
 0xa67   : > { %5350 = vmatprep.subr.bf16.mxu0 %v5139_v26 }
 0xa6a   : > { %5351 = vmatpush1.bf16.msra.mxu0 %v5138_v4 }
 0xa6b   : > { %5352 = vmatprep.subr.bf16.mxu0 %v5143_v5  ;;  %v4808_v5 = vld [vmem:[%s9988_s9 + $0x10] sm:$0xff] }
 0xa6c   : > { %v4936_v7 = vunpack.c.l.s8.bf16 %v4808_v5 }
 0xa6e   : > { %5353 = vmatpush1.bf16.msra.mxu0 %v5142_v42 }
 0xa6f   : > { %5354 = vmatprep.subr.bf16.mxu0 %v5147_v46  ;;  %v4813_v46 = vld [vmem:[%s9988_s9 + $0x38] sm:$0xff] }
 0xa70   : > { %v4945_v3 = vunpack.c.l.s8.bf16 %v4813_v46 }
 0xa72   : > { %5355 = vmatpush1.bf16.msra.mxu0 %v5146_v47  ;;  %v4940_v47 = vunpack.c.h.s8.bf16 %v4808_v5 }
 0xa73   : > { %5356 = vmatprep.subr.bf16.mxu0 %v5151_v9  ;;  %v4944_v9 = vunpack.c.l.s8.bf16 %v4812_v6  ;;  %v4849_v6 = vld [vmem:[%s9988_s9 + $0x158] sm:$0xff] }
 0xa76   : > { %5357 = vmatpush1.bf16.msra.mxu0 %v5150_v52  ;;  %v4949_v52 = vunpack.c.h.s8.bf16 %v4813_v46  ;;  %v4844_v46 = vld [vmem:[%s9988_s9 + $0x130] sm:$0xff] }
 0xa77   : > { %5358 = vmatprep.subr.bf16.mxu0 %v5155_v45 }
 0xa7a   : > { %5359 = vmatpush1.bf16.msra.mxu0 %v5154_v50 }
 0xa7b   : > { %5360 = vmatprep.subr.bf16.mxu0 %v5159_v17  ;;  %v4821_v17 = vld [vmem:[%s9988_s9 + $0x78] sm:$0xff] }
 0xa7c   : > { %v4965_v12 = vunpack.c.h.s8.bf16 %v4821_v17 }
 0xa7e   : > { %5361 = vmatpush1.bf16.msra.mxu0 %v5158_v25  ;;  %v4961_v25 = vunpack.c.l.s8.bf16 %v4821_v17 }
 0xa7f   : > { %5362 = vmatprep.subr.bf16.mxu0 %v5163_v10  ;;  %v4820_v10 = vld [vmem:[%s9988_s9 + $0x70] sm:$0xff] }
 0xa80   : > { %v4964_v34 = vunpack.c.h.s8.bf16 %v4820_v10 }
 0xa82   : > { %5363 = vmatpush1.bf16.msra.mxu0 %v5162_v19  ;;  %v4960_v19 = vunpack.c.l.s8.bf16 %v4820_v10 }
 0xa83   : > { %5364 = vmatprep.subr.bf16.mxu0 %v5167_v21  ;;  %v4825_v21 = vld [vmem:[%s9988_s9 + $0x98] sm:$0xff] }
 0xa84   : > { %v4973_v18 = vunpack.c.h.s8.bf16 %v4825_v21 }
 0xa86   : > { %5365 = vmatpush1.bf16.msra.mxu0 %v5166_v22  ;;  %v4969_v22 = vunpack.c.l.s8.bf16 %v4825_v21 }
 0xa87   : > { %5366 = vmatprep.subr.bf16.mxu0 %v5171_v29  ;;  %v4824_v29 = vld [vmem:[%s9988_s9 + $0x90] sm:$0xff] }
 0xa88   : > { %v4972_v32 = vunpack.c.h.s8.bf16 %v4824_v29 }
 0xa8a   : > { %5367 = vmatpush1.bf16.msra.mxu0 %v5170_v27  ;;  %v4968_v27 = vunpack.c.l.s8.bf16 %v4824_v29 }
 0xa8b   : > { %5368 = vmatprep.subr.bf16.mxu0 %v5175_v30  ;;  %v4829_v30 = vld [vmem:[%s9988_s9 + $0xb8] sm:$0xff] }
 0xa8c   : > { %v4981_v39 = vunpack.c.h.s8.bf16 %v4829_v30 }
 0xa8e   : > { %5369 = vmatpush1.bf16.msra.mxu0 %v5174_v35  ;;  %v4977_v35 = vunpack.c.l.s8.bf16 %v4829_v30 }
 0xa8f   : > { %5370 = vmatprep.subr.bf16.mxu0 %v5179_v36  ;;  %v4828_v36 = vld [vmem:[%s9988_s9 + $0xb0] sm:$0xff] }
 0xa90   : > { %v4980_v41 = vunpack.c.h.s8.bf16 %v4828_v36 }
 0xa92   : > { %5371 = vmatpush1.bf16.msra.mxu0 %v5178_v37  ;;  %v4976_v37 = vunpack.c.l.s8.bf16 %v4828_v36 }
 0xa93   : > { %5372 = vmatprep.subr.bf16.mxu0 %v5183_v40  ;;  %v4833_v40 = vld [vmem:[%s9988_s9 + $0xd8] sm:$0xff] }
 0xa94   : > { %v4989_v54 = vunpack.c.h.s8.bf16 %v4833_v40 }
 0xa96   : > { %5373 = vmatpush1.bf16.msra.mxu0 %v5182_v43  ;;  %v4985_v43 = vunpack.c.l.s8.bf16 %v4833_v40 }
 0xa97   : > { %5374 = vmatprep.subr.bf16.mxu0 %v5187_v44  ;;  %v4832_v44 = vld [vmem:[%s9988_s9 + $0xd0] sm:$0xff] }
 0xa9a   : > { %5375 = vmatpush1.bf16.msra.mxu0 %v5186_v53  ;;  %v4984_v53 = vunpack.c.l.s8.bf16 %v4832_v44 }
 0xa9d   : > { %5377 = vmatmul.mubr.bf16.vlgmr.msra.gmra.mrb[148].mxu0 %v9655_v55 }
 0xaf5   : > { %v4690_v57 = vpop.f32.mrb[100].mxu1 }
 0xaf6   : > { %v4697_v58 = vrot.slane %v4690_v57, %v8851_v15  ;;  %v7373_v49 = vpop.f32.mrb[101].mxu1  ;;  %v4837_v57 = vld [vmem:[%s9988_s9 + $0xf8] sm:$0xff] }
 0xaf7   : > { %v4993_v49 = vunpack.c.l.s8.bf16 %v4837_v57 }
 0xaf8   : > { %v9663_v51 = vsub.f32 %v9505_v23, %v4697_v58  ;;  %v9666_v60 = vsub.f32 %v9507_v33, %v4697_v58  ;;  %v4941_v33 = vunpack.c.h.s8.bf16 %v9627_v8  ;;  %v4817_v8 = vld [vmem:[%s9988_s9 + $0x58] sm:$0xff]  ;;  %v4988_v58 = vunpack.c.h.s8.bf16 %v4832_v44 }
 0xaf9   : > { %v4953_v45 = vunpack.c.l.s8.bf16 %v4817_v8  ;;  %v4957_v16 = vunpack.c.h.s8.bf16 %v4817_v8  ;;  %v5021_v8 = vunpack.c.h.s8.bf16 %v4849_v6 }
 0xafa   : > { %v4700_v62 = vmul.f32 %v9663_v51, %v9663_v51  ;;  %v4701_v0 = vmul.f32 %v9666_v60, %v9666_v60 }
 0xafc   : > { %v4702_v59 = vadd.f32 %v4701_v0, %v4700_v62  ;;  %v4836_v62 = vld [vmem:[%s9988_s9 + $0xf0] sm:$0xff] }
 0xafd   : > { %v4992_v0 = vunpack.c.l.s8.bf16 %v4836_v62 }
 0xafe   : > { %v4703_v2 = vrot.slane %v4702_v59, 4 }
 0xb00   : > { %v4704_v26 = vadd.f32 %v4703_v2, %v4702_v59  ;;  %v4997_v59 = vunpack.c.h.s8.bf16 %v4837_v57  ;;  %v4841_v2 = vld [vmem:[%s9988_s9 + $0x118] sm:$0xff] }
 0xb01   : > { %v9769_v57 = vld [vmem:[#allocation2] ss:$8 sm:$0xf] }
 0xb02   : > { %v4705_v4 = vrot.slane %v4704_v26, 2 }
 0xb04   : > { %v4706_v1 = vadd.f32 %v4705_v4, %v4704_v26  ;;  %v4996_v26 = vunpack.c.h.s8.bf16 %v4836_v62  ;;  %v5001_v4 = vunpack.c.l.s8.bf16 %v4841_v2  ;;  %v5553_v62 = vrot.slane %v9769_v57, %v8851_v15 }
 0xb06   : > { %v4707_v23 = vrot.slane %v4706_v1, 1 }
 0xb08   : > { %v4708_v42 = vadd.f32 %v4707_v23, %v4706_v1  ;;  %v4840_v1 = vld [vmem:[%s9988_s9 + $0x110] sm:$0xff]  ;;  %v5005_v23 = vunpack.c.h.s8.bf16 %v4841_v2 }
 0xb09   : > { %v5000_v5 = vunpack.c.l.s8.bf16 %v4840_v1 }
 0xb0a   : > { %7407 = vmatmul.mubr.f32.vlgmr.msra.gmra.mrb[102].mxu1 %v4708_v42  ;;  %v5004_v42 = vunpack.c.h.s8.bf16 %v4840_v1 }
 0xb0b   : > { %5386 = vmatpush1.bf16.msra.mxu1 %v4936_v7  ;;  %5417 = vmatprep.mubr.bf16.mxu1 %v9411_v31  ;;  %v4816_v31 = vld [vmem:[%s9988_s9 + $0x50] sm:$0xff]  ;;  %v4845_v7 = vld [vmem:[%s9988_s9 + $0x138] sm:$0xff] }
 0xb0c   : > { %5387 = vmatprep.subr.bf16.mxu1 %v4941_v33  ;;  %v4952_v50 = vunpack.c.l.s8.bf16 %v4816_v31  ;;  %v4956_v24 = vunpack.c.h.s8.bf16 %v4816_v31  ;;  %v5009_v33 = vunpack.c.l.s8.bf16 %v4845_v7 }
 0xb0f   : > { %5388 = vmatpush1.bf16.msra.mxu1 %v4940_v47  ;;  %v5008_v47 = vunpack.c.l.s8.bf16 %v4844_v46 }
 0xb10   : > { %5389 = vmatprep.subr.bf16.mxu1 %v4945_v3  ;;  %v5013_v3 = vunpack.c.h.s8.bf16 %v4845_v7 }
 0xb13   : > { %5390 = vmatpush1.bf16.msra.mxu1 %v4944_v9  ;;  %v5017_v9 = vunpack.c.l.s8.bf16 %v4849_v6 }
 0xb14   : > { %5391 = vmatprep.subr.bf16.mxu1 %v4949_v52 }
 0xb17   : > { %5392 = vmatpush1.bf16.msra.mxu1 %v4948_v11  ;;  %v4853_v11 = vld [vmem:[%s9988_s9 + $0x178] sm:$0xff] }
 0xb18   : > { %5393 = vmatprep.subr.bf16.mxu1 %v4953_v45  ;;  %v5025_v31 = vunpack.c.l.s8.bf16 %v4853_v11  ;;  %v5029_v17 = vunpack.c.h.s8.bf16 %v4853_v11 }
 0xb1b   : > { %5394 = vmatpush1.bf16.msra.mxu1 %v4952_v50  ;;  %v4852_v50 = vld [vmem:[%s9988_s9 + $0x170] sm:$0xff] }
 0xb1c   : > { %5395 = vmatprep.subr.bf16.mxu1 %v4957_v16  ;;  %v5024_v16 = vunpack.c.l.s8.bf16 %v4852_v50 }
 0xb1f   : > { %5396 = vmatpush1.bf16.msra.mxu1 %v4956_v24  ;;  %v4857_v24 = vld [vmem:[%s9988_s9 + $0x198] sm:$0xff] }
 0xb20   : > { %5397 = vmatprep.subr.bf16.mxu1 %v4961_v25  ;;  %v5028_v25 = vunpack.c.h.s8.bf16 %v4852_v50  ;;  %v5033_v10 = vunpack.c.l.s8.bf16 %v4857_v24  ;;  %v5037_v21 = vunpack.c.h.s8.bf16 %v4857_v24  ;;  %v7979_v24 = vld [vmem:[#allocation5 + $0x50] sm:$0xff]  }
 0xb23   : > { %5398 = vmatpush1.bf16.msra.mxu1 %v4960_v19  ;;  %v4856_v19 = vld [vmem:[%s9988_s9 + $0x190] sm:$0xff] }
 0xb24   : > { %5399 = vmatprep.subr.bf16.mxu1 %v4965_v12  ;;  %v5032_v12 = vunpack.c.l.s8.bf16 %v4856_v19 }
 0xb27   : > { %5400 = vmatpush1.bf16.msra.mxu1 %v4964_v34  ;;  %v4861_v34 = vld [vmem:[%s9988_s9 + $0x1b8] sm:$0xff] }
 0xb28   : > { %5401 = vmatprep.subr.bf16.mxu1 %v4969_v22  ;;  %v5036_v22 = vunpack.c.h.s8.bf16 %v4856_v19  ;;  %v5041_v29 = vunpack.c.l.s8.bf16 %v4861_v34  ;;  %v5045_v30 = vunpack.c.h.s8.bf16 %v4861_v34 }
 0xb2b   : > { %5402 = vmatpush1.bf16.msra.mxu1 %v4968_v27  ;;  %v4860_v27 = vld [vmem:[%s9988_s9 + $0x1b0] sm:$0xff] }
 0xb2c   : > { %5403 = vmatprep.subr.bf16.mxu1 %v4973_v18  ;;  %v5040_v18 = vunpack.c.l.s8.bf16 %v4860_v27 }
 0xb2f   : > { %5404 = vmatpush1.bf16.msra.mxu1 %v4972_v32  ;;  %v4865_v32 = vld [vmem:[%s9988_s9 + $0x1d8] sm:$0xff] }
 0xb30   : > { %5405 = vmatprep.subr.bf16.mxu1 %v4977_v35  ;;  %v5044_v35 = vunpack.c.h.s8.bf16 %v4860_v27  ;;  %v5049_v36 = vunpack.c.l.s8.bf16 %v4865_v32  ;;  %v5053_v40 = vunpack.c.h.s8.bf16 %v4865_v32 }
 0xb33   : > { %5406 = vmatpush1.bf16.msra.mxu1 %v4976_v37  ;;  %v4864_v37 = vld [vmem:[%s9988_s9 + $0x1d0] sm:$0xff] }
 0xb34   : > { %5407 = vmatprep.subr.bf16.mxu1 %v4981_v39  ;;  %v5048_v39 = vunpack.c.l.s8.bf16 %v4864_v37 }
 0xb37   : > { %5408 = vmatpush1.bf16.msra.mxu1 %v4980_v41  ;;  %v4869_v41 = vld [vmem:[%s9988_s9 + $0x1f8] sm:$0xff] }
 0xb38   : > { %5409 = vmatprep.subr.bf16.mxu1 %v4985_v43  ;;  %v5052_v43 = vunpack.c.h.s8.bf16 %v4864_v37  ;;  %v5057_v44 = vunpack.c.l.s8.bf16 %v4869_v41  ;;  %v4881_v37 = vld [vmem:[%s9988_s9 + $0x258] sm:$0xff] }
 0xb3b   : > { %5410 = vmatpush1.bf16.msra.mxu1 %v4984_v53  ;;  %v4868_v53 = vld [vmem:[%s9988_s9 + $0x1f0] sm:$0xff] }
 0xb3c   : > { %5411 = vmatprep.subr.bf16.mxu1 %v4989_v54  ;;  %v5056_v54 = vunpack.c.l.s8.bf16 %v4868_v53 }
 0xb3f   : > { %5412 = vmatpush1.bf16.msra.mxu1 %v4988_v58  ;;  %v9771_v58 = vld [vmem:[#allocation2 + $0x1] ss:$8 sm:$0xf] }
 0xb40   : > { %5413 = vmatprep.subr.bf16.mxu1 %v4993_v49  ;;  %v5061_v49 = vunpack.c.h.s8.bf16 %v4869_v41  ;;  %v5578_v2 = vrot.slane %v9771_v58, %v8851_v15 }
 0xb43   : > { %5414 = vmatpush1.bf16.msra.mxu1 %v4992_v0  ;;  %v5556_v0 = vsub.s32 1, %v8848_v14 }
 0xb44   : > { %5415 = vmatprep.subr.bf16.mxu1 %v4997_v59  ;;  %v4873_v59 = vld [vmem:[%s9988_s9 + $0x218] sm:$0xff] }
 0xb45   : > { %v5582_v1 = vrot.slane %v9771_v58, %v5556_v0 }
 0xb47   : > { %5416 = vmatpush1.bf16.msra.mxu1 %v4996_v26 }
 0xb48   : > { %5426 = vmatprep.subr.bf16.mxu1 %v5001_v4  ;;  %v5557_v4 = vrot.slane %v9769_v57, %v5556_v0  ;;  %v4885_v0 = vld [vmem:[%s9988_s9 + $0x278] sm:$0xff] }
 0xb4a   : > { %5418 = vmatmul.mubr.bf16.vlgmr.msra.gmra.mrb[104].mxu1 %v9461_v28  ;;  %v5012_v28 = vunpack.c.h.s8.bf16 %v4844_v46  ;;  %v5065_v46 = vunpack.c.l.s8.bf16 %v4873_v59 }
 0xb4b   : > { %5427 = vmatpush1.bf16.msra.mxu1 %v5000_v5  ;;  %5458 = vmatprep.mubr.bf16.mxu1 %v9465_v20  ;;  %v4848_v20 = vld [vmem:[%s9988_s9 + $0x150] sm:$0xff]  ;;  %v7975_v5 = vld [vmem:[#allocation5 + $0x40] sm:$0xff]  }
 0xb4c   : > { %5428 = vmatprep.subr.bf16.mxu1 %v5005_v23  ;;  %v5016_v52 = vunpack.c.l.s8.bf16 %v4848_v20  ;;  %v5020_v45 = vunpack.c.h.s8.bf16 %v4848_v20  ;;  %v5060_v23 = vunpack.c.h.s8.bf16 %v4868_v53  ;;  %6848 = vmatprep.subr.bf16.mxu0 %v7975_v5  ;;  %v7986_v53 = vld [vmem:[#allocation5 + $0x28] sm:$0xff]  }
 0xb4f   : > { %5429 = vmatpush1.bf16.msra.mxu1 %v5004_v42 }
 0xb50   : > { %5430 = vmatprep.subr.bf16.mxu1 %v5009_v33  ;;  %v7976_v33 = vld [vmem:[#allocation5] sm:$0xff]  }
 0xb51   : > { %6849 = vmatpush3.bf16.msra.mxu0 %v7976_v33 }
 0xb53   : > { %5431 = vmatpush1.bf16.msra.mxu1 %v5008_v47  ;;  %v4872_v47 = vld [vmem:[%s9988_s9 + $0x210] sm:$0xff] }
 0xb54   : > { %5432 = vmatprep.subr.bf16.mxu1 %v5013_v3 }
 0xb57   : > { %5433 = vmatpush1.bf16.msra.mxu1 %v5012_v28 }
 0xb58   : > { %5434 = vmatprep.subr.bf16.mxu1 %v5017_v9 }
 0xb5b   : > { %5435 = vmatpush1.bf16.msra.mxu1 %v5016_v52  ;;  %v7977_v52 = vld [vmem:[#allocation5 + $0x48] sm:$0xff]  }
 0xb5c   : > { %5436 = vmatprep.subr.bf16.mxu1 %v5021_v8  ;;  %v5064_v8 = vunpack.c.l.s8.bf16 %v4872_v47  ;;  %6850 = vmatprep.subr.bf16.mxu0 %v7977_v52 }
 0xb5f   : > { %5437 = vmatpush1.bf16.msra.mxu1 %v5020_v45  ;;  %v7978_v45 = vld [vmem:[#allocation5 + $0x8] sm:$0xff]  }
 0xb60   : > { %5438 = vmatprep.subr.bf16.mxu1 %v5025_v31  ;;  %v5069_v31 = vunpack.c.h.s8.bf16 %v4873_v59  ;;  %6851 = vmatpush3.bf16.msra.mxu0 %v7978_v45  ;;  %v7988_v59 = vld [vmem:[#allocation5 + $0x30] sm:$0xff]  }
 0xb61   : > { %6852 = vmatprep.subr.bf16.mxu0 %v7979_v24 }
 0xb63   : > { %5439 = vmatpush1.bf16.msra.mxu1 %v5024_v16  ;;  %v4877_v16 = vld [vmem:[%s9988_s9 + $0x238] sm:$0xff] }
 0xb64   : > { %5440 = vmatprep.subr.bf16.mxu1 %v5029_v17  ;;  %v5073_v34 = vunpack.c.l.s8.bf16 %v4877_v16 }
 0xb67   : > { %5441 = vmatpush1.bf16.msra.mxu1 %v5028_v25  ;;  %v7980_v25 = vld [vmem:[#allocation5 + $0x10] sm:$0xff]  }
 0xb68   : > { %5442 = vmatprep.subr.bf16.mxu1 %v5033_v10  ;;  %v7981_v10 = vld [vmem:[#allocation5 + $0x58] sm:$0xff]   ;;  %6853 = vmatpush3.bf16.msra.mxu0 %v7980_v25 }
 0xb69   : > { %6854 = vmatprep.subr.bf16.mxu0 %v7981_v10  ;;  %v4892_v10 = vld [vmem:[%s9988_s9 + $0x2b0] sm:$0xff] }
 0xb6b   : > { %5443 = vmatpush1.bf16.msra.mxu1 %v5032_v12  ;;  %v5068_v12 = vunpack.c.h.s8.bf16 %v4872_v47 }
 0xb6c   : > { %5444 = vmatprep.subr.bf16.mxu1 %v5037_v21 }
 0xb6f   : > { %5445 = vmatpush1.bf16.msra.mxu1 %v5036_v22  ;;  %v4876_v22 = vld [vmem:[%s9988_s9 + $0x230] sm:$0xff] }
 0xb70   : > { %5446 = vmatprep.subr.bf16.mxu1 %v5041_v29  ;;  %v5378_v26 = vpop.f32.mrb[148].mxu0  ;;  %v7982_v29 = vld [vmem:[#allocation5 + $0x18] sm:$0xff]   ;;  %v5076_v41 = vunpack.c.h.s8.bf16 %v4876_v22 }
 0xb71   : > { %v5570_v7 = vmul.f32 %v5553_v62, %v5378_v26  ;;  %v5380_v42 = vpop.f32.mrb[149].mxu0  ;;  %6855 = vmatpush3.bf16.msra.mxu0 %v7982_v29  ;;  %v5085_v62 = vunpack.c.h.s8.bf16 %v4881_v37 }
 0xb72   : > { %v5571_v3 = vmul.f32 %v5557_v4, %v5380_v42  ;;  %v5382_v6 = vpop.f32.mrb[150].mxu0  ;;  %v4884_v42 = vld [vmem:[%s9988_s9 + $0x270] sm:$0xff] }
 0xb73   : > { %5447 = vmatpush1.bf16.msra.mxu1 %v5040_v18  ;;  %v9786_v28 = vadd.f32 %v5578_v2, %v5570_v7  ;;  %v5383_v9 = vpop.f32.mrb[151].mxu0  ;;  %v7983_v18 = vld [vmem:[#allocation5 + $0x60] sm:$0xff]   ;;  %v7989_v2 = vld [vmem:[#allocation5 + $0x78] sm:$0xff]   ;;  %v5089_v7 = vunpack.c.l.s8.bf16 %v4885_v0  ;;  %v5088_v6 = vunpack.c.l.s8.bf16 %v4884_v42 }
 0xb74   : > { %5448 = vmatprep.subr.bf16.mxu1 %v5045_v30  ;;  %v9788_v20 = vadd.f32 %v5582_v1, %v5571_v3  ;;  %6856 = vmatprep.subr.bf16.mxu0 %v7983_v18  ;;  %v5093_v9 = vunpack.c.h.s8.bf16 %v4885_v0  ;;  %v4901_v18 = vld [vmem:[%s9988_s9 + $0x2f8] sm:$0xff] }
 0xb75   : > { %v5603_v11 = vmul.f32 0.044715, %v9786_v28  ;;  %v5599_v26 = vmul.f32 0.5, %v9786_v28 }
 0xb76   : > { %v5604_v50 = vmul.f32 0.044715, %v9788_v20  ;;  %v5600_v5 = vmul.f32 0.5, %v9788_v20 }
 0xb77   : > { %5449 = vmatpush1.bf16.msra.mxu1 %v5044_v35  ;;  %v5607_v17 = vmul.f32 %v5603_v11, %v9786_v28  ;;  %v5077_v35 = vunpack.c.h.s8.bf16 %v4877_v16  ;;  %v5092_v11 = vunpack.c.h.s8.bf16 %v4884_v42  ;;  %v4916_v42 = vld [vmem:[%s9988_s9 + $0x370] sm:$0xff] }
 0xb78   : > { %5450 = vmatprep.subr.bf16.mxu1 %v5049_v36  ;;  %v5608_v19 = vmul.f32 %v5604_v50, %v9788_v20 }
 0xb79   : > { %v5611_v21 = vmul.f32 %v5607_v17, %v9786_v28  ;;  %v4893_v17 = vld [vmem:[%s9988_s9 + $0x2b8] sm:$0xff] }
 0xb7a   : > { %v5105_v25 = vunpack.c.l.s8.bf16 %v4893_v17 }
 0xb7b   : > { %5451 = vmatpush1.bf16.msra.mxu1 %v5048_v39  ;;  %v5615_v27 = vadd.f32 %v5611_v21, %v9786_v28  ;;  %v7984_v39 = vld [vmem:[#allocation5 + $0x20] sm:$0xff]   ;;  %v4897_v21 = vld [vmem:[%s9988_s9 + $0x2d8] sm:$0xff] }
 0xb7c   : > { %5452 = vmatprep.subr.bf16.mxu1 %v5053_v40  ;;  %v7985_v40 = vld [vmem:[#allocation5 + $0x68] sm:$0xff]   ;;  %6857 = vmatpush3.bf16.msra.mxu0 %v7984_v39 }
 0xb7d   : > { %v5619_v32 = vmul.f32 0.7978846, %v5615_v27  ;;  %6858 = vmatprep.subr.bf16.mxu0 %v7985_v40  ;;  %v5117_v27 = vunpack.c.h.s8.bf16 %v4897_v21 }
 0xb7f   : > { %5453 = vmatpush1.bf16.msra.mxu1 %v5052_v43  ;;  %8017 = vtanh.f32 %v5619_v32  ;;  %v5081_v43 = vunpack.c.l.s8.bf16 %v4881_v37  ;;  %v4900_v32 = vld [vmem:[%s9988_s9 + $0x2f0] sm:$0xff]  ;;  %v4905_v37 = vld [vmem:[%s9988_s9 + $0x318] sm:$0xff] }
 0xb80   : > { %5454 = vmatprep.subr.bf16.mxu1 %v5057_v44  ;;  %v4880_v44 = vld [vmem:[%s9988_s9 + $0x250] sm:$0xff]  ;;  %6859 = vmatpush3.bf16.msra.mxu0 %v7986_v53  ;;  %v5124_v39 = vunpack.c.h.s8.bf16 %v4900_v32  ;;  %v5129_v40 = vunpack.c.l.s8.bf16 %v4905_v37  ;;  %v4909_v53 = vld [vmem:[%s9988_s9 + $0x338] sm:$0xff] }
 0xb81   : > { %v5084_v1 = vunpack.c.h.s8.bf16 %v4880_v44 }
 0xb83   : > { %5455 = vmatpush1.bf16.msra.mxu1 %v5056_v54  ;;  %v7987_v54 = vld [vmem:[#allocation5 + $0x70] sm:$0xff]  }
 0xb84   : > { %5456 = vmatprep.subr.bf16.mxu1 %v5061_v49  ;;  %v5080_v49 = vunpack.c.l.s8.bf16 %v4880_v44  ;;  %6860 = vmatprep.subr.bf16.mxu0 %v7987_v54  ;;  %v5133_v44 = vunpack.c.h.s8.bf16 %v4905_v37 }
 0xb85   : > { %6861 = vmatpush3.bf16.msra.mxu0 %v7988_v59  ;;  %v5141_v59 = vunpack.c.h.s8.bf16 %v4909_v53 }
 0xb86   : > { %6862 = vmatprep.subr.bf16.mxu0 %v7989_v2  ;;  %v4913_v2 = vld [vmem:[%s9988_s9 + $0x358] sm:$0xff] }
 0xb87   : > { %5457 = vmatpush1.bf16.msra.mxu1 %v5060_v23 }
 0xb88   : > { %5467 = vmatprep.subr.bf16.mxu1 %v5065_v46  ;;  %v7990_v46 = vld [vmem:[#allocation5 + $0x38] sm:$0xff]  }
 0xb89   : > { %v8018_v4 = vpop.eup %8017  ;;  %6863 = vmatpush3.bf16.msra.mxu0 %v7990_v46 }
 0xb8a   : > { %5459 = vmatmul.mubr.bf16.vlgmr.msra.gmra.mrb[104].mxu1 %v9528_v61  ;;  %v5612_v61 = vmul.f32 %v5608_v19, %v9788_v20  ;;  %v5627_v33 = vadd.f32 1.0, %v8018_v4  ;;  %7409 = vmatprep.subr.bf16.mxu0 %v8230_v38  ;;  %v5104_v19 = vunpack.c.l.s8.bf16 %v4892_v10 }
 0xb8b   : > { %5468 = vmatpush1.bf16.msra.mxu1 %v5064_v8  ;;  %5499 = vmatprep.mubr.bf16.mxu1 %v9532_v63  ;;  %v5072_v63 = vunpack.c.l.s8.bf16 %v4876_v22  ;;  %v5113_v22 = vunpack.c.l.s8.bf16 %v4897_v21 }
 0xb8c   : > { %5469 = vmatprep.subr.bf16.mxu1 %v5069_v31  ;;  %v5616_v30 = vadd.f32 %v5612_v61, %v9788_v20  ;;  %v5631_v3 = vmul.f32 %v5627_v33, %v5599_v26  ;;  %v4889_v20 = vld [vmem:[%s9988_s9 + $0x298] sm:$0xff]  ;;  %v4888_v31 = vld [vmem:[%s9988_s9 + $0x290] sm:$0xff]  ;;  %v5145_v26 = vunpack.c.l.s8.bf16 %v4913_v2 }
 0xb8d   : > { %v5097_v45 = vunpack.c.l.s8.bf16 %v4889_v20  ;;  %v5096_v50 = vunpack.c.l.s8.bf16 %v4888_v31  ;;  %v5101_v16 = vunpack.c.h.s8.bf16 %v4889_v20  ;;  %v5100_v24 = vunpack.c.h.s8.bf16 %v4888_v31  ;;  %v4896_v61 = vld [vmem:[%s9988_s9 + $0x2d0] sm:$0xff] }
 0xb8e   : > { %v5620_v36 = vmul.f32 0.7978846, %v5616_v30  ;;  %v5635_v52 = vpack.c.bf16 %v5631_v3, %v5631_v3  ;;  %v5112_v29 = vunpack.c.l.s8.bf16 %v4896_v61  ;;  %v5116_v30 = vunpack.c.h.s8.bf16 %v4896_v61  ;;  %v4920_v20 = vld [vmem:[%s9988_s9 + $0x390] sm:$0xff] }
 0xb8f   : > { %5470 = vmatpush1.bf16.msra.mxu1 %v5068_v12  ;;  %v5109_v12 = vunpack.c.h.s8.bf16 %v4893_v17  ;;  %v5152_v3 = vunpack.c.l.s8.bf16 %v4916_v42  ;;  %v6574_v17 = vld [vmem:[#allocation8 + $0x6] ss:$0 sm:$0xff] }
 0xb90   : > { %5471 = vmatprep.subr.bf16.mxu1 %v5073_v34  ;;  %8019 = vtanh.f32 %v5620_v36  ;;  %v5108_v34 = vunpack.c.h.s8.bf16 %v4892_v10  ;;  %v5125_v36 = vunpack.c.h.s8.bf16 %v4901_v18 }
 0xb93   : > { %5472 = vmatpush1.bf16.msra.mxu1 %v5072_v63  ;;  %v5121_v63 = vunpack.c.l.s8.bf16 %v4901_v18 }
 0xb94   : > { %5473 = vmatprep.subr.bf16.mxu1 %v5077_v35  ;;  %v5120_v35 = vunpack.c.l.s8.bf16 %v4900_v32 }
 0xb97   : > { %5474 = vmatpush1.bf16.msra.mxu1 %v5076_v41  ;;  %v4904_v41 = vld [vmem:[%s9988_s9 + $0x310] sm:$0xff] }
 0xb98   : > { %5475 = vmatprep.subr.bf16.mxu1 %v5081_v43  ;;  %v5128_v43 = vunpack.c.l.s8.bf16 %v4904_v41  ;;  %v5132_v54 = vunpack.c.h.s8.bf16 %v4904_v41 }
 0xb9a   : > { %v8020_v23 = vpop.eup %8019 }
 0xb9b   : > { %5476 = vmatpush1.bf16.msra.mxu1 %v5080_v49  ;;  %v5628_v47 = vadd.f32 1.0, %v8020_v23  ;;  %v5137_v49 = vunpack.c.l.s8.bf16 %v4909_v53  ;;  %v7991_v53 = vld [vmem:[#allocation5 + $0xc0] sm:$0xff]  }
 0xb9c   : > { %5477 = vmatprep.subr.bf16.mxu1 %v5085_v62  ;;  %v4908_v62 = vld [vmem:[%s9988_s9 + $0x330] sm:$0xff] }
 0xb9d   : > { %v5632_v28 = vmul.f32 %v5628_v47, %v5600_v5  ;;  %v5136_v0 = vunpack.c.l.s8.bf16 %v4908_v62  ;;  %v4917_v5 = vld [vmem:[%s9988_s9 + $0x378] sm:$0xff] }
 0xb9f   : > { %5478 = vmatpush1.bf16.msra.mxu1 %v5084_v1  ;;  %v5636_v8 = vpack.c.bf16 %v5632_v28, %v5632_v28  ;;  %v5149_v1 = vunpack.c.h.s8.bf16 %v4913_v2  ;;  %v4921_v28 = vld [vmem:[%s9988_s9 + $0x398] sm:$0xff] }
 0xba0   : > { %5479 = vmatprep.subr.bf16.mxu1 %v5089_v7  ;;  %v5153_v7 = vunpack.c.l.s8.bf16 %v4917_v5  ;;  %v7997_v2 = vld [vmem:[#allocation5 + $0xd8] sm:$0xff]  }
 0xba1   : > { %5931 = vmatprep.mubr.bf16.mxu0 %v5636_v8  ;;  %v5160_v8 = vunpack.c.l.s8.bf16 %v4920_v20 }
 0xba2   : > { %5932 = vmatmul.mubr.bf16.vlgmr.msra.gmra.mrb[152].mxu0 %v5635_v52  ;;  %v5161_v52 = vunpack.c.l.s8.bf16 %v4921_v28 }
 0xba3   : > { %5480 = vmatpush1.bf16.msra.mxu1 %v5088_v6  ;;  %7425 = vmatprep.mubr.msk.bf16.mxu0 %vm8229_vm1, %v8230_v38  ;;  %v5157_v6 = vunpack.c.h.s8.bf16 %v4917_v5  ;;  %v8004_v5 = vld [vmem:[#allocation5 + $0xb0] sm:$0xff]  }
 0xba4   : > { %5481 = vmatprep.subr.bf16.mxu1 %v5093_v9  ;;  %v5156_v9 = vunpack.c.h.s8.bf16 %v4916_v42 }
 0xba7   : > { %5482 = vmatpush1.bf16.msra.mxu1 %v5092_v11  ;;  %v5165_v11 = vunpack.c.h.s8.bf16 %v4921_v28  ;;  %v5564_v28 = vsub.s32 3, %v8848_v14 }
 0xba8   : > { %5483 = vmatprep.subr.bf16.mxu1 %v5097_v45  ;;  %v4925_v45 = vld [vmem:[%s9988_s9 + $0x3b8] sm:$0xff] }
 0xbab   : > { %5484 = vmatpush1.bf16.msra.mxu1 %v5096_v50 }
 0xbac   : > { %5485 = vmatprep.subr.bf16.mxu1 %v5101_v16  ;;  %v5164_v16 = vunpack.c.h.s8.bf16 %v4920_v20 }
 0xbaf   : > { %5486 = vmatpush1.bf16.msra.mxu1 %v5100_v24  ;;  %v5169_v24 = vunpack.c.l.s8.bf16 %v4925_v45 }
 0xbb0   : > { %5487 = vmatprep.subr.bf16.mxu1 %v5105_v25  ;;  %v4924_v25 = vld [vmem:[%s9988_s9 + $0x3b0] sm:$0xff] }
 0xbb3   : > { %5488 = vmatpush1.bf16.msra.mxu1 %v5104_v19 }
 0xbb4   : > { %5489 = vmatprep.subr.bf16.mxu1 %v5109_v12  ;;  %v6575_v12 = vld [vmem:[#allocation8 + $0x7] ss:$0 sm:$0xff] }
 0xbb7   : > { %5490 = vmatpush1.bf16.msra.mxu1 %v5108_v34 }
 0xbb8   : > { %5491 = vmatprep.subr.bf16.mxu1 %v5113_v22  ;;  %v5168_v22 = vunpack.c.l.s8.bf16 %v4924_v25 }
 0xbbb   : > { %5492 = vmatpush1.bf16.msra.mxu1 %v5112_v29 }
 0xbbc   : > { %5493 = vmatprep.subr.bf16.mxu1 %v5117_v27  ;;  %v4929_v27 = vld [vmem:[%s9988_s9 + $0x3d8] sm:$0xff] }
 0xbbf   : > { %5494 = vmatpush1.bf16.msra.mxu1 %v5116_v30 }
 0xbc0   : > { %5495 = vmatprep.subr.bf16.mxu1 %v5121_v63  ;;  %v4928_v63 = vld [vmem:[%s9988_s9 + $0x3d0] sm:$0xff] }
 0xbc1   : > { %v5176_v32 = vunpack.c.l.s8.bf16 %v4928_v63  ;;  %v5180_v37 = vunpack.c.h.s8.bf16 %v4928_v63 }
 0xbc3   : > { %5496 = vmatpush1.bf16.msra.mxu1 %v5120_v35  ;;  %v5181_v35 = vunpack.c.h.s8.bf16 %v4929_v27 }
 0xbc4   : > { %5497 = vmatprep.subr.bf16.mxu1 %v5125_v36  ;;  %v4933_v36 = vld [vmem:[%s9988_s9 + $0x3f8] sm:$0xff] }
 0xbc7   : > { %5498 = vmatpush1.bf16.msra.mxu1 %v5124_v39  ;;  %v5185_v39 = vunpack.c.l.s8.bf16 %v4933_v36 }
 0xbc8   : > { %5508 = vmatprep.subr.bf16.mxu1 %v5129_v40  ;;  %v4932_v40 = vld [vmem:[%s9988_s9 + $0x3f0] sm:$0xff] }
 0xbc9   : > { %v5184_v41 = vunpack.c.l.s8.bf16 %v4932_v40 }
 0xbca   : > { %5500 = vmatmul.mubr.bf16.vlgmr.msra.gmra.mrb[104].mxu1 %v9603_v48  ;;  %v5140_v48 = vunpack.c.h.s8.bf16 %v4908_v62  ;;  %v7994_v62 = vld [vmem:[#allocation5 + $0x88] sm:$0xff]  }
 0xbcb   : > { %5509 = vmatpush1.bf16.msra.mxu1 %v5128_v43  ;;  %5540 = vmatprep.mubr.bf16.mxu1 %v9657_v56  ;;  %v4912_v56 = vld [vmem:[%s9988_s9 + $0x350] sm:$0xff]  ;;  %v5189_v43 = vunpack.c.h.s8.bf16 %v4933_v36  ;;  %v6584_v36 = vld [vmem:[#allocation8 + $0x8] ss:$0 sm:$0xff] }
 0xbcc   : > { %5510 = vmatprep.subr.bf16.mxu1 %v5133_v44  ;;  %v5144_v4 = vunpack.c.l.s8.bf16 %v4912_v56  ;;  %v5148_v23 = vunpack.c.h.s8.bf16 %v4912_v56  ;;  %v5188_v44 = vunpack.c.h.s8.bf16 %v4932_v40  ;;  %v8000_v56 = vld [vmem:[#allocation5 + $0xa0] sm:$0xff]  }
 0xbcf   : > { %5511 = vmatpush1.bf16.msra.mxu1 %v5132_v54  ;;  %v7992_v54 = vld [vmem:[#allocation5 + $0x80] sm:$0xff]  }
 0xbd0   : > { %5512 = vmatprep.subr.bf16.mxu1 %v5137_v49  ;;  %v7993_v49 = vld [vmem:[#allocation5 + $0xc8] sm:$0xff]  }
 0xbd3   : > { %5513 = vmatpush1.bf16.msra.mxu1 %v5136_v0  ;;  %v7995_v0 = vld [vmem:[#allocation5 + $0xd0] sm:$0xff]  }
 0xbd4   : > { %5514 = vmatprep.subr.bf16.mxu1 %v5141_v59  ;;  %v7996_v59 = vld [vmem:[#allocation5 + $0x90] sm:$0xff]  }
 0xbd7   : > { %5515 = vmatpush1.bf16.msra.mxu1 %v5140_v48  ;;  %v7998_v48 = vld [vmem:[#allocation5 + $0x98] sm:$0xff]  }
 0xbd8   : > { %5516 = vmatprep.subr.bf16.mxu1 %v5145_v26  ;;  %v7999_v26 = vld [vmem:[#allocation5 + $0xe0] sm:$0xff]  }
 0xbdb   : > { %5517 = vmatpush1.bf16.msra.mxu1 %v5144_v4  ;;  %v8002_v4 = vld [vmem:[#allocation5 + $0xa8] sm:$0xff]  }
 0xbdc   : > { %5518 = vmatprep.subr.bf16.mxu1 %v5149_v1  ;;  %v8003_v1 = vld [vmem:[#allocation5 + $0xf0] sm:$0xff]  }
 0xbdd   : > { %v4775_v33 = vpop.f32.mrb[102].mxu1 }
 0xbde   : > { %v4776_v46 = vadd.f32 1e-05, %v4775_v33  ;;  %v7408_v47 = vpop.f32.mrb[103].mxu1  ;;  %v8006_v33 = vld [vmem:[#allocation5 + $0xb8] sm:$0xff]  }
 0xbdf   : > { %5519 = vmatpush1.bf16.msra.mxu1 %v5148_v23  ;;  %v8005_v23 = vld [vmem:[#allocation5 + $0xf8] sm:$0xff]  }
 0xbe0   : > { %8021 = vrsqrt.f32 %v4776_v46  ;;  %5520 = vmatprep.subr.bf16.mxu1 %v5153_v7 }
 0xbe3   : > { %5521 = vmatpush1.bf16.msra.mxu1 %v5152_v3 }
 0xbe4   : > { %5522 = vmatprep.subr.bf16.mxu1 %v5157_v6  ;;  %v5560_v6 = vsub.s32 2, %v8848_v14 }
 0xbe6   : > { %v5586_v20 = vrot.slane %v9771_v58, %v5560_v6 }
 0xbe7   : > { %5523 = vmatpush1.bf16.msra.mxu1 %v5156_v9  ;;  %v5561_v9 = vrot.slane %v9769_v57, %v5560_v6 }
 0xbe8   : > { %5524 = vmatprep.subr.bf16.mxu1 %v5161_v52  ;;  %v5565_v52 = vrot.slane %v9769_v57, %v5564_v28 }
 0xbea   : > { %v8022_v31 = vpop.eup %8021 }
 0xbeb   : > { %v4783_v50 = vrot.slane %v8022_v31, %v8851_v15  ;;  %5525 = vmatpush1.bf16.msra.mxu1 %v5160_v8  ;;  %v5173_v15 = vunpack.c.h.s8.bf16 %v4925_v45 }
 0xbec   : > { %5526 = vmatprep.subr.bf16.mxu1 %v5165_v11  ;;  %v5590_v11 = vrot.slane %v9771_v58, %v5564_v28 }
 0xbed   : > { %v4784_v10 = vmul.f32 %v4783_v50, %v9663_v51  ;;  %v4785_v19 = vmul.f32 %v4783_v50, %v9666_v60  ;;  %v5172_v51 = vunpack.c.h.s8.bf16 %v4924_v25  ;;  %v5177_v60 = vunpack.c.l.s8.bf16 %v4929_v27 }
 0xbef   : > { %v4790_v21 = vmul.f32 %v6574_v17, %v4784_v10  ;;  %v4791_v34 = vmul.f32 %v6574_v17, %v4785_v19  ;;  %5527 = vmatpush1.bf16.msra.mxu1 %v5164_v16 }
 0xbf0   : > { %5528 = vmatprep.subr.bf16.mxu1 %v5169_v24 }
 0xbf1   : > { %v4796_v61 = vadd.f32 %v6575_v12, %v4790_v21  ;;  %v4797_v29 = vadd.f32 %v6575_v12, %v4791_v34 }
 0xbf3   : > { %v4798_v18 = vmax.f32 %v4796_v61, 0.0  ;;  %v4799_v30 = vmax.f32 %v4797_v29, 0.0  ;;  %5529 = vmatpush1.bf16.msra.mxu1 %v5168_v22 }
 0xbf4   : > { %5530 = vmatprep.subr.bf16.mxu1 %v5173_v15 }
 0xbf5   : > { %4800 = vst [vmem:[%s9897_s30] sm:$0xff] %v4798_v18  ;;  %4801 = vst [vmem:[%s9897_s30 + $0x8] sm:$0xff] %v4799_v30  ;;  %s8147_s30 = sshll.u32 %s8231_s22, 4  ;;  %s8148_s30 = int_to_ptr.vmem [resolvable:$false] %s8147_s30 }
 0xbf6   : > { %s8149_s19 = scalar_lea.vmem %s8148_s30, 512  ;;  %p8150_p6 = scmp.lt.s32.totalorder %s9929_s21, %s8148_s30 }
 0xbf7   : > { %5531 = vmatpush1.bf16.msra.mxu1 %v5172_v51  ;;  %p8151_p9 = scmp.lt.s32.totalorder %s8149_s19, %s8143_s29 }
 0xbf8   : > { %5532 = vmatprep.subr.bf16.mxu1 %v5177_v60 }
 0xbf9   : > { %p8152_p5 = por %p8151_p9, %p8150_p6 }
 0xbfb   : > { %5533 = vmatpush1.bf16.msra.mxu1 %v5176_v32  ;;  %p8153_p10 = pnand %p8152_p5, %p8146_p1 }
 0xbfc   : > { %5534 = vmatprep.subr.bf16.mxu1 %v5181_v35 }
 0xbff   : > { %5535 = vmatpush1.bf16.msra.mxu1 %v5180_v37  ;;  %v5980_v37 = vand.u32 127, %v2576_v13  ;;  %v8010_v13 = vld [vmem:[#allocation7 + $0x18] sm:$0xff]  }
 0xc00   : > { %5536 = vmatprep.subr.bf16.mxu1 %v5185_v39 }
 0xc01   : > { %vm5981_vm3 = vcmp.lt.s32.totalorder %v5980_v37, 100 }
 0xc03   : > { %5537 = vmatpush1.bf16.msra.mxu1 %v5184_v41 }
 0xc04   : > { %5538 = vmatprep.subr.bf16.mxu1 %v5189_v43 }
 0xc07   : > { %5539 = vmatpush1.bf16.msra.mxu1 %v5188_v44 }
 0xc08   : > { %6870 = vmatprep.subr.bf16.mxu1 %v7991_v53 }
 0xc0a   : > { %5541 = vmatmul.mubr.bf16.vlgmr.msra.gmra.mrb[104].mxu1 %v9655_v55  ;;  %v8001_v55 = vld [vmem:[#allocation5 + $0xe8] sm:$0xff]  }
 0xc0b   : > { %6871 = vmatpush3.bf16.msra.mxu1 %v7992_v54 }
 0xc0c   : > { %6872 = vmatprep.subr.bf16.mxu1 %v7993_v49 }
 0xc0f   : > { %6873 = vmatpush3.bf16.msra.mxu1 %v7994_v62  ;;  %v8007_v62 = vld [vmem:[#allocation7] sm:$0xff]  }
 0xc10   : > { %6874 = vmatprep.subr.bf16.mxu1 %v7995_v0  ;;  %7410 = vmatpush3.bf16.msra.mxu0 %v8007_v62  ;;  %v8008_v0 = vld [vmem:[#allocation7 + $0x8] sm:$0xff]  }
 0xc11   : > { %7411 = vmatprep.subr.bf16.mxu0 %v8230_v38 }
 0xc13   : > { %6875 = vmatpush3.bf16.msra.mxu1 %v7996_v59  ;;  %v8009_v59 = vld [vmem:[#allocation7 + $0x10] sm:$0xff]  }
 0xc14   : > { %6876 = vmatprep.subr.bf16.mxu1 %v7997_v2  ;;  %7412 = vmatpush3.bf16.msra.mxu0 %v8008_v0 }
 0xc15   : > { %7413 = vmatprep.subr.bf16.mxu0 %v8230_v38 }
 0xc17   : > { %6877 = vmatpush3.bf16.msra.mxu1 %v7998_v48 }
 0xc18   : > { %6878 = vmatprep.subr.bf16.mxu1 %v7999_v26  ;;  %7414 = vmatpush3.bf16.msra.mxu0 %v8009_v59 }
 0xc19   : > { %7415 = vmatprep.subr.bf16.mxu0 %v8230_v38 }
 0xc1b   : > { %6879 = vmatpush3.bf16.msra.mxu1 %v8000_v56 }
 0xc1c   : > { %6880 = vmatprep.subr.bf16.mxu1 %v8001_v55  ;;  %7416 = vmatpush3.bf16.msra.mxu0 %v8010_v13  ;;  %v8011_v55 = vld [vmem:[#allocation7 + $0x20] sm:$0xff]  }
 0xc1d   : > { %7417 = vmatprep.subr.bf16.mxu0 %v8230_v38 }
 0xc1f   : > { %6881 = vmatpush3.bf16.msra.mxu1 %v8002_v4  ;;  %v8012_v4 = vld [vmem:[#allocation7 + $0x28] sm:$0xff]  }
 0xc20   : > { %6882 = vmatprep.subr.bf16.mxu1 %v8003_v1  ;;  %7418 = vmatpush3.bf16.msra.mxu0 %v8011_v55  ;;  %v8013_v1 = vld [vmem:[#allocation7 + $0x30] sm:$0xff]  }
 0xc21   : > { %7419 = vmatprep.subr.bf16.mxu0 %v8230_v38 }
 0xc23   : > { %6883 = vmatpush3.bf16.msra.mxu1 %v8004_v5  ;;  %v8014_v5 = vld [vmem:[#allocation7 + $0x38] sm:$0xff]  }
 0xc24   : > { %6884 = vmatprep.subr.bf16.mxu1 %v8005_v23  ;;  %7420 = vmatpush3.bf16.msra.mxu0 %v8012_v4 }
 0xc25   : > { %7421 = vmatprep.subr.bf16.mxu0 %v8230_v38 }
 0xc27   : > { %6885 = vmatpush3.bf16.msra.mxu1 %v8006_v33 }
 0xc28   : > { %7422 = vmatpush3.bf16.msra.mxu0 %v8013_v1 }
 0xc29   : > { %7423 = vmatprep.subr.bf16.mxu0 %v8230_v38 }
 0xc2c   : > { %7424 = vmatpush3.bf16.msra.mxu0 %v8014_v5 }
 0xc75   : > { %v6864_v7 = vpop.f32.mrb[152].mxu0 }
 0xc76   : > { %v6865_v42 = vpop.f32.mrb[153].mxu0 }
 0xc77   : > { %v6866_v46 = vadd.f32 %v6865_v42, %v6864_v7  ;;  %v6867_v47 = vpop.f32.mrb[154].mxu0 }
 0xc78   : > { %v6868_v3 = vpop.f32.mrb[155].mxu0 }
 0xc79   : > { %v5934_v41 = vadd.f32 %v6866_v46, %v6584_v36 }
 0xcdd   : > { %v5542_v8 = vpop.f32.mrb[104].mxu1 }
 0xcde   : > { %v5572_v45 = vmul.f32 %v5561_v9, %v5542_v8  ;;  %v5544_v31 = vpop.f32.mrb[105].mxu1 }
 0xcdf   : > { %v5573_v50 = vmul.f32 %v5565_v52, %v5544_v31  ;;  %v5546_v16 = vpop.f32.mrb[106].mxu1 }
 0xce0   : > { %v5597_v17 = vadd.f32 %v5586_v20, %v5572_v45  ;;  %v5547_v24 = vpop.f32.mrb[107].mxu1 }
 0xce1   : > { %v5598_v25 = vadd.f32 %v5590_v11, %v5573_v50 }
 0xce2   : > { %v5605_v10 = vmul.f32 0.044715, %v5597_v17  ;;  %v5601_v27 = vmul.f32 0.5, %v5597_v17 }
 0xce3   : > { %v5606_v19 = vmul.f32 0.044715, %v5598_v25  ;;  %v5602_v30 = vmul.f32 0.5, %v5598_v25 }
 0xce4   : > { %v5609_v12 = vmul.f32 %v5605_v10, %v5597_v17 }
 0xce5   : > { %v5610_v14 = vmul.f32 %v5606_v19, %v5598_v25 }
 0xce6   : > { %v5613_v21 = vmul.f32 %v5609_v12, %v5597_v17 }
 0xce7   : > { %v5614_v34 = vmul.f32 %v5610_v14, %v5598_v25 }
 0xce8   : > { %v5617_v22 = vadd.f32 %v5613_v21, %v5597_v17 }
 0xce9   : > { %v5618_v57 = vadd.f32 %v5614_v34, %v5598_v25 }
 0xcea   : > { %v5621_v15 = vmul.f32 0.7978846, %v5617_v22 }
 0xceb   : > { %v5622_v61 = vmul.f32 0.7978846, %v5618_v57 }
 0xcec   : > { %8023 = vtanh.f32 %v5621_v15 }
 0xced   : > { %8025 = vtanh.f32 %v5622_v61 }
 0xcf6   : > { %v8024_v58 = vpop.eup %8023 }
 0xcf7   : > { %v8026_v29 = vpop.eup %8025  ;;  %v5629_v18 = vadd.f32 1.0, %v8024_v58 }
 0xcf8   : > { %v5630_v51 = vadd.f32 1.0, %v8026_v29 }
 0xcf9   : > { %v5633_v60 = vmul.f32 %v5629_v18, %v5601_v27 }
 0xcfa   : > { %v5634_v63 = vmul.f32 %v5630_v51, %v5602_v30 }
 0xcfb   : > { %v5637_v35 = vpack.c.bf16 %v5633_v60, %v5633_v60 }
 0xcfc   : > { %v5638_v32 = vpack.c.bf16 %v5634_v63, %v5634_v63 }
 0xcfe   : > { %5971 = vmatprep.mubr.bf16.mxu1 %v5638_v32 }
 0xcff   : > { %5972 = vmatmul.mubr.bf16.vlgmr.msra.gmra.mrb[108].mxu1 %v5637_v35 }
 0xdd2   : > { %v6886_v39 = vpop.f32.mrb[108].mxu1 }
 0xdd3   : > { %v6887_v40 = vpop.f32.mrb[109].mxu1 }
 0xdd4   : > { %v6888_v43 = vadd.f32 %v6887_v40, %v6886_v39  ;;  %v6889_v44 = vpop.f32.mrb[110].mxu1 }
 0xdd5   : > { %v6890_v53 = vpop.f32.mrb[111].mxu1 }
 0xdd6   : > { %v5974_v54 = vadd.f32 %v6888_v43, %v5934_v41 }
 0xdd8   : > { %v5982_v49 = vsel %vm5981_vm3, %v5974_v54, -1e+30 }
 0xdd9   : > { %5983 = vmax.xlane.f32.xlu0 %v5982_v49 }
 0xe66   : > { %v5984_v2 = vpop.xlane.xlu0 %5983 }
 0xe67   : > { %v5985_v48 = vsub.f32 %v5982_v49, %v5984_v2 }
 0xe69   : > { %v5986_v26 = vmul.f32 1.442695, %v5985_v48 }
 0xe6b   : > { %8027 = vpow2.f32 %v5986_v26 }
 0xe75   : > { %v8028_v56 = vpop.eup %8027 }
 0xe76   : > { %5988 = vadd.xlane.f32.xlu0 %v8028_v56 }
 0xf03   : > { %v5989_v23 = vpop.xlane.xlu0 %5988 }
 0xf04   : > { %8029 = vrcp.f32 %v5989_v23 }
 0xf0e   : > { %v8030_v7 = vpop.eup %8029 }
 0xf0f   : > { %v5991_v42 = vmul.f32 %v8030_v7, %v8028_v56 }
 0xf11   : > { %v5992_v33 = vpack.c.bf16 %v5991_v42, %v5991_v42 }
 0xf13   : > { %7426 = vmatmul.mubr.bf16.vlgmr.msra.gmra.mrb[156].mxu0 %v5992_v33 }
 0xf14   : > { %8156 = shalt.err (!%p8153_p10)
}
 0xf15   : > { %s8157_s16 = scalar_lea.hbm %s9927_s14, 256  ;;  %s8161_s27 = scalar_lea.hbm %s10035_s3, 512 }
 0xf16   : > { %p8158_p0 = scmp.ne.s32.totalorder %s9927_s14, %s8157_s16  ;;  %p8162_p4 = scmp.lt.u32.totalorder %s9927_s14, %s10035_s3 }
 0xf17   : > { %p8163_p12 = scmp.lt.u32.totalorder %s8161_s27, %s8157_s16  ;;  %p8165_p8 = scmp.lt.u32.totalorder %s8157_s16, %s9927_s14 }
 0xf18   : > { %p8159_p2 = pnand %p8158_p0, %p10036_p11 }
 0xf19   : > { %p8164_p7 = por %p8163_p12, %p8162_p4 }
 0xf1a   : > { %p8160_p3 = pneg %p8159_p2 }
 0xf1b   : > { %p8166_p13 = por %p8165_p8, %p8164_p7 }
 0xf1d   : > { %p8167_p1 = pnand %p8166_p13, %p8160_p3 }
 0xf1f   : > { %8170 = shalt.err (!%p8167_p1)
}
 0xf20   : > { %s8232_s26 = smov 128   ;;  %s8233_s29 = smov 8  }
 0xf21   : > { %7669 = dma.vmem_to_hbm [thread:$0]  (%p10036_p11), %s9929_s21, 256, %s9927_s14, %s9933_s28, %s8232_s26, %s8232_s26, %s8233_s29  }
 0xf22   : > { %s10037_s19 = sld [smem:[#allocation25_spill]] }
 0xf28   : > { %s620_s24 = scalar_lea.vmem %s10037_s19, %s6632_s20 }
 0xfe6   : > { %v6091_v38 = vpop.f32.mrb[156].mxu0 }
 0xfe7   : > { %6097 = vst [vmem:[%s620_s24] sm:$0xff] %v6091_v38  ;;  %v7427_v46 = vpop.f32.mrb[157].mxu0 }
 0xfe8   : > { %v6094_v47 = vpop.f32.mrb[158].mxu0 }
 0xfe9   : > { %v7428_v3 = vpop.f32.mrb[159].mxu0 }
 0xfea PF: > { %s10038_s16 = sld [smem:[#allocation18_spill]]  ;;  %s10039_s25 = sld [smem:[#allocation15_spill]] }
 0xfeb   : > { %s10040_s27 = sld [smem:[#allocation22_spill]] }
 0xff0   : > { %p7696_p6 = scmp.ge.s32.totalorder %s10038_s16, 2  ;;  %s6134_s17 = sand.u32 1, %s10039_s25  }
 0xff1   : > { %p10041_p9 = scmp.ne.s32.totalorder %s10040_s27, 0  ;;  %s6135_s18 = scalar_lea.sflag [#allocation4], %s6134_s17 }
 0xff3   : > { %p7685_p5 = pnand %p7696_p6, %p10041_p9 }
 0xff5   : > { %8200 = dma.done.wait (!%p7685_p5), %s6135_s18, 256  }
 0xff6   : > { %8202 = vsyncadd (!%p7685_p5), %s6135_s18, 4294967040  ;;  %s10042_s21 = sld [smem:[#allocation19_spill]]  ;;  %s10043_s18 = sld [smem:[#allocation16_spill]] }
 0xff7   : > { %s10044_s19 = sld [smem:[#allocation17_spill]]  ;;  %s10045_s20 = sld [smem:[#allocation20_spill]] }
 0xffc   : > { %p29_p11 = scmp.ge.s32.totalorder %s10042_s21, 4  }
 0xffe   :  { %31 = sbr.rel (!%p29_p11) target bundleno = 10 (0xa), region = 150 }
0x1005   :  { %6147 = vsyncpa [#allocation3], 1 }
0x1006   :  { %6149 = vsyncpa [#allocation3 + $0x1], 1 }
0x1007   :  { %6150 = vsyncpa [#allocation6], 1 }
0x1008   :  { %6151 = vsyncpa [#allocation9], 1 }
0x1009   :  { %6152 = vsyncpa [#allocation4], 1 }
0x100a   :  { %6154 = vsyncpa [#allocation4 + $0x1], 1 }

</bundles_post_ra>
